<compile_context>
chip_gen: v7x
topology: tpu7x:2x2x1
jax: 0.10.0
libtpu: 0.0.40
codegen_flags: <defaults>
</compile_context>

<pallas_src>
import functools
import math

import jax
import jax.numpy as jnp
from jax.experimental import pallas as pl
from jax.experimental.pallas import tpu as pltpu


def _round_up(x, m):
    return (x + m - 1) // m * m


@functools.lru_cache(maxsize=None)
def _vmem_policy():
    """(per-step tile budget bytes, scoped vmem_limit_bytes) — generation aware.

    v7x: 64 MiB VMEM / TC  -> ~8 MiB tiles, 32 MiB scoped limit.
    v5e/v6e: 128 MiB VMEM  -> ~20 MiB tiles, 48 MiB scoped limit (bigger row tiles
    reach the HBM roofline sooner on the big spatial layers)."""
    try:
        vmem = pltpu.get_tpu_info().vmem_capacity_bytes
    except Exception:
        vmem = 64 * 1024 * 1024  # conservative default (v7x-sized)
    if vmem > 64 * 1024 * 1024:
        return 20 * 1024 * 1024, 48 * 1024 * 1024
    return 8 * 1024 * 1024, 32 * 1024 * 1024


# ----------------------------------------------------------------------------
# Fused Pallas kernel:  out = act( sum_i x_i @ w_i + shift )  [ @ wf + bf ]
# ----------------------------------------------------------------------------
def _apply_act(acc, act):
    if act == "relu":
        return jnp.maximum(acc, 0.0)
    if act == "leakyrelu":
        return jnp.where(acc >= 0.0, acc, 0.2 * acc)     # reference uses LeakyReLU(0.2)
    if act == "elu":
        return jnp.where(acc >= 0.0, acc, jnp.exp(jnp.minimum(acc, 0.0)) - 1.0)
    if act == "none":
        return acc
    raise ValueError("Unsupported activation")


def _fused_kernel(*refs, act, n_in, fuse_final):
    o_ref = refs[-1]
    pos = 0
    acc = None
    for _ in range(n_in):
        x_ref, w_ref = refs[pos], refs[pos + 1]
        pos += 2
        part = jnp.dot(x_ref[...], w_ref[...], preferred_element_type=jnp.float32)
        acc = part if acc is None else acc + part
    acc = acc + refs[pos][...]          # (1, N) shift = conv bias + folded BN (eval)
    pos += 1
    acc = _apply_act(acc, act)
    if fuse_final:
        # Fused final 1x1 conv: second MXU stage in bf16 (f32 accumulation).
        wf_ref, bf_ref = refs[pos], refs[pos + 1]
        acc = jnp.dot(acc.astype(jnp.bfloat16), wf_ref[...],
                      preferred_element_type=jnp.float32) + bf_ref[...]
    o_ref[...] = acc.astype(o_ref.dtype)


def _choose_tm(M, K_total, N_pad, N_out_pad, fuse_final, out_bytes, budget):
    """Row-tile size (multiple of 16).

    VMEM per grid step accounted as:
      per-row : 2x double-buffered bf16 X tiles (2*2*K_total)
                + double-buffered output tile  (2*out_bytes*N_out_pad)
                + f32 accumulator              (4*N_pad)
                [+ f32 second-stage accumulator 4*N_out_pad when fuse_final]
      fixed   : resident bf16 weights (2*K_total*N_pad) + f32 shift (4*N_pad)
                [+ bf16 Wf (2*N_pad*N_out_pad) + f32 bf (4*N_out_pad) when fuse_final]

    TM is additionally capped so the M-grid has >=4 steps for M>=64 and >=2 steps
    for M>=32: multi-step grids give DMA/compute pipelining and (v7x) megacore
    sharding; per-step overhead is only ~0.35 us so the extra steps are free."""
    per_row = 2 * 2 * K_total + 2 * out_bytes * N_out_pad + 4 * N_pad
    fixed = 2 * K_total * N_pad + 4 * N_pad
    if fuse_final:
        per_row += 4 * N_out_pad
        fixed += 2 * N_pad * N_out_pad + 4 * N_out_pad
    tm_budget = max(16, (budget - fixed) // max(per_row, 1))

    M16 = _round_up(M, 16)
    if M16 >= 64:
        tm_cap = M16 // 4
    elif M16 >= 32:
        tm_cap = M16 // 2
    else:
        tm_cap = M16
    tm = min(tm_budget, tm_cap, 1024)
    return max(16, (tm // 16) * 16)


def fused_matmul(xw_pairs, shift, act="none", final=None, out_dtype=jnp.bfloat16):
    """out = act(sum_i x_i @ w_i + shift)   (optionally followed by @ wf + bf).

    xw_pairs: list of (x (M, K_i), w (K_i, N)); shift: (N,);
    final: optional (wf (N, NF), bf (NF,)).  Returns (M, N) (or (M, NF)) in out_dtype.
    Correctness of the fused-final path relies on act(0) == 0 for the padded columns
    (true for relu / leakyrelu / elu)."""
    M = xw_pairs[0][0].shape[0]
    N = xw_pairs[0][1].shape[1]
    N_pad = _round_up(max(N, 128), 128)                 # lane-dense output columns

    if final is not None:
        NF = final[0].shape[1]
        N_out, N_out_pad = NF, _round_up(max(NF, 128), 128)
    else:
        N_out, N_out_pad = N, N_pad

    K_total = sum(x.shape[1] for x, _ in xw_pairs)
    out_bytes = jnp.dtype(out_dtype).itemsize
    tile_budget, vmem_limit = _vmem_policy()
    TM = _choose_tm(M, K_total, N_pad, N_out_pad, final is not None, out_bytes,
                    tile_budget)
    M_pad = _round_up(M, TM)
    n_steps = M_pad // TM

    operands, in_specs = [], []
    for x, w in xw_pairs:
        K = x.shape[1]
        xp = jnp.pad(x.astype(jnp.bfloat16), ((0, M_pad - M), (0, 0)))
        wp = jnp.pad(w.astype(jnp.bfloat16), ((0, 0), (0, N_pad - N)))
        operands += [xp, wp]
        in_specs += [pl.BlockSpec((TM, K), lambda i: (i, 0)),
                     pl.BlockSpec((K, N_pad), lambda i: (0, 0))]
    sp = jnp.pad(shift.astype(jnp.float32), (0, N_pad - N)).reshape(1, N_pad)
    operands.append(sp)
    in_specs.append(pl.BlockSpec((1, N_pad), lambda i: (0, 0)))

    if final is not None:
        wf, bf = final
        wfp = jnp.pad(wf.astype(jnp.bfloat16),
                      ((0, N_pad - N), (0, N_out_pad - N_out)))
        bfp = jnp.pad(bf.astype(jnp.float32), (0, N_out_pad - N_out)).reshape(1, N_out_pad)
        operands += [wfp, bfp]
        in_specs += [pl.BlockSpec((N_pad, N_out_pad), lambda i: (0, 0)),
                     pl.BlockSpec((1, N_out_pad), lambda i: (0, 0))]

    kern = functools.partial(_fused_kernel, act=act, n_in=len(xw_pairs),
                             fuse_final=final is not None)
    y = pl.pallas_call(
        kern,
        out_shape=jax.ShapeDtypeStruct((M_pad, N_out_pad), out_dtype),
        grid=(n_steps,),
        in_specs=in_specs,
        out_specs=pl.BlockSpec((TM, N_out_pad), lambda i: (i, 0)),
        compiler_params=pltpu.CompilerParams(
            dimension_semantics=("parallel",),          # megacore-shard the M row tiles
            vmem_limit_bytes=vmem_limit),
    )(*operands)
    return y[:M, :N_out]


# ----------------------------------------------------------------------------
# JAX glue: im2col patch extraction (layout plumbing only, no FLOPs)
# ----------------------------------------------------------------------------
def _im2col(x, kh, kw, stride, pad_t, pad_b, pad_l, pad_r):
    """x: (B,H,W,C) -> ((B*OH*OW, kh*kw*C), OH, OW); column order = (kh, kw, C)."""
    x = jnp.pad(x, ((0, 0), (pad_t, pad_b), (pad_l, pad_r), (0, 0)))
    B, Hp, Wp, C = x.shape
    OH = (Hp - kh) // stride + 1
    OW = (Wp - kw) // stride + 1
    cols = []
    for i in range(kh):
        for j in range(kw):
            cols.append(x[:, i:i + stride * OH:stride, j:j + stride * OW:stride, :])
    patches = jnp.concatenate(cols, axis=-1)
    return patches.reshape(B * OH * OW, kh * kw * C), OH, OW


def _conv_w_matrix(w):
    """(Cout, Cin, kh, kw) -> (kh*kw*Cin, Cout), rows ordered (kh, kw, Cin)."""
    Cout, Cin, kh, kw = w.shape
    return jnp.transpose(w, (2, 3, 1, 0)).reshape(kh * kw * Cin, Cout)


def bn_affine(gamma, beta, rmean, rvar, eps=1e-5):
    scale = gamma / jnp.sqrt(rvar + eps)
    shift = beta - rmean * scale
    return scale, shift


# ----------------------------------------------------------------------------
# Layers
# ----------------------------------------------------------------------------
def encoder_block(x, enc, act):
    """Conv(k,s,p) + BatchNorm(eval) + act, with BN folded into the matmul weights."""
    w, b = enc["w"], enc["b"]
    Cout, _, kh, kw = w.shape
    scale, shift = bn_affine(**enc["bn"])
    wm = _conv_w_matrix(w) * scale[None, :]
    sv = b * scale + shift
    p = enc["pad"]
    xc, OH, OW = _im2col(x, kh, kw, enc["stride"], p, p, p, p)
    y = fused_matmul([(xc, wm)], sv, act, out_dtype=jnp.bfloat16)
    return y.reshape(x.shape[0], OH, OW, Cout)


def conv_transpose_2x(x, w, b):
    """ConvTranspose2d(k=3, s=2, p=1, output_padding=1) + bias via sub-pixel phase
    decomposition: one (4*Cin -> 4*Cout) matmul on 2x2 patches of the undilated input,
    then a phase interleave (no zero-dilated tensor, no wasted zero MACs)."""
    Cin, Cout, kh, kw = w.shape
    B, H, W, _ = x.shape
    xc, _, _ = _im2col(x, 2, 2, 1, 0, 1, 0, 1)        # taps [t00, t01, t10, t11]
    wt = jnp.transpose(w, (2, 3, 0, 1))               # wt[a, b] = (Cin, Cout)
    Z = jnp.zeros((Cin, Cout), w.dtype)
    # output phase (r,s) lands at (2i+r, 2j+s); columns = [p00 | p01 | p10 | p11]
    col00 = jnp.concatenate([wt[1, 1], Z, Z, Z], axis=0)
    col01 = jnp.concatenate([wt[1, 2], wt[1, 0], Z, Z], axis=0)
    col10 = jnp.concatenate([wt[2, 1], Z, wt[0, 1], Z], axis=0)
    col11 = jnp.concatenate([wt[2, 2], wt[2, 0], wt[0, 2], wt[0, 0]], axis=0)
    w_all = jnp.concatenate([col00, col01, col10, col11], axis=1)   # (4*Cin, 4*Cout)
    sv = jnp.tile(b, 4)
    y = fused_matmul([(xc, w_all)], sv, "none", out_dtype=jnp.bfloat16)
    # TODO(synk): the phase interleave below still round-trips through HBM once; writing
    #             the 4 phases interleaved via an out_specs index_map (grid over
    #             (row-tile, phase)) would remove that read+write per decoder level.
    y = y.reshape(B, H, W, 2, 2, Cout)                # (..., r, s, Cout)
    return jnp.transpose(y, (0, 1, 3, 2, 4, 5)).reshape(B, 2 * H, 2 * W, Cout)


def conv_transpose_general(x, w, b, stride, pad, output_padding):
    """Generic ConvTranspose2d via zero-dilation (fallback for non-default conv_params)."""
    Cin, Cout, kh, kw = w.shape
    B, H, W, _ = x.shape
    xd = jnp.zeros((B, (H - 1) * stride + 1, (W - 1) * stride + 1, Cin), x.dtype)
    xd = xd.at[:, ::stride, ::stride, :].set(x)
    lo = kh - 1 - pad
    hi = kh - 1 - pad + output_padding
    w_eff = jnp.transpose(jnp.flip(w, axis=(2, 3)), (1, 0, 2, 3))   # (Cout, Cin, kh, kw)
    xc, OH, OW = _im2col(xd, kh, kw, 1, lo, hi, lo, hi)
    y = fused_matmul([(xc, _conv_w_matrix(w_eff))], b, "none", out_dtype=jnp.bfloat16)
    return y.reshape(B, OH, OW, Cout)


def avg_pool_2x(x):
    """F.interpolate(bilinear, align_corners=False) for an exact /2 downsample
    == 2x2 average pooling; pure layout/VPU work, no Pallas dispatch needed."""
    B, H, W, C = x.shape
    y = x.astype(jnp.float32).reshape(B, H // 2, 2, W // 2, 2, C).mean(axis=(2, 4))
    return y.astype(x.dtype)


def decoder_block(a, skip, dec, act, final=None):
    """Conv3x3(s1,p1) over concat([a, skip], ch) + BN(eval) + act WITHOUT materializing
    the concat (split-K two-operand matmul).  Optionally fuses the final 1x1 conv."""
    wc, bc = dec["wc"], dec["bc"]
    Cout = wc.shape[0]
    Ca = a.shape[-1]
    scale, shift = bn_affine(**dec["bn"])
    wa = _conv_w_matrix(wc[:, :Ca]) * scale[None, :]
    ws = _conv_w_matrix(wc[:, Ca:]) * scale[None, :]
    sv = bc * scale + shift
    B = a.shape[0]
    ac, OH, OW = _im2col(a, 3, 3, 1, 1, 1, 1, 1)
    sc, _, _ = _im2col(skip, 3, 3, 1, 1, 1, 1, 1)
    if final is not None:
        wf, bf = final                       # final 1x1 conv: (NF, Cout, 1, 1)
        NF = wf.shape[0]
        wfm = wf.reshape(NF, -1).T           # (Cout, NF)
        y = fused_matmul([(ac, wa), (sc, ws)], sv, act, final=(wfm, bf),
                         out_dtype=jnp.bfloat16)   # bf16 write; upcast after slice
        return y.reshape(B, OH, OW, NF)
    y = fused_matmul([(ac, wa), (sc, ws)], sv, act, out_dtype=jnp.bfloat16)
    return y.reshape(B, OH, OW, Cout)


# ----------------------------------------------------------------------------
# Deterministic parameter init (mirrors ColorizationNet.__init__ shapes)
# ----------------------------------------------------------------------------
def init_params(key, input_channels=1, output_channels=3, base_filters=8,
                num_layers=4, conv_params=None):
    if conv_params is None:
        conv_params = [{"kernel": 3, "stride": 2, "padding": 1}] * num_layers
    assert len(conv_params) == num_layers
    keys = iter(jax.random.split(key, 4 * (4 * num_layers + 1) + 8))

    def conv_init(cout, cin, kh, kw):
        bound = 1.0 / math.sqrt(cin * kh * kw)
        w = jax.random.uniform(next(keys), (cout, cin, kh, kw), jnp.float32, -bound, bound)
        b = jax.random.uniform(next(keys), (cout,), jnp.float32, -bound, bound)
        return w, b

    def convt_init(cin, cout, kh, kw):
        bound = 1.0 / math.sqrt(cout * kh * kw)
        w = jax.random.uniform(next(keys), (cin, cout, kh, kw), jnp.float32, -bound, bound)
        b = jax.random.uniform(next(keys), (cout,), jnp.float32, -bound, bound)
        return w, b

    def bn_init(c):  # PyTorch defaults (eval mode uses running stats)
        return dict(gamma=jnp.ones((c,), jnp.float32), beta=jnp.zeros((c,), jnp.float32),
                    rmean=jnp.zeros((c,), jnp.float32), rvar=jnp.ones((c,), jnp.float32))

    params = {"encoder": [], "decoder": []}
    skip_channels = []
    in_ch, filters = input_channels, base_filters
    for i in range(num_layers):
        p = conv_params[i]
        w, b = conv_init(filters, in_ch, p["kernel"], p["kernel"])
        params["encoder"].append(dict(w=w, b=b, bn=bn_init(filters),
                                      stride=p["stride"], pad=p["padding"]))
        skip_channels.append(filters)
        in_ch = filters
        filters *= 2
    for i in reversed(range(num_layers)):
        p = conv_params[i]
        skip_ch = skip_channels[i]
        wt, bt = convt_init(in_ch, skip_ch, p["kernel"], p["kernel"])
        wc, bc = conv_init(skip_ch, skip_ch * 2, 3, 3)
        params["decoder"].append(dict(wt=wt, bt=bt, t_stride=p["stride"], t_pad=p["padding"],
                                      t_kernel=p["kernel"], wc=wc, bc=bc, bn=bn_init(skip_ch)))
        in_ch = skip_ch
    wf, bf = conv_init(output_channels, in_ch, 1, 1)
    params["final"] = dict(w=wf, b=bf)
    return params


# ----------------------------------------------------------------------------
# Forward pass (matches ColorizationNet.forward, eval mode)
# ----------------------------------------------------------------------------
def colorization_net_forward(params, x_nchw, activation="relu"):
    x = jnp.transpose(x_nchw, (0, 2, 3, 1)).astype(jnp.float32)  # NCHW -> NHWC
    skips = []
    out = x
    for enc in params["encoder"]:
        out = encoder_block(out, enc, activation)
        # Dropout: eval-mode identity.
        skips.append(out)
    n_dec = len(params["decoder"])
    for i, dec in enumerate(params["decoder"]):
        skip = skips[-(i + 1)]
        if dec["t_kernel"] == 3 and dec["t_stride"] == 2 and dec["t_pad"] == 1:
            out = conv_transpose_2x(out, dec["wt"], dec["bt"])
        else:
            out = conv_transpose_general(out, dec["wt"], dec["bt"],
                                         dec["t_stride"], dec["t_pad"], 1)
        if out.shape[1:3] != skip.shape[1:3]:
            assert out.shape[1] == 2 * skip.shape[1] and out.shape[2] == 2 * skip.shape[2]
            out = avg_pool_2x(out)   # == F.interpolate(bilinear, align_corners=False)
        final = None
        if i == n_dec - 1:           # fuse the final 1x1 conv into the last decoder conv
            final = (params["final"]["w"], params["final"]["b"])
        out = decoder_block(out, skip, dec, activation, final=final)
        # Dropout: eval-mode identity.
    return jnp.transpose(out, (0, 3, 1, 2)).astype(jnp.float32)  # NHWC -> NCHW (f32)


# ----------------------------------------------------------------------------
# Pure-JAX (lax.conv) f32 reference — numerical parity check for BN folding,
# split-K concat, the conv-transpose phase mapping and the fused final 1x1.
# ----------------------------------------------------------------------------
def _reference_forward(params, x_nchw, activation="relu"):
    def act(v):
        if activation == "relu":
            return jnp.maximum(v, 0.0)
        if activation == "leakyrelu":
            return jnp.where(v >= 0.0, v, 0.2 * v)
        if activation == "elu":
            return jnp.where(v >= 0.0, v, jnp.exp(jnp.minimum(v, 0.0)) - 1.0)
        raise ValueError("Unsupported activation")

    def conv(x, w, b, stride, pad):
        y = jax.lax.conv_general_dilated(
            x, jnp.transpose(w, (2, 3, 1, 0)), (stride, stride),
            [(pad, pad), (pad, pad)], dimension_numbers=("NHWC", "HWIO", "NHWC"))
        return y + b

    def bn(x, p, eps=1e-5):
        return (x - p["rmean"]) / jnp.sqrt(p["rvar"] + eps) * p["gamma"] + p["beta"]

    def convt(x, w, b, stride, pad, op):
        k = w.shape[2]
        w_eff = jnp.transpose(jnp.flip(w, (2, 3)), (1, 0, 2, 3))
        y = jax.lax.conv_general_dilated(
            x, jnp.transpose(w_eff, (2, 3, 1, 0)), (1, 1),
            [(k - 1 - pad, k - 1 - pad + op)] * 2, lhs_dilation=(stride, stride),
            dimension_numbers=("NHWC", "HWIO", "NHWC"))
        return y + b

    x = jnp.transpose(x_nchw, (0, 2, 3, 1)).astype(jnp.float32)
    skips = []
    out = x
    for enc in params["encoder"]:
        out = act(bn(conv(out, enc["w"], enc["b"], enc["stride"], enc["pad"]), enc["bn"]))
        skips.append(out)
    for i, dec in enumerate(params["decoder"]):
        skip = skips[-(i + 1)]
        out = convt(out, dec["wt"], dec["bt"], dec["t_stride"], dec["t_pad"], 1)
        if out.shape[1:3] != skip.shape[1:3]:
            B, H, W, C = out.shape
            out = out.reshape(B, H // 2, 2, W // 2, 2, C).mean(axis=(2, 4))
        out = jnp.concatenate([out, skip], axis=-1)
        out = act(bn(conv(out, dec["wc"], dec["bc"], 1, 1), dec["bn"]))
    out = conv(out, params["final"]["w"], params["final"]["b"], 1, 0)
    return jnp.transpose(out, (0, 3, 1, 2))


if __name__ == "__main__":
    B, C_IN, H, W = 2, 1, 32, 32
    x = jax.random.normal(jax.random.PRNGKey(0), (B, C_IN, H, W), jnp.float32)
    params = init_params(jax.random.PRNGKey(42),
                         input_channels=C_IN, output_channels=3,
                         base_filters=8, num_layers=4)
    fwd = jax.jit(functools.partial(colorization_net_forward, params, activation="relu"))
    y = jax.block_until_ready(fwd(x))
    # Architecture quirk of the reference module: output spatial = input / 2.
    assert y.shape == (B, 3, H // 2, W // 2), y.shape
    assert bool(jnp.all(jnp.isfinite(y)))

    # Numerical parity vs pure-JAX f32 reference (loose tolerance: the Pallas path
    # stores bf16 activations between layers).
    y_ref = jax.block_until_ready(
        jax.jit(functools.partial(_reference_forward, params, activation="relu"))(x))
    max_ref = float(jnp.max(jnp.abs(y_ref)))
    max_err = float(jnp.max(jnp.abs(y - y_ref)))
    assert max_err <= 0.1 * max_ref + 0.05, (max_err, max_ref)

    print("KERNEL_OK")
</pallas_src>

<mosaic_0001>
module attributes {stable_mosaic.version = 11 : i64} {
  func.func @_fused_kernel(%arg0: i32, %arg1: memref<128x9xbf16, #tpu.memory_space<vmem>>, %arg2: memref<9x128xbf16, #tpu.memory_space<vmem>>, %arg3: memref<1x128xf32, #tpu.memory_space<vmem>>, %arg4: memref<128x128xbf16, #tpu.memory_space<vmem>>) attributes {dimension_semantics = [#tpu.dimension_semantics<parallel>], iteration_bounds = array<i64: 4>, scalar_prefetch = 0 : i64, scratch_operands = 0 : i64, tpu.core_type = #tpu.core_type<tc>, window_params = [{transform_indices = @transform_0, window_bounds = array<i64: 128, 9>}, {pipeline_mode = #tpu.pipeline_mode<synchronous>, transform_indices = @transform_1, window_bounds = array<i64: 9, 128>}, {pipeline_mode = #tpu.pipeline_mode<synchronous>, transform_indices = @transform_2, window_bounds = array<i64: 1, 128>}, {transform_indices = @transform_3, window_bounds = array<i64: 128, 128>}]} {
    %c0 = arith.constant 0 : index
    %c0_0 = arith.constant 0 : index
    %0 = vector.load %arg1[%c0, %c0_0] : memref<128x9xbf16, #tpu.memory_space<vmem>>, vector<128x9xbf16>
    %c0_1 = arith.constant 0 : index
    %c0_2 = arith.constant 0 : index
    %1 = vector.load %arg2[%c0_1, %c0_2] : memref<9x128xbf16, #tpu.memory_space<vmem>>, vector<9x128xbf16>
    %cst = arith.constant dense<0.000000e+00> : vector<128x128xf32>
    %2 = tpu.matmul %0, %1, %cst {dimension_numbers = #tpu.dot_dimension_numbers<[1], [0], [0], [1], [0, 0, 1, 1], [], []>} : vector<128x9xbf16>, vector<9x128xbf16>, vector<128x128xf32> -> vector<128x128xf32>
    %c0_3 = arith.constant 0 : index
    %c0_4 = arith.constant 0 : index
    %3 = vector.load %arg3[%c0_3, %c0_4] : memref<1x128xf32, #tpu.memory_space<vmem>>, vector<1x128xf32>
    %4 = vector.broadcast %3 : vector<1x128xf32> to vector<128x128xf32>
    %5 = arith.addf %2, %4 : vector<128x128xf32>
    %cst_5 = arith.constant 0.000000e+00 : f32
    %6 = vector.broadcast %cst_5 : f32 to vector<128x128xf32>
    %7 = arith.maximumf %5, %6 : vector<128x128xf32>
    %8 = arith.truncf %7 : vector<128x128xf32> to vector<128x128xbf16>
    %c0_6 = arith.constant 0 : index
    %c0_7 = arith.constant 0 : index
    %9 = vector.load %arg4[%c0_6, %c0_7] : memref<128x128xbf16, #tpu.memory_space<vmem>>, vector<128x128xbf16>
    tpu.vector_store %arg4[%c0_6, %c0_7], %8 {strides = array<i32>} : memref<128x128xbf16, #tpu.memory_space<vmem>>, vector<128x128xbf16>,
    return
  }
  func.func @transform_0(%arg0: i32) -> (i32, i32) {
    %c0_i32 = arith.constant 0 : i32
    %c0_i32_0 = arith.constant 0 : i32
    return %arg0, %c0_i32 : i32, i32
  }
  func.func @transform_1(%arg0: i32) -> (i32, i32) {
    %c0_i32 = arith.constant 0 : i32
    %c0_i32_0 = arith.constant 0 : i32
    %c0_i32_1 = arith.constant 0 : i32
    return %c0_i32, %c0_i32_0 : i32, i32
  }
  func.func @transform_2(%arg0: i32) -> (i32, i32) {
    %c0_i32 = arith.constant 0 : i32
    %c0_i32_0 = arith.constant 0 : i32
    %c0_i32_1 = arith.constant 0 : i32
    return %c0_i32, %c0_i32_0 : i32, i32
  }
  func.func @transform_3(%arg0: i32) -> (i32, i32) {
    %c0_i32 = arith.constant 0 : i32
    %c0_i32_0 = arith.constant 0 : i32
    return %arg0, %c0_i32 : i32, i32
  }
}

module attributes {stable_mosaic.version = 11 : i64} {
  func.func @_fused_kernel(%arg0: i32, %arg1: memref<32x72xbf16, #tpu.memory_space<vmem>>, %arg2: memref<72x128xbf16, #tpu.memory_space<vmem>>, %arg3: memref<1x128xf32, #tpu.memory_space<vmem>>, %arg4: memref<32x128xbf16, #tpu.memory_space<vmem>>) attributes {dimension_semantics = [#tpu.dimension_semantics<parallel>], iteration_bounds = array<i64: 4>, scalar_prefetch = 0 : i64, scratch_operands = 0 : i64, tpu.core_type = #tpu.core_type<tc>, window_params = [{transform_indices = @transform_0, window_bounds = array<i64: 32, 72>}, {pipeline_mode = #tpu.pipeline_mode<synchronous>, transform_indices = @transform_1, window_bounds = array<i64: 72, 128>}, {pipeline_mode = #tpu.pipeline_mode<synchronous>, transform_indices = @transform_2, window_bounds = array<i64: 1, 128>}, {transform_indices = @transform_3, window_bounds = array<i64: 32, 128>}]} {
    %c0 = arith.constant 0 : index
    %c0_0 = arith.constant 0 : index
    %0 = vector.load %arg1[%c0, %c0_0] : memref<32x72xbf16, #tpu.memory_space<vmem>>, vector<32x72xbf16>
    %c0_1 = arith.constant 0 : index
    %c0_2 = arith.constant 0 : index
    %1 = vector.load %arg2[%c0_1, %c0_2] : memref<72x128xbf16, #tpu.memory_space<vmem>>, vector<72x128xbf16>
    %cst = arith.constant dense<0.000000e+00> : vector<32x128xf32>
    %2 = tpu.matmul %0, %1, %cst {dimension_numbers = #tpu.dot_dimension_numbers<[1], [0], [0], [1], [0, 0, 1, 1], [], []>} : vector<32x72xbf16>, vector<72x128xbf16>, vector<32x128xf32> -> vector<32x128xf32>
    %c0_3 = arith.constant 0 : index
    %c0_4 = arith.constant 0 : index
    %3 = vector.load %arg3[%c0_3, %c0_4] : memref<1x128xf32, #tpu.memory_space<vmem>>, vector<1x128xf32>
    %4 = vector.broadcast %3 : vector<1x128xf32> to vector<32x128xf32>
    %5 = arith.addf %2, %4 : vector<32x128xf32>
    %cst_5 = arith.constant 0.000000e+00 : f32
    %6 = vector.broadcast %cst_5 : f32 to vector<32x128xf32>
    %7 = arith.maximumf %5, %6 : vector<32x128xf32>
    %8 = arith.truncf %7 : vector<32x128xf32> to vector<32x128xbf16>
    %c0_6 = arith.constant 0 : index
    %c0_7 = arith.constant 0 : index
    %9 = vector.load %arg4[%c0_6, %c0_7] : memref<32x128xbf16, #tpu.memory_space<vmem>>, vector<32x128xbf16>
    tpu.vector_store %arg4[%c0_6, %c0_7], %8 {strides = array<i32>} : memref<32x128xbf16, #tpu.memory_space<vmem>>, vector<32x128xbf16>,
    return
  }
  func.func @transform_0(%arg0: i32) -> (i32, i32) {
    %c0_i32 = arith.constant 0 : i32
    %c0_i32_0 = arith.constant 0 : i32
    return %arg0, %c0_i32 : i32, i32
  }
  func.func @transform_1(%arg0: i32) -> (i32, i32) {
    %c0_i32 = arith.constant 0 : i32
    %c0_i32_0 = arith.constant 0 : i32
    %c0_i32_1 = arith.constant 0 : i32
    return %c0_i32, %c0_i32_0 : i32, i32
  }
  func.func @transform_2(%arg0: i32) -> (i32, i32) {
    %c0_i32 = arith.constant 0 : i32
    %c0_i32_0 = arith.constant 0 : i32
    %c0_i32_1 = arith.constant 0 : i32
    return %c0_i32, %c0_i32_0 : i32, i32
  }
  func.func @transform_3(%arg0: i32) -> (i32, i32) {
    %c0_i32 = arith.constant 0 : i32
    %c0_i32_0 = arith.constant 0 : i32
    return %arg0, %c0_i32 : i32, i32
  }
}

module attributes {stable_mosaic.version = 11 : i64} {
  func.func @_fused_kernel(%arg0: i32, %arg1: memref<16x144xbf16, #tpu.memory_space<vmem>>, %arg2: memref<144x128xbf16, #tpu.memory_space<vmem>>, %arg3: memref<1x128xf32, #tpu.memory_space<vmem>>, %arg4: memref<16x128xbf16, #tpu.memory_space<vmem>>) attributes {dimension_semantics = [#tpu.dimension_semantics<parallel>], iteration_bounds = array<i64: 2>, scalar_prefetch = 0 : i64, scratch_operands = 0 : i64, tpu.core_type = #tpu.core_type<tc>, window_params = [{transform_indices = @transform_0, window_bounds = array<i64: 16, 144>}, {pipeline_mode = #tpu.pipeline_mode<synchronous>, transform_indices = @transform_1, window_bounds = array<i64: 144, 128>}, {pipeline_mode = #tpu.pipeline_mode<synchronous>, transform_indices = @transform_2, window_bounds = array<i64: 1, 128>}, {transform_indices = @transform_3, window_bounds = array<i64: 16, 128>}]} {
    %c0 = arith.constant 0 : index
    %c0_0 = arith.constant 0 : index
    %0 = vector.load %arg1[%c0, %c0_0] : memref<16x144xbf16, #tpu.memory_space<vmem>>, vector<16x144xbf16>
    %c0_1 = arith.constant 0 : index
    %c0_2 = arith.constant 0 : index
    %1 = vector.load %arg2[%c0_1, %c0_2] : memref<144x128xbf16, #tpu.memory_space<vmem>>, vector<144x128xbf16>
    %cst = arith.constant dense<0.000000e+00> : vector<16x128xf32>
    %2 = tpu.matmul %0, %1, %cst {dimension_numbers = #tpu.dot_dimension_numbers<[1], [0], [0], [1], [0, 0, 1, 1], [], []>} : vector<16x144xbf16>, vector<144x128xbf16>, vector<16x128xf32> -> vector<16x128xf32>
    %c0_3 = arith.constant 0 : index
    %c0_4 = arith.constant 0 : index
    %3 = vector.load %arg3[%c0_3, %c0_4] : memref<1x128xf32, #tpu.memory_space<vmem>>, vector<1x128xf32>
    %4 = vector.broadcast %3 : vector<1x128xf32> to vector<16x128xf32>
    %5 = arith.addf %2, %4 : vector<16x128xf32>
    %cst_5 = arith.constant 0.000000e+00 : f32
    %6 = vector.broadcast %cst_5 : f32 to vector<16x128xf32>
    %7 = arith.maximumf %5, %6 : vector<16x128xf32>
    %8 = arith.truncf %7 : vector<16x128xf32> to vector<16x128xbf16>
    %c0_6 = arith.constant 0 : index
    %c0_7 = arith.constant 0 : index
    %9 = vector.load %arg4[%c0_6, %c0_7] : memref<16x128xbf16, #tpu.memory_space<vmem>>, vector<16x128xbf16>
    tpu.vector_store %arg4[%c0_6, %c0_7], %8 {strides = array<i32>} : memref<16x128xbf16, #tpu.memory_space<vmem>>, vector<16x128xbf16>,
    return
  }
  func.func @transform_0(%arg0: i32) -> (i32, i32) {
    %c0_i32 = arith.constant 0 : i32
    %c0_i32_0 = arith.constant 0 : i32
    return %arg0, %c0_i32 : i32, i32
  }
  func.func @transform_1(%arg0: i32) -> (i32, i32) {
    %c0_i32 = arith.constant 0 : i32
    %c0_i32_0 = arith.constant 0 : i32
    %c0_i32_1 = arith.constant 0 : i32
    return %c0_i32, %c0_i32_0 : i32, i32
  }
  func.func @transform_2(%arg0: i32) -> (i32, i32) {
    %c0_i32 = arith.constant 0 : i32
    %c0_i32_0 = arith.constant 0 : i32
    %c0_i32_1 = arith.constant 0 : i32
    return %c0_i32, %c0_i32_0 : i32, i32
  }
  func.func @transform_3(%arg0: i32) -> (i32, i32) {
    %c0_i32 = arith.constant 0 : i32
    %c0_i32_0 = arith.constant 0 : i32
    return %arg0, %c0_i32 : i32, i32
  }
}

module attributes {stable_mosaic.version = 11 : i64} {
  func.func @_fused_kernel(%arg0: i32, %arg1: memref<16x288xbf16, #tpu.memory_space<vmem>>, %arg2: memref<288x128xbf16, #tpu.memory_space<vmem>>, %arg3: memref<1x128xf32, #tpu.memory_space<vmem>>, %arg4: memref<16x128xbf16, #tpu.memory_space<vmem>>) attributes {dimension_semantics = [#tpu.dimension_semantics<parallel>], iteration_bounds = array<i64: 1>, scalar_prefetch = 0 : i64, scratch_operands = 0 : i64, tpu.core_type = #tpu.core_type<tc>, window_params = [{transform_indices = @transform_0, window_bounds = array<i64: 16, 288>}, {pipeline_mode = #tpu.pipeline_mode<synchronous>, transform_indices = @transform_1, window_bounds = array<i64: 288, 128>}, {pipeline_mode = #tpu.pipeline_mode<synchronous>, transform_indices = @transform_2, window_bounds = array<i64: 1, 128>}, {transform_indices = @transform_3, window_bounds = array<i64: 16, 128>}]} {
    %c0 = arith.constant 0 : index
    %c0_0 = arith.constant 0 : index
    %0 = vector.load %arg1[%c0, %c0_0] : memref<16x288xbf16, #tpu.memory_space<vmem>>, vector<16x288xbf16>
    %c0_1 = arith.constant 0 : index
    %c0_2 = arith.constant 0 : index
    %1 = vector.load %arg2[%c0_1, %c0_2] : memref<288x128xbf16, #tpu.memory_space<vmem>>, vector<288x128xbf16>
    %cst = arith.constant dense<0.000000e+00> : vector<16x128xf32>
    %2 = tpu.matmul %0, %1, %cst {dimension_numbers = #tpu.dot_dimension_numbers<[1], [0], [0], [1], [0, 0, 1, 1], [], []>} : vector<16x288xbf16>, vector<288x128xbf16>, vector<16x128xf32> -> vector<16x128xf32>
    %c0_3 = arith.constant 0 : index
    %c0_4 = arith.constant 0 : index
    %3 = vector.load %arg3[%c0_3, %c0_4] : memref<1x128xf32, #tpu.memory_space<vmem>>, vector<1x128xf32>
    %4 = vector.broadcast %3 : vector<1x128xf32> to vector<16x128xf32>
    %5 = arith.addf %2, %4 : vector<16x128xf32>
    %cst_5 = arith.constant 0.000000e+00 : f32
    %6 = vector.broadcast %cst_5 : f32 to vector<16x128xf32>
    %7 = arith.maximumf %5, %6 : vector<16x128xf32>
    %8 = arith.truncf %7 : vector<16x128xf32> to vector<16x128xbf16>
    %c0_6 = arith.constant 0 : index
    %c0_7 = arith.constant 0 : index
    %9 = vector.load %arg4[%c0_6, %c0_7] : memref<16x128xbf16, #tpu.memory_space<vmem>>, vector<16x128xbf16>
    tpu.vector_store %arg4[%c0_6, %c0_7], %8 {strides = array<i32>} : memref<16x128xbf16, #tpu.memory_space<vmem>>, vector<16x128xbf16>,
    return
  }
  func.func @transform_0(%arg0: i32) -> (i32, i32) {
    %c0_i32 = arith.constant 0 : i32
    %c0_i32_0 = arith.constant 0 : i32
    return %arg0, %c0_i32 : i32, i32
  }
  func.func @transform_1(%arg0: i32) -> (i32, i32) {
    %c0_i32 = arith.constant 0 : i32
    %c0_i32_0 = arith.constant 0 : i32
    %c0_i32_1 = arith.constant 0 : i32
    return %c0_i32, %c0_i32_0 : i32, i32
  }
  func.func @transform_2(%arg0: i32) -> (i32, i32) {
    %c0_i32 = arith.constant 0 : i32
    %c0_i32_0 = arith.constant 0 : i32
    %c0_i32_1 = arith.constant 0 : i32
    return %c0_i32, %c0_i32_0 : i32, i32
  }
  func.func @transform_3(%arg0: i32) -> (i32, i32) {
    %c0_i32 = arith.constant 0 : i32
    %c0_i32_0 = arith.constant 0 : i32
    return %arg0, %c0_i32 : i32, i32
  }
}

module attributes {stable_mosaic.version = 11 : i64} {
  func.func @_fused_kernel(%arg0: i32, %arg1: memref<16x256xbf16, #tpu.memory_space<vmem>>, %arg2: memref<256x256xbf16, #tpu.memory_space<vmem>>, %arg3: memref<1x256xf32, #tpu.memory_space<vmem>>, %arg4: memref<16x256xbf16, #tpu.memory_space<vmem>>) attributes {dimension_semantics = [#tpu.dimension_semantics<parallel>], iteration_bounds = array<i64: 1>, scalar_prefetch = 0 : i64, scratch_operands = 0 : i64, tpu.core_type = #tpu.core_type<tc>, window_params = [{transform_indices = @transform_0, window_bounds = array<i64: 16, 256>}, {pipeline_mode = #tpu.pipeline_mode<synchronous>, transform_indices = @transform_1, window_bounds = array<i64: 256, 256>}, {pipeline_mode = #tpu.pipeline_mode<synchronous>, transform_indices = @transform_2, window_bounds = array<i64: 1, 256>}, {transform_indices = @transform_3, window_bounds = array<i64: 16, 256>}]} {
    %c0 = arith.constant 0 : index
    %c0_0 = arith.constant 0 : index
    %0 = vector.load %arg1[%c0, %c0_0] : memref<16x256xbf16, #tpu.memory_space<vmem>>, vector<16x256xbf16>
    %c0_1 = arith.constant 0 : index
    %c0_2 = arith.constant 0 : index
    %1 = vector.load %arg2[%c0_1, %c0_2] : memref<256x256xbf16, #tpu.memory_space<vmem>>, vector<256x256xbf16>
    %cst = arith.constant dense<0.000000e+00> : vector<16x256xf32>
    %2 = tpu.matmul %0, %1, %cst {dimension_numbers = #tpu.dot_dimension_numbers<[1], [0], [0], [1], [0, 0, 1, 1], [], []>} : vector<16x256xbf16>, vector<256x256xbf16>, vector<16x256xf32> -> vector<16x256xf32>
    %c0_3 = arith.constant 0 : index
    %c0_4 = arith.constant 0 : index
    %3 = vector.load %arg3[%c0_3, %c0_4] : memref<1x256xf32, #tpu.memory_space<vmem>>, vector<1x256xf32>
    %4 = vector.broadcast %3 : vector<1x256xf32> to vector<16x256xf32>
    %5 = arith.addf %2, %4 : vector<16x256xf32>
    %6 = arith.truncf %5 : vector<16x256xf32> to vector<16x256xbf16>
    %c0_5 = arith.constant 0 : index
    %c0_6 = arith.constant 0 : index
    %7 = vector.load %arg4[%c0_5, %c0_6] : memref<16x256xbf16, #tpu.memory_space<vmem>>, vector<16x256xbf16>
    tpu.vector_store %arg4[%c0_5, %c0_6], %6 {strides = array<i32>} : memref<16x256xbf16, #tpu.memory_space<vmem>>, vector<16x256xbf16>,
    return
  }
  func.func @transform_0(%arg0: i32) -> (i32, i32) {
    %c0_i32 = arith.constant 0 : i32
    %c0_i32_0 = arith.constant 0 : i32
    return %arg0, %c0_i32 : i32, i32
  }
  func.func @transform_1(%arg0: i32) -> (i32, i32) {
    %c0_i32 = arith.constant 0 : i32
    %c0_i32_0 = arith.constant 0 : i32
    %c0_i32_1 = arith.constant 0 : i32
    return %c0_i32, %c0_i32_0 : i32, i32
  }
  func.func @transform_2(%arg0: i32) -> (i32, i32) {
    %c0_i32 = arith.constant 0 : i32
    %c0_i32_0 = arith.constant 0 : i32
    %c0_i32_1 = arith.constant 0 : i32
    return %c0_i32, %c0_i32_0 : i32, i32
  }
  func.func @transform_3(%arg0: i32) -> (i32, i32) {
    %c0_i32 = arith.constant 0 : i32
    %c0_i32_0 = arith.constant 0 : i32
    return %arg0, %c0_i32 : i32, i32
  }
}

module attributes {stable_mosaic.version = 11 : i64} {
  func.func @_fused_kernel(%arg0: i32, %arg1: memref<16x256xbf16, #tpu.memory_space<vmem>>, %arg2: memref<256x128xbf16, #tpu.memory_space<vmem>>, %arg3: memref<1x128xf32, #tpu.memory_space<vmem>>, %arg4: memref<16x128xbf16, #tpu.memory_space<vmem>>) attributes {dimension_semantics = [#tpu.dimension_semantics<parallel>], iteration_bounds = array<i64: 1>, scalar_prefetch = 0 : i64, scratch_operands = 0 : i64, tpu.core_type = #tpu.core_type<tc>, window_params = [{transform_indices = @transform_0, window_bounds = array<i64: 16, 256>}, {pipeline_mode = #tpu.pipeline_mode<synchronous>, transform_indices = @transform_1, window_bounds = array<i64: 256, 128>}, {pipeline_mode = #tpu.pipeline_mode<synchronous>, transform_indices = @transform_2, window_bounds = array<i64: 1, 128>}, {transform_indices = @transform_3, window_bounds = array<i64: 16, 128>}]} {
    %c0 = arith.constant 0 : index
    %c0_0 = arith.constant 0 : index
    %0 = vector.load %arg1[%c0, %c0_0] : memref<16x256xbf16, #tpu.memory_space<vmem>>, vector<16x256xbf16>
    %c0_1 = arith.constant 0 : index
    %c0_2 = arith.constant 0 : index
    %1 = vector.load %arg2[%c0_1, %c0_2] : memref<256x128xbf16, #tpu.memory_space<vmem>>, vector<256x128xbf16>
    %cst = arith.constant dense<0.000000e+00> : vector<16x128xf32>
    %2 = tpu.matmul %0, %1, %cst {dimension_numbers = #tpu.dot_dimension_numbers<[1], [0], [0], [1], [0, 0, 1, 1], [], []>} : vector<16x256xbf16>, vector<256x128xbf16>, vector<16x128xf32> -> vector<16x128xf32>
    %c0_3 = arith.constant 0 : index
    %c0_4 = arith.constant 0 : index
    %3 = vector.load %arg3[%c0_3, %c0_4] : memref<1x128xf32, #tpu.memory_space<vmem>>, vector<1x128xf32>
    %4 = vector.broadcast %3 : vector<1x128xf32> to vector<16x128xf32>
    %5 = arith.addf %2, %4 : vector<16x128xf32>
    %6 = arith.truncf %5 : vector<16x128xf32> to vector<16x128xbf16>
    %c0_5 = arith.constant 0 : index
    %c0_6 = arith.constant 0 : index
    %7 = vector.load %arg4[%c0_5, %c0_6] : memref<16x128xbf16, #tpu.memory_space<vmem>>, vector<16x128xbf16>
    tpu.vector_store %arg4[%c0_5, %c0_6], %6 {strides = array<i32>} : memref<16x128xbf16, #tpu.memory_space<vmem>>, vector<16x128xbf16>,
    return
  }
  func.func @transform_0(%arg0: i32) -> (i32, i32) {
    %c0_i32 = arith.constant 0 : i32
    %c0_i32_0 = arith.constant 0 : i32
    return %arg0, %c0_i32 : i32, i32
  }
  func.func @transform_1(%arg0: i32) -> (i32, i32) {
    %c0_i32 = arith.constant 0 : i32
    %c0_i32_0 = arith.constant 0 : i32
    %c0_i32_1 = arith.constant 0 : i32
    return %c0_i32, %c0_i32_0 : i32, i32
  }
  func.func @transform_2(%arg0: i32) -> (i32, i32) {
    %c0_i32 = arith.constant 0 : i32
    %c0_i32_0 = arith.constant 0 : i32
    %c0_i32_1 = arith.constant 0 : i32
    return %c0_i32, %c0_i32_0 : i32, i32
  }
  func.func @transform_3(%arg0: i32) -> (i32, i32) {
    %c0_i32 = arith.constant 0 : i32
    %c0_i32_0 = arith.constant 0 : i32
    return %arg0, %c0_i32 : i32, i32
  }
}

module attributes {stable_mosaic.version = 11 : i64} {
  func.func @_fused_kernel(%arg0: i32, %arg1: memref<16x576xbf16, #tpu.memory_space<vmem>>, %arg2: memref<576x128xbf16, #tpu.memory_space<vmem>>, %arg3: memref<16x576xbf16, #tpu.memory_space<vmem>>, %arg4: memref<576x128xbf16, #tpu.memory_space<vmem>>, %arg5: memref<1x128xf32, #tpu.memory_space<vmem>>, %arg6: memref<16x128xbf16, #tpu.memory_space<vmem>>) attributes {dimension_semantics = [#tpu.dimension_semantics<parallel>], iteration_bounds = array<i64: 1>, scalar_prefetch = 0 : i64, scratch_operands = 0 : i64, tpu.core_type = #tpu.core_type<tc>, window_params = [{transform_indices = @transform_0, window_bounds = array<i64: 16, 576>}, {pipeline_mode = #tpu.pipeline_mode<synchronous>, transform_indices = @transform_1, window_bounds = array<i64: 576, 128>}, {transform_indices = @transform_2, window_bounds = array<i64: 16, 576>}, {pipeline_mode = #tpu.pipeline_mode<synchronous>, transform_indices = @transform_3, window_bounds = array<i64: 576, 128>}, {pipeline_mode = #tpu.pipeline_mode<synchronous>, transform_indices = @transform_4, window_bounds = array<i64: 1, 128>}, {transform_indices = @transform_5, window_bounds = array<i64: 16, 128>}]} {
    %c0 = arith.constant 0 : index
    %c0_0 = arith.constant 0 : index
    %0 = vector.load %arg1[%c0, %c0_0] : memref<16x576xbf16, #tpu.memory_space<vmem>>, vector<16x576xbf16>
    %c0_1 = arith.constant 0 : index
    %c0_2 = arith.constant 0 : index
    %1 = vector.load %arg2[%c0_1, %c0_2] : memref<576x128xbf16, #tpu.memory_space<vmem>>, vector<576x128xbf16>
    %cst = arith.constant dense<0.000000e+00> : vector<16x128xf32>
    %2 = tpu.matmul %0, %1, %cst {dimension_numbers = #tpu.dot_dimension_numbers<[1], [0], [0], [1], [0, 0, 1, 1], [], []>} : vector<16x576xbf16>, vector<576x128xbf16>, vector<16x128xf32> -> vector<16x128xf32>
    %c0_3 = arith.constant 0 : index
    %c0_4 = arith.constant 0 : index
    %3 = vector.load %arg3[%c0_3, %c0_4] : memref<16x576xbf16, #tpu.memory_space<vmem>>, vector<16x576xbf16>
    %c0_5 = arith.constant 0 : index
    %c0_6 = arith.constant 0 : index
    %4 = vector.load %arg4[%c0_5, %c0_6] : memref<576x128xbf16, #tpu.memory_space<vmem>>, vector<576x128xbf16>
    %cst_7 = arith.constant dense<0.000000e+00> : vector<16x128xf32>
    %5 = tpu.matmul %3, %4, %cst_7 {dimension_numbers = #tpu.dot_dimension_numbers<[1], [0], [0], [1], [0, 0, 1, 1], [], []>} : vector<16x576xbf16>, vector<576x128xbf16>, vector<16x128xf32> -> vector<16x128xf32>
    %6 = arith.addf %2, %5 : vector<16x128xf32>
    %c0_8 = arith.constant 0 : index
    %c0_9 = arith.constant 0 : index
    %7 = vector.load %arg5[%c0_8, %c0_9] : memref<1x128xf32, #tpu.memory_space<vmem>>, vector<1x128xf32>
    %8 = vector.broadcast %7 : vector<1x128xf32> to vector<16x128xf32>
    %9 = arith.addf %6, %8 : vector<16x128xf32>
    %cst_10 = arith.constant 0.000000e+00 : f32
    %10 = vector.broadcast %cst_10 : f32 to vector<16x128xf32>
    %11 = arith.maximumf %9, %10 : vector<16x128xf32>
    %12 = arith.truncf %11 : vector<16x128xf32> to vector<16x128xbf16>
    %c0_11 = arith.constant 0 : index
    %c0_12 = arith.constant 0 : index
    %13 = vector.load %arg6[%c0_11, %c0_12] : memref<16x128xbf16, #tpu.memory_space<vmem>>, vector<16x128xbf16>
    tpu.vector_store %arg6[%c0_11, %c0_12], %12 {strides = array<i32>} : memref<16x128xbf16, #tpu.memory_space<vmem>>, vector<16x128xbf16>,
    return
  }
  func.func @transform_0(%arg0: i32) -> (i32, i32) {
    %c0_i32 = arith.constant 0 : i32
    %c0_i32_0 = arith.constant 0 : i32
    return %arg0, %c0_i32 : i32, i32
  }
  func.func @transform_1(%arg0: i32) -> (i32, i32) {
    %c0_i32 = arith.constant 0 : i32
    %c0_i32_0 = arith.constant 0 : i32
    %c0_i32_1 = arith.constant 0 : i32
    return %c0_i32, %c0_i32_0 : i32, i32
  }
  func.func @transform_2(%arg0: i32) -> (i32, i32) {
    %c0_i32 = arith.constant 0 : i32
    %c0_i32_0 = arith.constant 0 : i32
    return %arg0, %c0_i32 : i32, i32
  }
  func.func @transform_3(%arg0: i32) -> (i32, i32) {
    %c0_i32 = arith.constant 0 : i32
    %c0_i32_0 = arith.constant 0 : i32
    %c0_i32_1 = arith.constant 0 : i32
    return %c0_i32, %c0_i32_0 : i32, i32
  }
  func.func @transform_4(%arg0: i32) -> (i32, i32) {
    %c0_i32 = arith.constant 0 : i32
    %c0_i32_0 = arith.constant 0 : i32
    %c0_i32_1 = arith.constant 0 : i32
    return %c0_i32, %c0_i32_0 : i32, i32
  }
  func.func @transform_5(%arg0: i32) -> (i32, i32) {
    %c0_i32 = arith.constant 0 : i32
    %c0_i32_0 = arith.constant 0 : i32
    return %arg0, %c0_i32 : i32, i32
  }
}

module attributes {stable_mosaic.version = 11 : i64} {
  func.func @_fused_kernel(%arg0: i32, %arg1: memref<16x288xbf16, #tpu.memory_space<vmem>>, %arg2: memref<288x128xbf16, #tpu.memory_space<vmem>>, %arg3: memref<16x288xbf16, #tpu.memory_space<vmem>>, %arg4: memref<288x128xbf16, #tpu.memory_space<vmem>>, %arg5: memref<1x128xf32, #tpu.memory_space<vmem>>, %arg6: memref<16x128xbf16, #tpu.memory_space<vmem>>) attributes {dimension_semantics = [#tpu.dimension_semantics<parallel>], iteration_bounds = array<i64: 2>, scalar_prefetch = 0 : i64, scratch_operands = 0 : i64, tpu.core_type = #tpu.core_type<tc>, window_params = [{transform_indices = @transform_0, window_bounds = array<i64: 16, 288>}, {pipeline_mode = #tpu.pipeline_mode<synchronous>, transform_indices = @transform_1, window_bounds = array<i64: 288, 128>}, {transform_indices = @transform_2, window_bounds = array<i64: 16, 288>}, {pipeline_mode = #tpu.pipeline_mode<synchronous>, transform_indices = @transform_3, window_bounds = array<i64: 288, 128>}, {pipeline_mode = #tpu.pipeline_mode<synchronous>, transform_indices = @transform_4, window_bounds = array<i64: 1, 128>}, {transform_indices = @transform_5, window_bounds = array<i64: 16, 128>}]} {
    %c0 = arith.constant 0 : index
    %c0_0 = arith.constant 0 : index
    %0 = vector.load %arg1[%c0, %c0_0] : memref<16x288xbf16, #tpu.memory_space<vmem>>, vector<16x288xbf16>
    %c0_1 = arith.constant 0 : index
    %c0_2 = arith.constant 0 : index
    %1 = vector.load %arg2[%c0_1, %c0_2] : memref<288x128xbf16, #tpu.memory_space<vmem>>, vector<288x128xbf16>
    %cst = arith.constant dense<0.000000e+00> : vector<16x128xf32>
    %2 = tpu.matmul %0, %1, %cst {dimension_numbers = #tpu.dot_dimension_numbers<[1], [0], [0], [1], [0, 0, 1, 1], [], []>} : vector<16x288xbf16>, vector<288x128xbf16>, vector<16x128xf32> -> vector<16x128xf32>
    %c0_3 = arith.constant 0 : index
    %c0_4 = arith.constant 0 : index
    %3 = vector.load %arg3[%c0_3, %c0_4] : memref<16x288xbf16, #tpu.memory_space<vmem>>, vector<16x288xbf16>
    %c0_5 = arith.constant 0 : index
    %c0_6 = arith.constant 0 : index
    %4 = vector.load %arg4[%c0_5, %c0_6] : memref<288x128xbf16, #tpu.memory_space<vmem>>, vector<288x128xbf16>
    %cst_7 = arith.constant dense<0.000000e+00> : vector<16x128xf32>
    %5 = tpu.matmul %3, %4, %cst_7 {dimension_numbers = #tpu.dot_dimension_numbers<[1], [0], [0], [1], [0, 0, 1, 1], [], []>} : vector<16x288xbf16>, vector<288x128xbf16>, vector<16x128xf32> -> vector<16x128xf32>
    %6 = arith.addf %2, %5 : vector<16x128xf32>
    %c0_8 = arith.constant 0 : index
    %c0_9 = arith.constant 0 : index
    %7 = vector.load %arg5[%c0_8, %c0_9] : memref<1x128xf32, #tpu.memory_space<vmem>>, vector<1x128xf32>
    %8 = vector.broadcast %7 : vector<1x128xf32> to vector<16x128xf32>
    %9 = arith.addf %6, %8 : vector<16x128xf32>
    %cst_10 = arith.constant 0.000000e+00 : f32
    %10 = vector.broadcast %cst_10 : f32 to vector<16x128xf32>
    %11 = arith.maximumf %9, %10 : vector<16x128xf32>
    %12 = arith.truncf %11 : vector<16x128xf32> to vector<16x128xbf16>
    %c0_11 = arith.constant 0 : index
    %c0_12 = arith.constant 0 : index
    %13 = vector.load %arg6[%c0_11, %c0_12] : memref<16x128xbf16, #tpu.memory_space<vmem>>, vector<16x128xbf16>
    tpu.vector_store %arg6[%c0_11, %c0_12], %12 {strides = array<i32>} : memref<16x128xbf16, #tpu.memory_space<vmem>>, vector<16x128xbf16>,
    return
  }
  func.func @transform_0(%arg0: i32) -> (i32, i32) {
    %c0_i32 = arith.constant 0 : i32
    %c0_i32_0 = arith.constant 0 : i32
    return %arg0, %c0_i32 : i32, i32
  }
  func.func @transform_1(%arg0: i32) -> (i32, i32) {
    %c0_i32 = arith.constant 0 : i32
    %c0_i32_0 = arith.constant 0 : i32
    %c0_i32_1 = arith.constant 0 : i32
    return %c0_i32, %c0_i32_0 : i32, i32
  }
  func.func @transform_2(%arg0: i32) -> (i32, i32) {
    %c0_i32 = arith.constant 0 : i32
    %c0_i32_0 = arith.constant 0 : i32
    return %arg0, %c0_i32 : i32, i32
  }
  func.func @transform_3(%arg0: i32) -> (i32, i32) {
    %c0_i32 = arith.constant 0 : i32
    %c0_i32_0 = arith.constant 0 : i32
    %c0_i32_1 = arith.constant 0 : i32
    return %c0_i32, %c0_i32_0 : i32, i32
  }
  func.func @transform_4(%arg0: i32) -> (i32, i32) {
    %c0_i32 = arith.constant 0 : i32
    %c0_i32_0 = arith.constant 0 : i32
    %c0_i32_1 = arith.constant 0 : i32
    return %c0_i32, %c0_i32_0 : i32, i32
  }
  func.func @transform_5(%arg0: i32) -> (i32, i32) {
    %c0_i32 = arith.constant 0 : i32
    %c0_i32_0 = arith.constant 0 : i32
    return %arg0, %c0_i32 : i32, i32
  }
}

module attributes {stable_mosaic.version = 11 : i64} {
  func.func @_fused_kernel(%arg0: i32, %arg1: memref<16x128xbf16, #tpu.memory_space<vmem>>, %arg2: memref<128x128xbf16, #tpu.memory_space<vmem>>, %arg3: memref<1x128xf32, #tpu.memory_space<vmem>>, %arg4: memref<16x128xbf16, #tpu.memory_space<vmem>>) attributes {dimension_semantics = [#tpu.dimension_semantics<parallel>], iteration_bounds = array<i64: 2>, scalar_prefetch = 0 : i64, scratch_operands = 0 : i64, tpu.core_type = #tpu.core_type<tc>, window_params = [{transform_indices = @transform_0, window_bounds = array<i64: 16, 128>}, {pipeline_mode = #tpu.pipeline_mode<synchronous>, transform_indices = @transform_1, window_bounds = array<i64: 128, 128>}, {pipeline_mode = #tpu.pipeline_mode<synchronous>, transform_indices = @transform_2, window_bounds = array<i64: 1, 128>}, {transform_indices = @transform_3, window_bounds = array<i64: 16, 128>}]} {
    %c0 = arith.constant 0 : index
    %c0_0 = arith.constant 0 : index
    %0 = vector.load %arg1[%c0, %c0_0] : memref<16x128xbf16, #tpu.memory_space<vmem>>, vector<16x128xbf16>
    %c0_1 = arith.constant 0 : index
    %c0_2 = arith.constant 0 : index
    %1 = vector.load %arg2[%c0_1, %c0_2] : memref<128x128xbf16, #tpu.memory_space<vmem>>, vector<128x128xbf16>
    %cst = arith.constant dense<0.000000e+00> : vector<16x128xf32>
    %2 = tpu.matmul %0, %1, %cst {dimension_numbers = #tpu.dot_dimension_numbers<[1], [0], [0], [1], [0, 0, 1, 1], [], []>} : vector<16x128xbf16>, vector<128x128xbf16>, vector<16x128xf32> -> vector<16x128xf32>
    %c0_3 = arith.constant 0 : index
    %c0_4 = arith.constant 0 : index
    %3 = vector.load %arg3[%c0_3, %c0_4] : memref<1x128xf32, #tpu.memory_space<vmem>>, vector<1x128xf32>
    %4 = vector.broadcast %3 : vector<1x128xf32> to vector<16x128xf32>
    %5 = arith.addf %2, %4 : vector<16x128xf32>
    %6 = arith.truncf %5 : vector<16x128xf32> to vector<16x128xbf16>
    %c0_5 = arith.constant 0 : index
    %c0_6 = arith.constant 0 : index
    %7 = vector.load %arg4[%c0_5, %c0_6] : memref<16x128xbf16, #tpu.memory_space<vmem>>, vector<16x128xbf16>
    tpu.vector_store %arg4[%c0_5, %c0_6], %6 {strides = array<i32>} : memref<16x128xbf16, #tpu.memory_space<vmem>>, vector<16x128xbf16>,
    return
  }
  func.func @transform_0(%arg0: i32) -> (i32, i32) {
    %c0_i32 = arith.constant 0 : i32
    %c0_i32_0 = arith.constant 0 : i32
    return %arg0, %c0_i32 : i32, i32
  }
  func.func @transform_1(%arg0: i32) -> (i32, i32) {
    %c0_i32 = arith.constant 0 : i32
    %c0_i32_0 = arith.constant 0 : i32
    %c0_i32_1 = arith.constant 0 : i32
    return %c0_i32, %c0_i32_0 : i32, i32
  }
  func.func @transform_2(%arg0: i32) -> (i32, i32) {
    %c0_i32 = arith.constant 0 : i32
    %c0_i32_0 = arith.constant 0 : i32
    %c0_i32_1 = arith.constant 0 : i32
    return %c0_i32, %c0_i32_0 : i32, i32
  }
  func.func @transform_3(%arg0: i32) -> (i32, i32) {
    %c0_i32 = arith.constant 0 : i32
    %c0_i32_0 = arith.constant 0 : i32
    return %arg0, %c0_i32 : i32, i32
  }
}

module attributes {stable_mosaic.version = 11 : i64} {
  func.func @_fused_kernel(%arg0: i32, %arg1: memref<32x144xbf16, #tpu.memory_space<vmem>>, %arg2: memref<144x128xbf16, #tpu.memory_space<vmem>>, %arg3: memref<32x144xbf16, #tpu.memory_space<vmem>>, %arg4: memref<144x128xbf16, #tpu.memory_space<vmem>>, %arg5: memref<1x128xf32, #tpu.memory_space<vmem>>, %arg6: memref<32x128xbf16, #tpu.memory_space<vmem>>) attributes {dimension_semantics = [#tpu.dimension_semantics<parallel>], iteration_bounds = array<i64: 4>, scalar_prefetch = 0 : i64, scratch_operands = 0 : i64, tpu.core_type = #tpu.core_type<tc>, window_params = [{transform_indices = @transform_0, window_bounds = array<i64: 32, 144>}, {pipeline_mode = #tpu.pipeline_mode<synchronous>, transform_indices = @transform_1, window_bounds = array<i64: 144, 128>}, {transform_indices = @transform_2, window_bounds = array<i64: 32, 144>}, {pipeline_mode = #tpu.pipeline_mode<synchronous>, transform_indices = @transform_3, window_bounds = array<i64: 144, 128>}, {pipeline_mode = #tpu.pipeline_mode<synchronous>, transform_indices = @transform_4, window_bounds = array<i64: 1, 128>}, {transform_indices = @transform_5, window_bounds = array<i64: 32, 128>}]} {
    %c0 = arith.constant 0 : index
    %c0_0 = arith.constant 0 : index
    %0 = vector.load %arg1[%c0, %c0_0] : memref<32x144xbf16, #tpu.memory_space<vmem>>, vector<32x144xbf16>
    %c0_1 = arith.constant 0 : index
    %c0_2 = arith.constant 0 : index
    %1 = vector.load %arg2[%c0_1, %c0_2] : memref<144x128xbf16, #tpu.memory_space<vmem>>, vector<144x128xbf16>
    %cst = arith.constant dense<0.000000e+00> : vector<32x128xf32>
    %2 = tpu.matmul %0, %1, %cst {dimension_numbers = #tpu.dot_dimension_numbers<[1], [0], [0], [1], [0, 0, 1, 1], [], []>} : vector<32x144xbf16>, vector<144x128xbf16>, vector<32x128xf32> -> vector<32x128xf32>
    %c0_3 = arith.constant 0 : index
    %c0_4 = arith.constant 0 : index
    %3 = vector.load %arg3[%c0_3, %c0_4] : memref<32x144xbf16, #tpu.memory_space<vmem>>, vector<32x144xbf16>
    %c0_5 = arith.constant 0 : index
    %c0_6 = arith.constant 0 : index
    %4 = vector.load %arg4[%c0_5, %c0_6] : memref<144x128xbf16, #tpu.memory_space<vmem>>, vector<144x128xbf16>
    %cst_7 = arith.constant dense<0.000000e+00> : vector<32x128xf32>
    %5 = tpu.matmul %3, %4, %cst_7 {dimension_numbers = #tpu.dot_dimension_numbers<[1], [0], [0], [1], [0, 0, 1, 1], [], []>} : vector<32x144xbf16>, vector<144x128xbf16>, vector<32x128xf32> -> vector<32x128xf32>
    %6 = arith.addf %2, %5 : vector<32x128xf32>
    %c0_8 = arith.constant 0 : index
    %c0_9 = arith.constant 0 : index
    %7 = vector.load %arg5[%c0_8, %c0_9] : memref<1x128xf32, #tpu.memory_space<vmem>>, vector<1x128xf32>
    %8 = vector.broadcast %7 : vector<1x128xf32> to vector<32x128xf32>
    %9 = arith.addf %6, %8 : vector<32x128xf32>
    %cst_10 = arith.constant 0.000000e+00 : f32
    %10 = vector.broadcast %cst_10 : f32 to vector<32x128xf32>
    %11 = arith.maximumf %9, %10 : vector<32x128xf32>
    %12 = arith.truncf %11 : vector<32x128xf32> to vector<32x128xbf16>
    %c0_11 = arith.constant 0 : index
    %c0_12 = arith.constant 0 : index
    %13 = vector.load %arg6[%c0_11, %c0_12] : memref<32x128xbf16, #tpu.memory_space<vmem>>, vector<32x128xbf16>
    tpu.vector_store %arg6[%c0_11, %c0_12], %12 {strides = array<i32>} : memref<32x128xbf16, #tpu.memory_space<vmem>>, vector<32x128xbf16>,
    return
  }
  func.func @transform_0(%arg0: i32) -> (i32, i32) {
    %c0_i32 = arith.constant 0 : i32
    %c0_i32_0 = arith.constant 0 : i32
    return %arg0, %c0_i32 : i32, i32
  }
  func.func @transform_1(%arg0: i32) -> (i32, i32) {
    %c0_i32 = arith.constant 0 : i32
    %c0_i32_0 = arith.constant 0 : i32
    %c0_i32_1 = arith.constant 0 : i32
    return %c0_i32, %c0_i32_0 : i32, i32
  }
  func.func @transform_2(%arg0: i32) -> (i32, i32) {
    %c0_i32 = arith.constant 0 : i32
    %c0_i32_0 = arith.constant 0 : i32
    return %arg0, %c0_i32 : i32, i32
  }
  func.func @transform_3(%arg0: i32) -> (i32, i32) {
    %c0_i32 = arith.constant 0 : i32
    %c0_i32_0 = arith.constant 0 : i32
    %c0_i32_1 = arith.constant 0 : i32
    return %c0_i32, %c0_i32_0 : i32, i32
  }
  func.func @transform_4(%arg0: i32) -> (i32, i32) {
    %c0_i32 = arith.constant 0 : i32
    %c0_i32_0 = arith.constant 0 : i32
    %c0_i32_1 = arith.constant 0 : i32
    return %c0_i32, %c0_i32_0 : i32, i32
  }
  func.func @transform_5(%arg0: i32) -> (i32, i32) {
    %c0_i32 = arith.constant 0 : i32
    %c0_i32_0 = arith.constant 0 : i32
    return %arg0, %c0_i32 : i32, i32
  }
}

module attributes {stable_mosaic.version = 11 : i64} {
  func.func @_fused_kernel(%arg0: i32, %arg1: memref<32x64xbf16, #tpu.memory_space<vmem>>, %arg2: memref<64x128xbf16, #tpu.memory_space<vmem>>, %arg3: memref<1x128xf32, #tpu.memory_space<vmem>>, %arg4: memref<32x128xbf16, #tpu.memory_space<vmem>>) attributes {dimension_semantics = [#tpu.dimension_semantics<parallel>], iteration_bounds = array<i64: 4>, scalar_prefetch = 0 : i64, scratch_operands = 0 : i64, tpu.core_type = #tpu.core_type<tc>, window_params = [{transform_indices = @transform_0, window_bounds = array<i64: 32, 64>}, {pipeline_mode = #tpu.pipeline_mode<synchronous>, transform_indices = @transform_1, window_bounds = array<i64: 64, 128>}, {pipeline_mode = #tpu.pipeline_mode<synchronous>, transform_indices = @transform_2, window_bounds = array<i64: 1, 128>}, {transform_indices = @transform_3, window_bounds = array<i64: 32, 128>}]} {
    %c0 = arith.constant 0 : index
    %c0_0 = arith.constant 0 : index
    %0 = vector.load %arg1[%c0, %c0_0] : memref<32x64xbf16, #tpu.memory_space<vmem>>, vector<32x64xbf16>
    %c0_1 = arith.constant 0 : index
    %c0_2 = arith.constant 0 : index
    %1 = vector.load %arg2[%c0_1, %c0_2] : memref<64x128xbf16, #tpu.memory_space<vmem>>, vector<64x128xbf16>
    %cst = arith.constant dense<0.000000e+00> : vector<32x128xf32>
    %2 = tpu.matmul %0, %1, %cst {dimension_numbers = #tpu.dot_dimension_numbers<[1], [0], [0], [1], [0, 0, 1, 1], [], []>} : vector<32x64xbf16>, vector<64x128xbf16>, vector<32x128xf32> -> vector<32x128xf32>
    %c0_3 = arith.constant 0 : index
    %c0_4 = arith.constant 0 : index
    %3 = vector.load %arg3[%c0_3, %c0_4] : memref<1x128xf32, #tpu.memory_space<vmem>>, vector<1x128xf32>
    %4 = vector.broadcast %3 : vector<1x128xf32> to vector<32x128xf32>
    %5 = arith.addf %2, %4 : vector<32x128xf32>
    %6 = arith.truncf %5 : vector<32x128xf32> to vector<32x128xbf16>
    %c0_5 = arith.constant 0 : index
    %c0_6 = arith.constant 0 : index
    %7 = vector.load %arg4[%c0_5, %c0_6] : memref<32x128xbf16, #tpu.memory_space<vmem>>, vector<32x128xbf16>
    tpu.vector_store %arg4[%c0_5, %c0_6], %6 {strides = array<i32>} : memref<32x128xbf16, #tpu.memory_space<vmem>>, vector<32x128xbf16>,
    return
  }
  func.func @transform_0(%arg0: i32) -> (i32, i32) {
    %c0_i32 = arith.constant 0 : i32
    %c0_i32_0 = arith.constant 0 : i32
    return %arg0, %c0_i32 : i32, i32
  }
  func.func @transform_1(%arg0: i32) -> (i32, i32) {
    %c0_i32 = arith.constant 0 : i32
    %c0_i32_0 = arith.constant 0 : i32
    %c0_i32_1 = arith.constant 0 : i32
    return %c0_i32, %c0_i32_0 : i32, i32
  }
  func.func @transform_2(%arg0: i32) -> (i32, i32) {
    %c0_i32 = arith.constant 0 : i32
    %c0_i32_0 = arith.constant 0 : i32
    %c0_i32_1 = arith.constant 0 : i32
    return %c0_i32, %c0_i32_0 : i32, i32
  }
  func.func @transform_3(%arg0: i32) -> (i32, i32) {
    %c0_i32 = arith.constant 0 : i32
    %c0_i32_0 = arith.constant 0 : i32
    return %arg0, %c0_i32 : i32, i32
  }
}

module attributes {stable_mosaic.version = 11 : i64} {
  func.func @_fused_kernel(%arg0: i32, %arg1: memref<128x72xbf16, #tpu.memory_space<vmem>>, %arg2: memref<72x128xbf16, #tpu.memory_space<vmem>>, %arg3: memref<128x72xbf16, #tpu.memory_space<vmem>>, %arg4: memref<72x128xbf16, #tpu.memory_space<vmem>>, %arg5: memref<1x128xf32, #tpu.memory_space<vmem>>, %arg6: memref<128x128xbf16, #tpu.memory_space<vmem>>, %arg7: memref<1x128xf32, #tpu.memory_space<vmem>>, %arg8: memref<128x128xbf16, #tpu.memory_space<vmem>>) attributes {dimension_semantics = [#tpu.dimension_semantics<parallel>], iteration_bounds = array<i64: 4>, scalar_prefetch = 0 : i64, scratch_operands = 0 : i64, tpu.core_type = #tpu.core_type<tc>, window_params = [{transform_indices = @transform_0, window_bounds = array<i64: 128, 72>}, {pipeline_mode = #tpu.pipeline_mode<synchronous>, transform_indices = @transform_1, window_bounds = array<i64: 72, 128>}, {transform_indices = @transform_2, window_bounds = array<i64: 128, 72>}, {pipeline_mode = #tpu.pipeline_mode<synchronous>, transform_indices = @transform_3, window_bounds = array<i64: 72, 128>}, {pipeline_mode = #tpu.pipeline_mode<synchronous>, transform_indices = @transform_4, window_bounds = array<i64: 1, 128>}, {pipeline_mode = #tpu.pipeline_mode<synchronous>, transform_indices = @transform_5, window_bounds = array<i64: 128, 128>}, {pipeline_mode = #tpu.pipeline_mode<synchronous>, transform_indices = @transform_6, window_bounds = array<i64: 1, 128>}, {transform_indices = @transform_7, window_bounds = array<i64: 128, 128>}]} {
    %c0 = arith.constant 0 : index
    %c0_0 = arith.constant 0 : index
    %0 = vector.load %arg1[%c0, %c0_0] : memref<128x72xbf16, #tpu.memory_space<vmem>>, vector<128x72xbf16>
    %c0_1 = arith.constant 0 : index
    %c0_2 = arith.constant 0 : index
    %1 = vector.load %arg2[%c0_1, %c0_2] : memref<72x128xbf16, #tpu.memory_space<vmem>>, vector<72x128xbf16>
    %cst = arith.constant dense<0.000000e+00> : vector<128x128xf32>
    %2 = tpu.matmul %0, %1, %cst {dimension_numbers = #tpu.dot_dimension_numbers<[1], [0], [0], [1], [0, 0, 1, 1], [], []>} : vector<128x72xbf16>, vector<72x128xbf16>, vector<128x128xf32> -> vector<128x128xf32>
    %c0_3 = arith.constant 0 : index
    %c0_4 = arith.constant 0 : index
    %3 = vector.load %arg3[%c0_3, %c0_4] : memref<128x72xbf16, #tpu.memory_space<vmem>>, vector<128x72xbf16>
    %c0_5 = arith.constant 0 : index
    %c0_6 = arith.constant 0 : index
    %4 = vector.load %arg4[%c0_5, %c0_6] : memref<72x128xbf16, #tpu.memory_space<vmem>>, vector<72x128xbf16>
    %cst_7 = arith.constant dense<0.000000e+00> : vector<128x128xf32>
    %5 = tpu.matmul %3, %4, %cst_7 {dimension_numbers = #tpu.dot_dimension_numbers<[1], [0], [0], [1], [0, 0, 1, 1], [], []>} : vector<128x72xbf16>, vector<72x128xbf16>, vector<128x128xf32> -> vector<128x128xf32>
    %6 = arith.addf %2, %5 : vector<128x128xf32>
    %c0_8 = arith.constant 0 : index
    %c0_9 = arith.constant 0 : index
    %7 = vector.load %arg5[%c0_8, %c0_9] : memref<1x128xf32, #tpu.memory_space<vmem>>, vector<1x128xf32>
    %8 = vector.broadcast %7 : vector<1x128xf32> to vector<128x128xf32>
    %9 = arith.addf %6, %8 : vector<128x128xf32>
    %cst_10 = arith.constant 0.000000e+00 : f32
    %10 = vector.broadcast %cst_10 : f32 to vector<128x128xf32>
    %11 = arith.maximumf %9, %10 : vector<128x128xf32>
    %12 = arith.truncf %11 : vector<128x128xf32> to vector<128x128xbf16>
    %c0_11 = arith.constant 0 : index
    %c0_12 = arith.constant 0 : index
    %13 = vector.load %arg6[%c0_11, %c0_12] : memref<128x128xbf16, #tpu.memory_space<vmem>>, vector<128x128xbf16>
    %cst_13 = arith.constant dense<0.000000e+00> : vector<128x128xf32>
    %14 = tpu.matmul %12, %13, %cst_13 {dimension_numbers = #tpu.dot_dimension_numbers<[1], [0], [0], [1], [0, 0, 1, 1], [], []>} : vector<128x128xbf16>, vector<128x128xbf16>, vector<128x128xf32> -> vector<128x128xf32>
    %c0_14 = arith.constant 0 : index
    %c0_15 = arith.constant 0 : index
    %15 = vector.load %arg7[%c0_14, %c0_15] : memref<1x128xf32, #tpu.memory_space<vmem>>, vector<1x128xf32>
    %16 = vector.broadcast %15 : vector<1x128xf32> to vector<128x128xf32>
    %17 = arith.addf %14, %16 : vector<128x128xf32>
    %18 = arith.truncf %17 : vector<128x128xf32> to vector<128x128xbf16>
    %c0_16 = arith.constant 0 : index
    %c0_17 = arith.constant 0 : index
    %19 = vector.load %arg8[%c0_16, %c0_17] : memref<128x128xbf16, #tpu.memory_space<vmem>>, vector<128x128xbf16>
    tpu.vector_store %arg8[%c0_16, %c0_17], %18 {strides = array<i32>} : memref<128x128xbf16, #tpu.memory_space<vmem>>, vector<128x128xbf16>,
    return
  }
  func.func @transform_0(%arg0: i32) -> (i32, i32) {
    %c0_i32 = arith.constant 0 : i32
    %c0_i32_0 = arith.constant 0 : i32
    return %arg0, %c0_i32 : i32, i32
  }
  func.func @transform_1(%arg0: i32) -> (i32, i32) {
    %c0_i32 = arith.constant 0 : i32
    %c0_i32_0 = arith.constant 0 : i32
    %c0_i32_1 = arith.constant 0 : i32
    return %c0_i32, %c0_i32_0 : i32, i32
  }
  func.func @transform_2(%arg0: i32) -> (i32, i32) {
    %c0_i32 = arith.constant 0 : i32
    %c0_i32_0 = arith.constant 0 : i32
    return %arg0, %c0_i32 : i32, i32
  }
  func.func @transform_3(%arg0: i32) -> (i32, i32) {
    %c0_i32 = arith.constant 0 : i32
    %c0_i32_0 = arith.constant 0 : i32
    %c0_i32_1 = arith.constant 0 : i32
    return %c0_i32, %c0_i32_0 : i32, i32
  }
  func.func @transform_4(%arg0: i32) -> (i32, i32) {
    %c0_i32 = arith.constant 0 : i32
    %c0_i32_0 = arith.constant 0 : i32
    %c0_i32_1 = arith.constant 0 : i32
    return %c0_i32, %c0_i32_0 : i32, i32
  }
  func.func @transform_5(%arg0: i32) -> (i32, i32) {
    %c0_i32 = arith.constant 0 : i32
    %c0_i32_0 = arith.constant 0 : i32
    %c0_i32_1 = arith.constant 0 : i32
    return %c0_i32, %c0_i32_0 : i32, i32
  }
  func.func @transform_6(%arg0: i32) -> (i32, i32) {
    %c0_i32 = arith.constant 0 : i32
    %c0_i32_0 = arith.constant 0 : i32
    %c0_i32_1 = arith.constant 0 : i32
    return %c0_i32, %c0_i32_0 : i32, i32
  }
  func.func @transform_7(%arg0: i32) -> (i32, i32) {
    %c0_i32 = arith.constant 0 : i32
    %c0_i32_0 = arith.constant 0 : i32
    return %arg0, %c0_i32 : i32, i32
  }
}

</mosaic_0001>

<bundles_post_ra>
// kernel: tile.22
= control target key start
LH: loop header
LB: loop body
LE: loop exit
PB: predicated region body
PF: predicated region fallthrough
CT: control target
= control target key end

     0   :  { %s22_s0 = inlined_call_operand.vmem [shape: f32[32], index: 0, kind: input, shape index: {}]   ;;  %s23_s1 = inlined_call_operand.vmem [shape: f32[4,32], index: 1, kind: output, shape index: {}]  }
   0x1   :  { %v4_v0 = vld [vmem:[%s22_s0] ss:$0 sm:$0xff] }
   0x2   :  { %5 = vst [vmem:[%s23_s1] sm:$0xf] %v4_v0 }

// kernel: tile.18
= control target key start
LH: loop header
LB: loop body
LE: loop exit
PB: predicated region body
PF: predicated region fallthrough
CT: control target
= control target key end

     0   :  { %s22_s0 = inlined_call_operand.vmem [shape: f32[64], index: 0, kind: input, shape index: {}]   ;;  %s23_s1 = inlined_call_operand.vmem [shape: f32[4,64], index: 1, kind: output, shape index: {}]  }
   0x1   :  { %v4_v0 = vld [vmem:[%s22_s0] ss:$0 sm:$0xff] }
   0x2   :  { %5 = vst [vmem:[%s23_s1] sm:$0xf] %v4_v0 }

// kernel: tile.30
= control target key start
LH: loop header
LB: loop body
LE: loop exit
PB: predicated region body
PF: predicated region fallthrough
CT: control target
= control target key end

     0   :  { %s22_s0 = inlined_call_operand.vmem [shape: f32[8], index: 0, kind: input, shape index: {}]   ;;  %s23_s1 = inlined_call_operand.vmem [shape: f32[4,8], index: 1, kind: output, shape index: {}]  }
   0x1   :  { %v4_v0 = vld [vmem:[%s22_s0] ss:$0 sm:$0xff] }
   0x2   :  { %5 = vst [vmem:[%s23_s1] sm:$0xf] %v4_v0 }

// kernel: tile.26
= control target key start
LH: loop header
LB: loop body
LE: loop exit
PB: predicated region body
PF: predicated region fallthrough
CT: control target
= control target key end

     0   :  { %s22_s0 = inlined_call_operand.vmem [shape: f32[16], index: 0, kind: input, shape index: {}]   ;;  %s23_s1 = inlined_call_operand.vmem [shape: f32[4,16], index: 1, kind: output, shape index: {}]  }
   0x1   :  { %v4_v0 = vld [vmem:[%s22_s0] ss:$0 sm:$0xff] }
   0x2   :  { %5 = vst [vmem:[%s23_s1] sm:$0xf] %v4_v0 }

// kernel: tile.27
= control target key start
LH: loop header
LB: loop body
LE: loop exit
PB: predicated region body
PF: predicated region fallthrough
CT: control target
= control target key end

     0   :  { %vm7_vm0 = vcmask 130048   ;;  %s37_s8 = smov 16   ;;  %s38_s9 = smov 32   ;;  %vm13_vm1 = vcmask 523648   ;;  %vm19_vm2 = vcmask 392448   ;;  %vm25_vm3 = vcmask 261248   ;;  %s55_s0 = inlined_call_operand.vmem [shape: f32[4,16], index: 0, kind: input, shape index: {}]   ;;  %s56_s1 = inlined_call_operand.vmem [shape: f32[64], index: 1, kind: output, shape index: {}]  }
   0x1   :  { %v4_v0 = vld [vmem:[%s55_s0] sm:$0xf]  ;;  %s36_s0 = smov 48  }
   0x2   :  { %5 = vst [vmem:[#allocation1] sm:$0xf] %v4_v0 }
   0x9   :  { %v10_v1 = vld [vmem:[#allocation1 + $0x3] sm:$0x1]   ;;  %v22_v2 = vld [vmem:[#allocation1 + $0x1] sm:$0x1]   ;;  %v6_v3 = vld [vmem:[#allocation1] sm:$0x1]  }
   0xa   :  { %11 = vrot.lane.b32.xlu0 %v10_v1, %s36_s0  ;;  %23 = vrot.lane.b32.xlu1 %v22_v2, %s37_s8  ;;  %v16_v4 = vld [vmem:[#allocation1 + $0x2] sm:$0x1]   ;;  %8 = vst.msk [vmem:[#allocation0] sm:$0x1] %vm7_vm0, %v6_v3  }
   0xe   :  { %17 = vrot.lane.b32.xlu0 %v16_v4, %s38_s9 }
  0x7c   :  { %v12_v5 = vpop.permute.xlu0 %11   ;;  %v24_v6 = vpop.permute.xlu1 %23  }
  0x7d   :  { %14 = vst.msk [vmem:[#allocation0] sm:$0x1] %vm13_vm1, %v12_v5  }
  0x80   :  { %v18_v7 = vpop.permute.xlu0 %17  }
  0x81   :  { %20 = vst.msk [vmem:[#allocation0] sm:$0x1] %vm19_vm2, %v18_v7  }
  0x82   :  { %26 = vst.msk [vmem:[#allocation0] sm:$0x1] %vm25_vm3, %v24_v6  }
  0x89   :  { %v30_v8 = vld [vmem:[#allocation0] sm:$0x1] }
  0x8a   :  { %32 = vst [vmem:[%s56_s1] sm:$0x1] %v30_v8 }

// kernel: tile.31
= control target key start
LH: loop header
LB: loop body
LE: loop exit
PB: predicated region body
PF: predicated region fallthrough
CT: control target
= control target key end

     0   :  { %vm7_vm0 = vcmask 64512   ;;  %s37_s8 = smov 8   ;;  %s38_s9 = smov 16   ;;  %vm13_vm1 = vcmask 261312   ;;  %vm19_vm2 = vcmask 195712   ;;  %vm25_vm3 = vcmask 130112   ;;  %s55_s0 = inlined_call_operand.vmem [shape: f32[4,8], index: 0, kind: input, shape index: {}]   ;;  %s56_s1 = inlined_call_operand.vmem [shape: f32[32], index: 1, kind: output, shape index: {}]  }
   0x1   :  { %v4_v0 = vld [vmem:[%s55_s0] sm:$0xf]  ;;  %s36_s0 = smov 24  }
   0x2   :  { %5 = vst [vmem:[#allocation1] sm:$0xf] %v4_v0 }
   0x9   :  { %v10_v1 = vld [vmem:[#allocation1 + $0x3] sm:$0x1]   ;;  %v22_v2 = vld [vmem:[#allocation1 + $0x1] sm:$0x1]   ;;  %v6_v3 = vld [vmem:[#allocation1] sm:$0x1]  }
   0xa   :  { %11 = vrot.lane.b32.xlu0 %v10_v1, %s36_s0  ;;  %23 = vrot.lane.b32.xlu1 %v22_v2, %s37_s8  ;;  %v16_v4 = vld [vmem:[#allocation1 + $0x2] sm:$0x1]   ;;  %8 = vst.msk [vmem:[#allocation0] sm:$0x1] %vm7_vm0, %v6_v3  }
   0xe   :  { %17 = vrot.lane.b32.xlu0 %v16_v4, %s38_s9 }
  0x7c   :  { %v12_v5 = vpop.permute.xlu0 %11   ;;  %v24_v6 = vpop.permute.xlu1 %23  }
  0x7d   :  { %14 = vst.msk [vmem:[#allocation0] sm:$0x1] %vm13_vm1, %v12_v5  }
  0x80   :  { %v18_v7 = vpop.permute.xlu0 %17  }
  0x81   :  { %20 = vst.msk [vmem:[#allocation0] sm:$0x1] %vm19_vm2, %v18_v7  }
  0x82   :  { %26 = vst.msk [vmem:[#allocation0] sm:$0x1] %vm25_vm3, %v24_v6  }
  0x89   :  { %v30_v8 = vld [vmem:[#allocation0] sm:$0x1] }
  0x8a   :  { %32 = vst [vmem:[%s56_s1] sm:$0x1] %v30_v8 }

// kernel: colorization_net_forward.12
= control target key start
LH: loop header
LB: loop body
LE: loop exit
PB: predicated region body
PF: predicated region fallthrough
CT: control target
= control target key end

     0   :  { %s710_s12 = smov 0   ;;  %s758_s0 = inlined_call_operand.vmem [shape: bf16[512,9], index: 0, kind: input, shape index: {}]   ;;  %s759_s1 = inlined_call_operand.vmem [shape: bf16[9,128], index: 1, kind: input, shape index: {}]   ;;  %s760_s2 = inlined_call_operand.vmem [shape: f32[1,128], index: 2, kind: input, shape index: {}]   ;;  %s761_s3 = inlined_call_operand.vmem [shape: bf16[512,128], index: 3, kind: output, shape index: {}]  }
   0x1 LB: > { %s526_s13 = sadd.s32 4294967295, %s687_s12   ;;  %p530_p0 = scmp.ge.s32.totalorder %s687_s12, 1  ;;  %s687_s12 = sphi %s710_s12, %s13_s12  }
   0x2   : > { %p138_p1 = scmp.lt.s32.totalorder %s687_s12, 5 }
   0x4   : > { %p139_p2 = pnand %p530_p0, %p138_p1 }
   0x5   : > { %v672_v0 = vld [vmem:[%s759_s1] sm:$0x1f] (!%p139_p2)   ;;  %vm270_vm0 = vcmask (!%p139_p2), 1043456   ;;  %vm271_vm1 = vcmask (!%p139_p2), 1044480   ;;  %s531_s16 = sshll.u32 (!%p139_p2), %s526_s13, 4  ;;  %v689_v1 = vmov (!%p139_p2), 65535  }
   0x6   : > { %142 = sbr.rel (%p139_p2) target bundleno = 249 (0xf9), region = 32  ;;  %v272_v2 = vsel (!%p139_p2), %vm270_vm0, 4294967295, %v689_v1  ;;  %p163_p3 = scmp.lt.s32.totalorder (!%p139_p2), %s531_s16, 63  ;;  %vm245_vm2 = vcmask (!%p139_p2), 72704   ;;  %v535_v13 = vld [vmem:[%s760_s2] ss:$0 sm:$0xff] (!%p139_p2) }
   0x7   : > { %v273_v3 = vsel (!%p139_p2), %vm271_vm1, %v272_v2, 0 }
   0x8   : > { %v275_v4 = vand.u32 (!%p139_p2), %v672_v0, %v273_v3 }
   0xa   : > { %643 = vmatprep.subr.bf16.mxu0 (!%p139_p2), %v275_v4  ;;  %661 = vmatprep.subr.bf16.mxu1 (!%p139_p2), %v275_v4 }
   0xb   : > { %644 = vmatpush3.bf16.msra.mxu0 (!%p139_p2), %v275_v4  ;;  %662 = vmatpush3.bf16.msra.mxu1 (!%p139_p2), %v275_v4 }
   0xd   : > { %s763_s16 = smov (!%p163_p3, %s531_s16), 63 }
   0xe   : > { %s532_s17 = sshll.u32 %s763_s16, 2 }
   0xf   : > { %s166_s20 = scalar_lea.vmem %s758_s0, %s532_s17  ;;  %s745_s25 = scalar_lea.vmem %s761_s3, %s532_s17 }
  0x10   : > { %v673_v5 = vld [vmem:[%s166_s20] sm:$0xff]   ;;  %v675_v7 = vld [vmem:[%s166_s20 + $0x8] sm:$0xff]   ;;  %v677_v9 = vld [vmem:[%s166_s20 + $0x10] sm:$0xff]  }
  0x11   : > { %v674_v6 = vld [vmem:[%s166_s20 + $0x20] sm:$0xff]   ;;  %645 = vmatprep.mubr.msk.bf16.mxu0 %vm245_vm2, %v673_v5  ;;  %v676_v8 = vld [vmem:[%s166_s20 + $0x28] sm:$0xff]   ;;  %v678_v10 = vld [vmem:[%s166_s20 + $0x30] sm:$0xff]  }
  0x12   : > { %653 = vmatprep.mubr.msk.bf16.mxu1 %vm245_vm2, %v674_v6  ;;  %646 = vmatmul.mubr.msk.bf16.vlgmr.msra.gmra.mrb[0].mxu0 %vm245_vm2, %v675_v7  ;;  %v679_v11 = vld [vmem:[%s166_s20 + $0x18] sm:$0xff]  }
  0x13   : > { %654 = vmatmul.mubr.msk.bf16.vlgmr.msra.gmra.mrb[0].mxu1 %vm245_vm2, %v676_v8  ;;  %649 = vmatprep.mubr.msk.bf16.mxu0 %vm245_vm2, %v677_v9  ;;  %v680_v12 = vld [vmem:[%s166_s20 + $0x38] sm:$0xff]  }
  0x14   : > { %657 = vmatprep.mubr.msk.bf16.mxu1 %vm245_vm2, %v678_v10 }
  0x1a   : > { %650 = vmatmul.mubr.msk.bf16.gmra.mrb[4].mxu0 %vm245_vm2, %v679_v11 }
  0x1b   : > { %658 = vmatmul.mubr.msk.bf16.gmra.mrb[4].mxu1 %vm245_vm2, %v680_v12 }
  0xe5   : > { %v647_v14 = vpop.f32.mrb[0].mxu0 }
  0xe6   : > { %v320_v15 = vadd.f32 %v647_v14, %v535_v13  ;;  %v655_v16 = vpop.f32.mrb[0].mxu1  ;;  %v311_v17 = vpop.f32.mrb[1].mxu0 }
  0xe7   : > { %v352_v18 = vadd.f32 %v655_v16, %v535_v13  ;;  %v312_v19 = vadd.f32 %v535_v13, %v311_v17  ;;  %v343_v20 = vpop.f32.mrb[1].mxu1  ;;  %v648_v21 = vpop.f32.mrb[2].mxu0 }
  0xe8   : > { %v344_v22 = vadd.f32 %v535_v13, %v343_v20  ;;  %v323_v23 = vadd.f32 %v648_v21, %v535_v13  ;;  %v656_v24 = vpop.f32.mrb[2].mxu1  ;;  %v314_v25 = vpop.f32.mrb[3].mxu0  ;;  %v376_v29 = vmax.f32 %v320_v15, 0.0 }
  0xe9   : > { %v355_v26 = vadd.f32 %v656_v24, %v535_v13  ;;  %v315_v27 = vadd.f32 %v535_v13, %v314_v25  ;;  %v346_v28 = vpop.f32.mrb[3].mxu1  ;;  %v384_v32 = vmax.f32 %v352_v18, 0.0  ;;  %v374_v33 = vmax.f32 %v312_v19, 0.0 }
  0xea   : > { %v377_v30 = vmax.f32 %v323_v23, 0.0  ;;  %v347_v31 = vadd.f32 %v535_v13, %v346_v28  ;;  %v382_v36 = vmax.f32 %v344_v22, 0.0 }
  0xeb   : > { %v385_v34 = vmax.f32 %v355_v26, 0.0  ;;  %v375_v35 = vmax.f32 %v315_v27, 0.0 }
  0xec   : > { %v595_v37 = vpack.c.bf16 %v377_v30, %v376_v29  ;;  %v383_v38 = vmax.f32 %v347_v31, 0.0 }
  0xed   : > { %v615_v39 = vpack.c.bf16 %v385_v34, %v384_v32  ;;  %v590_v40 = vpack.c.bf16 %v375_v35, %v374_v33  ;;  %v651_v41 = vpop.f32.mrb[4].mxu0 }
  0xee   : > { %627 = vst [vmem:[%s745_s25 + $0x8] sm:$0xff] %v595_v37   ;;  %v610_v42 = vpack.c.bf16 %v383_v38, %v382_v36  ;;  %v336_v43 = vadd.f32 %v651_v41, %v535_v13  ;;  %v659_v44 = vpop.f32.mrb[4].mxu1  ;;  %v327_v45 = vpop.f32.mrb[5].mxu0 }
  0xef   : > { %631 = vst [vmem:[%s745_s25 + $0x28] sm:$0xff] %v615_v39   ;;  %591 = vst [vmem:[%s745_s25] sm:$0xff] %v590_v40   ;;  %v368_v46 = vadd.f32 %v659_v44, %v535_v13  ;;  %v328_v47 = vadd.f32 %v535_v13, %v327_v45  ;;  %v359_v48 = vpop.f32.mrb[5].mxu1  ;;  %v652_v49 = vpop.f32.mrb[6].mxu0 }
  0xf0   : > { %630 = vst [vmem:[%s745_s25 + $0x20] sm:$0xff] %v610_v42   ;;  %v360_v50 = vadd.f32 %v535_v13, %v359_v48  ;;  %v339_v51 = vadd.f32 %v652_v49, %v535_v13  ;;  %v660_v52 = vpop.f32.mrb[6].mxu1  ;;  %v330_v53 = vpop.f32.mrb[7].mxu0  ;;  %v380_v57 = vmax.f32 %v336_v43, 0.0 }
  0xf1   : > { %v371_v54 = vadd.f32 %v660_v52, %v535_v13  ;;  %v331_v55 = vadd.f32 %v535_v13, %v330_v53  ;;  %v362_v56 = vpop.f32.mrb[7].mxu1  ;;  %v388_v60 = vmax.f32 %v368_v46, 0.0  ;;  %v378_v61 = vmax.f32 %v328_v47, 0.0 }
  0xf2   : > { %v381_v58 = vmax.f32 %v339_v51, 0.0  ;;  %v363_v59 = vadd.f32 %v535_v13, %v362_v56  ;;  %v386_v0 = vmax.f32 %v360_v50, 0.0 }
  0xf3   : > { %v389_v62 = vmax.f32 %v371_v54, 0.0  ;;  %v379_v63 = vmax.f32 %v331_v55, 0.0 }
  0xf4   : > { %v605_v1 = vpack.c.bf16 %v381_v58, %v380_v57  ;;  %v387_v2 = vmax.f32 %v363_v59, 0.0 }
  0xf5   : > { %v625_v3 = vpack.c.bf16 %v389_v62, %v388_v60  ;;  %v600_v4 = vpack.c.bf16 %v379_v63, %v378_v61 }
  0xf6   : > { %629 = vst [vmem:[%s745_s25 + $0x18] sm:$0xff] %v605_v1   ;;  %v620_v5 = vpack.c.bf16 %v387_v2, %v386_v0 }
  0xf7   : > { %633 = vst [vmem:[%s745_s25 + $0x38] sm:$0xff] %v625_v3   ;;  %628 = vst [vmem:[%s745_s25 + $0x10] sm:$0xff] %v600_v4  }
  0xf8   : > { %632 = vst [vmem:[%s745_s25 + $0x30] sm:$0xff] %v620_v5  }
  0xf9 PF: > { %s13_s12 = sadd.s32 1, %s687_s12  }
  0xfa   : > { %p10_p4 = scmp.ge.s32.totalorder %s13_s12, 6  }
  0xfc   :  { %12 = sbr.rel (!%p10_p4) target bundleno = 1 (0x1), region = 62 }

// kernel: colorization_net_forward.13
= control target key start
LH: loop header
LB: loop body
LE: loop exit
PB: predicated region body
PF: predicated region fallthrough
CT: control target
= control target key end

     0   :  { %s477_s12 = smov 0   ;;  %s519_s0 = inlined_call_operand.vmem [shape: bf16[128,72], index: 0, kind: input, shape index: {}]   ;;  %s520_s1 = inlined_call_operand.vmem [shape: bf16[72,128], index: 1, kind: input, shape index: {}]   ;;  %s521_s2 = inlined_call_operand.vmem [shape: f32[1,128], index: 2, kind: input, shape index: {}]   ;;  %s522_s3 = inlined_call_operand.vmem [shape: bf16[128,128], index: 3, kind: output, shape index: {}]  }
   0x1 LB: > { %s372_s13 = sadd.s32 4294967295, %s455_s12   ;;  %p376_p0 = scmp.ge.s32.totalorder %s455_s12, 1  ;;  %s455_s12 = sphi %s477_s12, %s13_s12  }
   0x2   : > { %p138_p1 = scmp.lt.s32.totalorder %s455_s12, 5 }
   0x4   : > { %p139_p2 = pnand %p376_p0, %p138_p1 }
   0x5   : > { %v442_v0 = vld [vmem:[%s520_s1] sm:$0xff] (!%p139_p2)   ;;  %v443_v1 = vld [vmem:[%s520_s1 + $0x8] sm:$0xff] (!%p139_p2)   ;;  %s377_s18 = sshll.u32 (!%p139_p2), %s372_s13, 2  ;;  %v444_v2 = vld [vmem:[%s520_s1 + $0x10] sm:$0xff] (!%p139_p2)   ;;  %vm232_vm0 = vcmask (!%p139_p2), 588800   ;;  %vm239_vm1 = vcmask (!%p139_p2), 1043456  }
   0x6   : > { %142 = sbr.rel (%p139_p2) target bundleno = 248 (0xf8), region = 32  ;;  %419 = vmatprep.subr.bf16.mxu0 (!%p139_p2), %v442_v0  ;;  %p163_p3 = scmp.lt.s32.totalorder (!%p139_p2), %s377_s18, 15  ;;  %v445_v3 = vld [vmem:[%s520_s1 + $0x18] sm:$0xff] (!%p139_p2)   ;;  %v446_v5 = vld [vmem:[%s520_s1 + $0x20] ss:$0 sps:$4 sm:$0xff] (!%p139_p2)  }
   0x7   : > { %420 = vmatpush3.bf16.msra.mxu0 (!%p139_p2), %v442_v0  ;;  %v241_v6 = vsel (!%p139_p2), %vm239_vm1, %v446_v5, 0  ;;  %v381_v8 = vld [vmem:[%s521_s2] ss:$0 sm:$0xff] (!%p139_p2) }
   0x8   : > { %421 = vmatprep.subr.bf16.mxu0 (!%p139_p2), %v443_v1 }
   0xb   : > { %422 = vmatpush3.bf16.msra.mxu0 (!%p139_p2), %v443_v1 }
   0xc   : > { %423 = vmatprep.subr.bf16.mxu0 (!%p139_p2), %v444_v2 }
   0xd   : > { %s524_s18 = smov (!%p163_p3, %s377_s18), 15 }
   0xe   : > { %s378_s21 = sshll.u32 %s524_s18, 2 }
   0xf   : > { %s166_s26 = scalar_lea.vmem %s519_s0, %s378_s21  ;;  %424 = vmatpush3.bf16.msra.mxu0 %v444_v2  ;;  %s172_s6 = scalar_lea.vmem %s522_s3, %s378_s21 }
  0x10   : > { %v447_v4 = vld [vmem:[%s166_s26] sm:$0xff]   ;;  %425 = vmatprep.subr.bf16.mxu0 %v445_v3  ;;  %v448_v7 = vld [vmem:[%s166_s26 + $0x8] sm:$0xff]  }
  0x11   : > { %429 = vmatprep.mubr.msk.bf16.mxu0 %vm232_vm0, %v447_v4 }
  0x13   : > { %426 = vmatpush3.bf16.msra.mxu0 %v445_v3 }
  0x14   : > { %433 = vmatprep.subr.msk.bf16.mxu0 %vm239_vm1, %v446_v5 }
  0x17   : > { %428 = vmatpush3.bf16.msra.mxu0 %v241_v6 }
  0x1a   : > { %430 = vmatmul.mubr.msk.bf16.vlgmr.msra.gmra.mrb[0].mxu0 %vm232_vm0, %v448_v7 }
  0xed   : > { %v431_v9 = vpop.f32.mrb[0].mxu0 }
  0xee   : > { %v286_v10 = vadd.f32 %v431_v9, %v381_v8  ;;  %v277_v11 = vpop.f32.mrb[1].mxu0 }
  0xef   : > { %v278_v12 = vadd.f32 %v381_v8, %v277_v11  ;;  %v432_v13 = vpop.f32.mrb[2].mxu0 }
  0xf0   : > { %v289_v14 = vadd.f32 %v432_v13, %v381_v8  ;;  %v280_v15 = vpop.f32.mrb[3].mxu0  ;;  %v294_v17 = vmax.f32 %v286_v10, 0.0 }
  0xf1   : > { %v281_v16 = vadd.f32 %v381_v8, %v280_v15  ;;  %v292_v19 = vmax.f32 %v278_v12, 0.0 }
  0xf2   : > { %v295_v18 = vmax.f32 %v289_v14, 0.0 }
  0xf3   : > { %v293_v20 = vmax.f32 %v281_v16, 0.0 }
  0xf4   : > { %v409_v21 = vpack.c.bf16 %v295_v18, %v294_v17 }
  0xf5   : > { %v404_v22 = vpack.c.bf16 %v293_v20, %v292_v19 }
  0xf6   : > { %411 = vst [vmem:[%s172_s6 + $0x8] sm:$0xff] %v409_v21  }
  0xf7   : > { %405 = vst [vmem:[%s172_s6] sm:$0xff] %v404_v22  }
  0xf8 PF: > { %s13_s12 = sadd.s32 1, %s455_s12  }
  0xf9   : > { %p10_p4 = scmp.ge.s32.totalorder %s13_s12, 6  }
  0xfb   :  { %12 = sbr.rel (!%p10_p4) target bundleno = 1 (0x1), region = 62 }

// kernel: colorization_net_forward.14
= control target key start
LH: loop header
LB: loop body
LE: loop exit
PB: predicated region body
PF: predicated region fallthrough
CT: control target
= control target key end

     0   :  { %s466_s12 = smov 0   ;;  %s517_s0 = inlined_call_operand.vmem [shape: bf16[32,144], index: 0, kind: input, shape index: {}]   ;;  %s518_s1 = inlined_call_operand.vmem [shape: bf16[144,128], index: 1, kind: input, shape index: {}]   ;;  %s519_s2 = inlined_call_operand.vmem [shape: f32[1,128], index: 2, kind: input, shape index: {}]   ;;  %s520_s3 = inlined_call_operand.vmem [shape: bf16[32,128], index: 3, kind: output, shape index: {}]  }
   0x1 LB: > { %s381_s13 = sadd.s32 4294967295, %s443_s12   ;;  %p385_p0 = scmp.ge.s32.totalorder %s443_s12, 1  ;;  %s443_s12 = sphi %s466_s12, %s13_s12  }
   0x2   : > { %p139_p1 = scmp.lt.s32.totalorder %s443_s12, 3 }
   0x4   : > { %p140_p2 = pnand %p385_p0, %p139_p1 }
   0x5   : > { %v425_v0 = vld [vmem:[%s518_s1] sm:$0xff] (!%p140_p2)   ;;  %v445_v1 = vmov (!%p140_p2), 0   ;;  %s386_s16 = sshll.u32 (!%p140_p2), %s381_s13, 1  ;;  %v426_v2 = vld [vmem:[%s518_s1 + $0x8] sm:$0xff] (!%p140_p2)   ;;  %v427_v3 = vld [vmem:[%s518_s1 + $0x10] sm:$0xff] (!%p140_p2)   ;;  %vm268_vm0 = vcmask (!%p140_p2), 130048  }
   0x6   : > { %143 = sbr.rel (%p140_p2) target bundleno = 263 (0x107), region = 32  ;;  %272 = vmatprep.subr.bf16.mxu0 (!%p140_p2), %v445_v1  ;;  %p165_p3 = scmp.lt.s32.totalorder (!%p140_p2), %s386_s16, 3  ;;  %v428_v4 = vld [vmem:[%s518_s1 + $0x18] sm:$0xff] (!%p140_p2)   ;;  %v429_v6 = vld [vmem:[%s518_s1 + $0x20] sm:$0xff] (!%p140_p2)   ;;  %v430_v7 = vld [vmem:[%s518_s1 + $0x28] sm:$0xff] (!%p140_p2)  }
   0x7   : > { %273 = vmatpush1.bf16.msra.mxu0 (!%p140_p2), %v425_v0  ;;  %v431_v8 = vld [vmem:[%s518_s1 + $0x30] sm:$0xff] (!%p140_p2)   ;;  %v432_v9 = vld [vmem:[%s518_s1 + $0x38] sm:$0xff] (!%p140_p2)   ;;  %v433_v10 = vld [vmem:[%s518_s1 + $0x40] sm:$0xff] (!%p140_p2)  }
   0x8   : > { %274 = vmatprep.subr.bf16.mxu0 (!%p140_p2), %v445_v1  ;;  %v391_v12 = vld [vmem:[%s519_s2] ss:$0 sm:$0xff] (!%p140_p2) }
   0xb   : > { %275 = vmatpush1.bf16.msra.mxu0 (!%p140_p2), %v426_v2 }
   0xc   : > { %276 = vmatprep.subr.bf16.mxu0 (!%p140_p2), %v445_v1 }
   0xd   : > { %s522_s16 = smov (!%p165_p3, %s386_s16), 3 }
   0xe   : > { %s408_s21 = sshll.u32 %s522_s16, 3  ;;  %s390_s13 = sshll.u32 %s522_s16, 2 }
   0xf   : > { %s169_s24 = scalar_lea.vmem %s517_s0, %s408_s21  ;;  %277 = vmatpush1.bf16.msra.mxu0 %v427_v3  ;;  %s175_s17 = scalar_lea.vmem %s520_s3, %s390_s13 }
  0x10   : > { %v436_v5 = vld [vmem:[%s169_s24 + $0x4] ss:$8 sps:$4 sm:$0xff]   ;;  %278 = vmatprep.subr.bf16.mxu0 %v445_v1  ;;  %v434_v11 = vld [vmem:[%s169_s24] ss:$8 sps:$4 sm:$0xff]  }
  0x11   : > { %403 = vmatprep.mubr.msk.bf16.mxu0 %vm268_vm0, %v436_v5 }
  0x13   : > { %279 = vmatpush1.bf16.msra.mxu0 %v428_v4 }
  0x14   : > { %280 = vmatprep.subr.bf16.mxu0 %v445_v1 }
  0x17   : > { %281 = vmatpush1.bf16.msra.mxu0 %v429_v6 }
  0x18   : > { %282 = vmatprep.subr.bf16.mxu0 %v445_v1 }
  0x1b   : > { %283 = vmatpush1.bf16.msra.mxu0 %v430_v7 }
  0x1c   : > { %284 = vmatprep.subr.bf16.mxu0 %v445_v1 }
  0x1f   : > { %285 = vmatpush1.bf16.msra.mxu0 %v431_v8 }
  0x20   : > { %286 = vmatprep.subr.bf16.mxu0 %v445_v1 }
  0x23   : > { %287 = vmatpush1.bf16.msra.mxu0 %v432_v9 }
  0x24   : > { %288 = vmatprep.subr.bf16.mxu0 %v445_v1 }
  0x27   : > { %289 = vmatpush1.bf16.msra.mxu0 %v433_v10 }
  0x2a   : > { %305 = vmatmul.mubr.bf16.vlgmr.msra.gmra.mrb[0].mxu0 %v434_v11 }
  0xfd   : > { %v306_v13 = vpop.f32.mrb[0].mxu0 }
  0xfe   : > { %v307_v14 = vadd.f32 %v391_v12, %v306_v13  ;;  %v308_v15 = vpop.f32.mrb[1].mxu0 }
  0xff   : > { %v309_v16 = vpop.f32.mrb[2].mxu0 }
 0x100   : > { %v310_v17 = vadd.f32 %v391_v12, %v309_v16  ;;  %v311_v18 = vpop.f32.mrb[3].mxu0  ;;  %v313_v19 = vmax.f32 %v307_v14, 0.0 }
 0x102   : > { %v314_v20 = vmax.f32 %v310_v17, 0.0 }
 0x104   : > { %v414_v21 = vpack.c.bf16 %v314_v20, %v313_v19 }
 0x106   : > { %415 = vst [vmem:[%s175_s17] sm:$0xff] %v414_v21  }
 0x107 PF: > { %s13_s12 = sadd.s32 1, %s443_s12  }
 0x108   : > { %p10_p4 = scmp.ge.s32.totalorder %s13_s12, 4  }
 0x10a   :  { %12 = sbr.rel (!%p10_p4) target bundleno = 1 (0x1), region = 62 }

// kernel: colorization_net_forward.15
= control target key start
LH: loop header
LB: loop body
LE: loop exit
PB: predicated region body
PF: predicated region fallthrough
CT: control target
= control target key end

     0   :  { %v376_v1 = vmov 0.0   ;;  %vm377_vm0 = vmmov 0   ;;  %vm185_vm1 = vcmask 261120   ;;  %s467_s1 = inlined_call_operand.vmem [shape: bf16[288,128], index: 1, kind: input, shape index: {}]   ;;  %s468_s0 = inlined_call_operand.vmem [shape: bf16[16,288], index: 0, kind: input, shape index: {}]   ;;  %s469_s2 = inlined_call_operand.vmem [shape: f32[1,128], index: 2, kind: input, shape index: {}]   ;;  %s470_s3 = inlined_call_operand.vmem [shape: bf16[16,128], index: 3, kind: output, shape index: {}]  }
   0x1   :  { %v354_v0 = vld [vmem:[%s467_s1 + $0x40] sm:$0xff]   ;;  %344 = vmatprep.subr.bf16.mxu1 %v376_v1  ;;  %348 = vmatprep.mubr.msk.bf16.mxu1 %vm377_vm0, %v376_v1  ;;  %v356_v3 = vld [vmem:[%s467_s1 + $0x48] sm:$0xff]   ;;  %v358_v5 = vld [vmem:[%s467_s1 + $0x50] sm:$0xff]  }
   0x2   :  { %v355_v2 = vld [vmem:[%s467_s1] sm:$0xff]   ;;  %319 = vmatprep.subr.bf16.mxu0 %v354_v0  ;;  %v357_v4 = vld [vmem:[%s467_s1 + $0x8] sm:$0xff]   ;;  %v359_v6 = vld [vmem:[%s467_s1 + $0x10] sm:$0xff]  }
   0x3   :  { %320 = vmatpush3.bf16.msra.mxu0 %v355_v2  ;;  %v360_v7 = vld [vmem:[%s467_s1 + $0x58] sm:$0xff]   ;;  %v362_v9 = vld [vmem:[%s467_s1 + $0x60] sm:$0xff]   ;;  %v364_v12 = vld [vmem:[%s467_s1 + $0x68] sm:$0xff]  }
   0x4   :  { %321 = vmatprep.subr.bf16.mxu0 %v356_v3  ;;  %v361_v8 = vld [vmem:[%s467_s1 + $0x18] sm:$0xff]   ;;  %v368_v10 = vld [vmem:[%s467_s1 + $0x80] sm:$0xff]   ;;  %v365_v13 = vld [vmem:[%s467_s1 + $0x28] sm:$0xff]  }
   0x5   :  { %v363_v11 = vld [vmem:[%s467_s1 + $0x20] sm:$0xff]   ;;  %345 = vmatpush3.bf16.msra.mxu1 %v368_v10  ;;  %v374_v15 = vld [vmem:[%s467_s1 + $0x88] sm:$0xff]   ;;  %v366_v16 = vld [vmem:[%s467_s1 + $0x70] sm:$0xff]  }
   0x6   :  { %346 = vmatprep.subr.bf16.mxu1 %v376_v1  ;;  %v373_v14 = vld [vmem:[%s468_s0 + $0x4] ss:$12 sps:$4 sm:$0xff]   ;;  %v375_v17 = vld [vmem:[%s468_s0 + $0x8] ss:$12 sps:$4 sm:$0xff]   ;;  %v369_v19 = vld [vmem:[%s467_s1 + $0x78] sm:$0xff]  }
   0x7   :  { %322 = vmatpush3.bf16.msra.mxu0 %v357_v4  ;;  %221 = vmatprep.mubr.bf16.mxu0 %v373_v14  ;;  %v367_v18 = vld [vmem:[%s467_s1 + $0x30] sm:$0xff]   ;;  %v370_v20 = vld [vmem:[%s467_s1 + $0x38] sm:$0xff]   ;;  %v371_v21 = vld [vmem:[%s468_s0] ss:$12 sps:$4 sm:$0xff]  }
   0x8   :  { %323 = vmatprep.subr.bf16.mxu0 %v358_v5  ;;  %v287_v28 = vld [vmem:[%s469_s2] ss:$0 sm:$0xff] }
   0x9   :  { %347 = vmatpush3.bf16.msra.mxu1 %v374_v15 }
   0xb   :  { %324 = vmatpush3.bf16.msra.mxu0 %v359_v6 }
   0xc   :  { %325 = vmatprep.subr.bf16.mxu0 %v360_v7  ;;  %349 = vmatmul.mubr.msk.bf16.vlgmr.msra.gmra.mrb[0].mxu1 %vm185_vm1, %v375_v17 }
   0xf   :  { %326 = vmatpush3.bf16.msra.mxu0 %v361_v8 }
  0x10   :  { %327 = vmatprep.subr.bf16.mxu0 %v362_v9 }
  0x13   :  { %328 = vmatpush3.bf16.msra.mxu0 %v363_v11 }
  0x14   :  { %329 = vmatprep.subr.bf16.mxu0 %v364_v12 }
  0x17   :  { %330 = vmatpush3.bf16.msra.mxu0 %v365_v13 }
  0x18   :  { %331 = vmatprep.subr.bf16.mxu0 %v366_v16 }
  0x1b   :  { %332 = vmatpush3.bf16.msra.mxu0 %v367_v18 }
  0x1c   :  { %333 = vmatprep.subr.bf16.mxu0 %v369_v19 }
  0x1f   :  { %334 = vmatpush3.bf16.msra.mxu0 %v370_v20 }
  0x22   :  { %222 = vmatmul.mubr.bf16.vlgmr.msra.gmra.mrb[0].mxu0 %v371_v21 }
  0xdf   :  { %v264_v22 = vpop.f32.mrb[0].mxu1 }
  0xe0   :  { %v350_v23 = vpop.f32.mrb[1].mxu1 }
  0xe1   :  { %v267_v24 = vpop.f32.mrb[2].mxu1 }
  0xe2   :  { %v351_v25 = vpop.f32.mrb[3].mxu1 }
  0xf5   :  { %v335_v26 = vpop.f32.mrb[0].mxu0 }
  0xf6   :  { %v336_v27 = vpop.f32.mrb[1].mxu0 }
  0xf7   :  { %v337_v29 = vadd.f32 %v336_v27, %v335_v26  ;;  %v338_v30 = vpop.f32.mrb[2].mxu0 }
  0xf8   :  { %v339_v31 = vpop.f32.mrb[3].mxu0 }
  0xf9   :  { %v224_v32 = vadd.f32 %v337_v29, %v287_v28  ;;  %v340_v33 = vadd.f32 %v339_v31, %v338_v30 }
  0xfb   :  { %v265_v34 = vadd.f32 %v264_v22, %v224_v32  ;;  %v227_v35 = vadd.f32 %v340_v33, %v287_v28 }
  0xfd   :  { %v268_v36 = vadd.f32 %v267_v24, %v227_v35  ;;  %v271_v37 = vmax.f32 %v265_v34, 0.0 }
  0xff   :  { %v272_v38 = vmax.f32 %v268_v36, 0.0 }
 0x101   :  { %v317_v39 = vpack.c.bf16 %v272_v38, %v271_v37 }
 0x103   :  { %318 = vst [vmem:[%s470_s3] sm:$0xff] %v317_v39  }

// kernel: colorization_net_forward.16
= control target key start
LH: loop header
LB: loop body
LE: loop exit
PB: predicated region body
PF: predicated region fallthrough
CT: control target
= control target key end

     0   :  { %v50_v34 = vlaneseq  ;;  %s511_s1 = inlined_call_operand.vmem [shape: bf16[256,256], index: 1, kind: input, shape index: {}]   ;;  %s512_s0 = inlined_call_operand.vmem [shape: bf16[16,256], index: 0, kind: input, shape index: {}]   ;;  %s513_s2 = inlined_call_operand.vmem [shape: f32[1,256], index: 2, kind: input, shape index: {}]   ;;  %s514_s3 = inlined_call_operand.vmem [shape: bf16[16,256], index: 3, kind: output, shape index: {}]  }
   0x1   :  { %v329_v0 = vld [vmem:[%s511_s1 + $0x4] ss:$8 sps:$4 sm:$0xff]   ;;  %v331_v1 = vld [vmem:[%s511_s1] ss:$8 sps:$4 sm:$0xff]   ;;  %v332_v2 = vld [vmem:[%s511_s1 + $0x14] ss:$8 sps:$4 sm:$0xff]  }
   0x2   :  { %230 = vmatprep.subr.bf16.mxu0 %v329_v0  ;;  %v334_v3 = vld [vmem:[%s511_s1 + $0x10] ss:$8 sps:$4 sm:$0xff]   ;;  %v335_v4 = vld [vmem:[%s511_s1 + $0x24] ss:$8 sps:$4 sm:$0xff]   ;;  %v337_v5 = vld [vmem:[%s511_s1 + $0x20] ss:$8 sps:$4 sm:$0xff]  }
   0x3   :  { %231 = vmatpush1.bf16.msra.mxu0 %v331_v1  ;;  %v338_v6 = vld [vmem:[%s511_s1 + $0x34] ss:$8 sps:$4 sm:$0xff]   ;;  %v340_v7 = vld [vmem:[%s511_s1 + $0x30] ss:$8 sps:$4 sm:$0xff]   ;;  %v341_v8 = vld [vmem:[%s511_s1 + $0x44] ss:$8 sps:$4 sm:$0xff]  }
   0x4   :  { %232 = vmatprep.subr.bf16.mxu0 %v332_v2  ;;  %v343_v9 = vld [vmem:[%s511_s1 + $0x40] ss:$8 sps:$4 sm:$0xff]   ;;  %v344_v10 = vld [vmem:[%s511_s1 + $0x54] ss:$8 sps:$4 sm:$0xff]   ;;  %v346_v11 = vld [vmem:[%s511_s1 + $0x50] ss:$8 sps:$4 sm:$0xff]  }
   0x5   :  { %v347_v12 = vld [vmem:[%s511_s1 + $0x64] ss:$8 sps:$4 sm:$0xff]   ;;  %v349_v14 = vld [vmem:[%s511_s1 + $0x60] ss:$8 sps:$4 sm:$0xff]   ;;  %v350_v15 = vld [vmem:[%s511_s1 + $0x74] ss:$8 sps:$4 sm:$0xff]  }
   0x6   :  { %v379_v13 = vld [vmem:[%s512_s0 + $0x4] ss:$8 sps:$4 sm:$0xff]   ;;  %v352_v16 = vld [vmem:[%s511_s1 + $0x70] ss:$8 sps:$4 sm:$0xff]   ;;  %v355_v18 = vld [vmem:[%s511_s1 + $0x80] ss:$8 sps:$4 sm:$0xff]  }
   0x7   :  { %233 = vmatpush1.bf16.msra.mxu0 %v334_v3  ;;  %262 = vmatprep.mubr.bf16.mxu0 %v379_v13  ;;  %v353_v17 = vld [vmem:[%s511_s1 + $0x84] ss:$8 sps:$4 sm:$0xff]   ;;  %v356_v19 = vld [vmem:[%s511_s1 + $0x94] ss:$8 sps:$4 sm:$0xff]   ;;  %v358_v20 = vld [vmem:[%s511_s1 + $0x90] ss:$8 sps:$4 sm:$0xff]  }
   0x8   :  { %234 = vmatprep.subr.bf16.mxu0 %v335_v4  ;;  %v359_v21 = vld [vmem:[%s511_s1 + $0xa4] ss:$8 sps:$4 sm:$0xff]   ;;  %v361_v22 = vld [vmem:[%s511_s1 + $0xa0] ss:$8 sps:$4 sm:$0xff]   ;;  %v362_v23 = vld [vmem:[%s511_s1 + $0xb4] ss:$8 sps:$4 sm:$0xff]  }
   0x9   :  { %v364_v24 = vld [vmem:[%s511_s1 + $0xb0] ss:$8 sps:$4 sm:$0xff]   ;;  %v365_v25 = vld [vmem:[%s511_s1 + $0xc4] ss:$8 sps:$4 sm:$0xff]   ;;  %v367_v26 = vld [vmem:[%s511_s1 + $0xc0] ss:$8 sps:$4 sm:$0xff]  }
   0xa   :  { %v368_v27 = vld [vmem:[%s511_s1 + $0xd4] ss:$8 sps:$4 sm:$0xff]   ;;  %v370_v28 = vld [vmem:[%s511_s1 + $0xd0] ss:$8 sps:$4 sm:$0xff]   ;;  %v371_v29 = vld [vmem:[%s511_s1 + $0xe4] ss:$8 sps:$4 sm:$0xff]  }
   0xb   :  { %235 = vmatpush1.bf16.msra.mxu0 %v337_v5  ;;  %v373_v30 = vld [vmem:[%s511_s1 + $0xe0] ss:$8 sps:$4 sm:$0xff]   ;;  %v374_v31 = vld [vmem:[%s511_s1 + $0xf4] ss:$8 sps:$4 sm:$0xff]   ;;  %v376_v32 = vld [vmem:[%s511_s1 + $0xf0] ss:$8 sps:$4 sm:$0xff]  }
   0xc   :  { %236 = vmatprep.subr.bf16.mxu0 %v338_v6  ;;  %v377_v33 = vld [vmem:[%s512_s0] ss:$8 sps:$4 sm:$0xff]   ;;  %v51_v35 = vshrl.u32 %v50_v34, 7 }
   0xd   :  { %v48_v37 = vld [vmem:[%s513_s2] sm:$0x3] }
   0xe   :  { %v52_v36 = vsub.s32 0, %v51_v35  ;;  %v56_v38 = vsub.s32 1, %v51_v35 }
   0xf   :  { %237 = vmatpush1.bf16.msra.mxu0 %v340_v7 }
  0x10   :  { %238 = vmatprep.subr.bf16.mxu0 %v341_v8  ;;  %v53_v39 = vrot.slane %v48_v37, %v52_v36  ;;  %v57_v40 = vrot.slane %v48_v37, %v56_v38 }
  0x13   :  { %239 = vmatpush1.bf16.msra.mxu0 %v343_v9 }
  0x14   :  { %240 = vmatprep.subr.bf16.mxu0 %v344_v10 }
  0x17   :  { %241 = vmatpush1.bf16.msra.mxu0 %v346_v11 }
  0x18   :  { %242 = vmatprep.subr.bf16.mxu0 %v347_v12 }
  0x1b   :  { %243 = vmatpush1.bf16.msra.mxu0 %v349_v14 }
  0x1c   :  { %244 = vmatprep.subr.bf16.mxu0 %v350_v15 }
  0x1f   :  { %245 = vmatpush1.bf16.msra.mxu0 %v352_v16 }
  0x20   :  { %246 = vmatprep.subr.bf16.mxu0 %v353_v17 }
  0x23   :  { %247 = vmatpush1.bf16.msra.mxu0 %v355_v18 }
  0x24   :  { %248 = vmatprep.subr.bf16.mxu0 %v356_v19 }
  0x27   :  { %249 = vmatpush1.bf16.msra.mxu0 %v358_v20 }
  0x28   :  { %250 = vmatprep.subr.bf16.mxu0 %v359_v21 }
  0x2b   :  { %251 = vmatpush1.bf16.msra.mxu0 %v361_v22 }
  0x2c   :  { %252 = vmatprep.subr.bf16.mxu0 %v362_v23 }
  0x2f   :  { %253 = vmatpush1.bf16.msra.mxu0 %v364_v24 }
  0x30   :  { %254 = vmatprep.subr.bf16.mxu0 %v365_v25 }
  0x33   :  { %255 = vmatpush1.bf16.msra.mxu0 %v367_v26 }
  0x34   :  { %256 = vmatprep.subr.bf16.mxu0 %v368_v27 }
  0x37   :  { %257 = vmatpush1.bf16.msra.mxu0 %v370_v28 }
  0x38   :  { %258 = vmatprep.subr.bf16.mxu0 %v371_v29 }
  0x3b   :  { %259 = vmatpush1.bf16.msra.mxu0 %v373_v30 }
  0x3c   :  { %260 = vmatprep.subr.bf16.mxu0 %v374_v31 }
  0x3f   :  { %261 = vmatpush1.bf16.msra.mxu0 %v376_v32 }
  0x42   :  { %263 = vmatmul.mubr.bf16.vlgmr.msra.gmra.mrb[0].mxu0 %v377_v33 }
 0x115   :  { %v264_v41 = vpop.f32.mrb[0].mxu0 }
 0x116   :  { %v265_v42 = vadd.f32 %v264_v41, %v53_v39  ;;  %v266_v43 = vpop.f32.mrb[1].mxu0 }
 0x117   :  { %v267_v44 = vadd.f32 %v266_v43, %v57_v40  ;;  %v268_v45 = vpop.f32.mrb[2].mxu0 }
 0x118   :  { %v269_v46 = vadd.f32 %v268_v45, %v53_v39  ;;  %v270_v47 = vpop.f32.mrb[3].mxu0 }
 0x119   :  { %v327_v48 = vpack.c.bf16 %v267_v44, %v265_v42  ;;  %v271_v49 = vadd.f32 %v270_v47, %v57_v40 }
 0x11b   :  { %285 = vst [vmem:[%s514_s3] sm:$0xff] %v327_v48  ;;  %v328_v50 = vpack.c.bf16 %v271_v49, %v269_v46 }
 0x11d   :  { %286 = vst [vmem:[%s514_s3 + $0x8] sm:$0xff] %v328_v50 }

// kernel: colorization_net_forward.18
= control target key start
LH: loop header
LB: loop body
LE: loop exit
PB: predicated region body
PF: predicated region fallthrough
CT: control target
= control target key end

     0   :  { %s366_s1 = inlined_call_operand.vmem [shape: bf16[256,128], index: 1, kind: input, shape index: {}]   ;;  %s367_s0 = inlined_call_operand.vmem [shape: bf16[16,256], index: 0, kind: input, shape index: {}]   ;;  %s368_s2 = inlined_call_operand.vmem [shape: f32[1,128], index: 2, kind: input, shape index: {}]   ;;  %s369_s3 = inlined_call_operand.vmem [shape: bf16[16,128], index: 3, kind: output, shape index: {}]  }
   0x1   :  { %v267_v0 = vld [vmem:[%s366_s1 + $0x40] sm:$0xff]   ;;  %v269_v2 = vld [vmem:[%s366_s1 + $0x48] sm:$0xff]   ;;  %v271_v4 = vld [vmem:[%s366_s1 + $0x50] sm:$0xff]  }
   0x2   :  { %v268_v1 = vld [vmem:[%s366_s1] sm:$0xff]   ;;  %245 = vmatprep.subr.bf16.mxu0 %v267_v0  ;;  %v270_v3 = vld [vmem:[%s366_s1 + $0x8] sm:$0xff]   ;;  %v272_v5 = vld [vmem:[%s366_s1 + $0x10] sm:$0xff]  }
   0x3   :  { %246 = vmatpush3.bf16.msra.mxu0 %v268_v1  ;;  %v273_v6 = vld [vmem:[%s366_s1 + $0x58] sm:$0xff]   ;;  %v275_v8 = vld [vmem:[%s366_s1 + $0x60] sm:$0xff]   ;;  %v277_v10 = vld [vmem:[%s366_s1 + $0x68] sm:$0xff]  }
   0x4   :  { %247 = vmatprep.subr.bf16.mxu0 %v269_v2  ;;  %v274_v7 = vld [vmem:[%s366_s1 + $0x18] sm:$0xff]   ;;  %v276_v9 = vld [vmem:[%s366_s1 + $0x20] sm:$0xff]   ;;  %v278_v12 = vld [vmem:[%s366_s1 + $0x28] sm:$0xff]  }
   0x5   :  { %v285_v11 = vld [vmem:[%s367_s0 + $0x4] ss:$8 sps:$4 sm:$0xff]   ;;  %v279_v13 = vld [vmem:[%s366_s1 + $0x70] sm:$0xff]   ;;  %v281_v15 = vld [vmem:[%s366_s1 + $0x78] sm:$0xff]  }
   0x6   :  { %194 = vmatprep.mubr.bf16.mxu0 %v285_v11  ;;  %v280_v14 = vld [vmem:[%s366_s1 + $0x30] sm:$0xff]   ;;  %v282_v16 = vld [vmem:[%s366_s1 + $0x38] sm:$0xff]   ;;  %v283_v17 = vld [vmem:[%s367_s0] ss:$8 sps:$4 sm:$0xff]  }
   0x7   :  { %248 = vmatpush3.bf16.msra.mxu0 %v270_v3  ;;  %v217_v22 = vld [vmem:[%s368_s2] ss:$0 sm:$0xff] }
   0x8   :  { %249 = vmatprep.subr.bf16.mxu0 %v271_v4 }
   0xb   :  { %250 = vmatpush3.bf16.msra.mxu0 %v272_v5 }
   0xc   :  { %251 = vmatprep.subr.bf16.mxu0 %v273_v6 }
   0xf   :  { %252 = vmatpush3.bf16.msra.mxu0 %v274_v7 }
  0x10   :  { %253 = vmatprep.subr.bf16.mxu0 %v275_v8 }
  0x13   :  { %254 = vmatpush3.bf16.msra.mxu0 %v276_v9 }
  0x14   :  { %255 = vmatprep.subr.bf16.mxu0 %v277_v10 }
  0x17   :  { %256 = vmatpush3.bf16.msra.mxu0 %v278_v12 }
  0x18   :  { %257 = vmatprep.subr.bf16.mxu0 %v279_v13 }
  0x1b   :  { %258 = vmatpush3.bf16.msra.mxu0 %v280_v14 }
  0x1c   :  { %259 = vmatprep.subr.bf16.mxu0 %v281_v15 }
  0x1f   :  { %260 = vmatpush3.bf16.msra.mxu0 %v282_v16 }
  0x22   :  { %195 = vmatmul.mubr.bf16.vlgmr.msra.gmra.mrb[0].mxu0 %v283_v17 }
  0xf5   :  { %v261_v18 = vpop.f32.mrb[0].mxu0 }
  0xf6   :  { %v262_v19 = vpop.f32.mrb[1].mxu0 }
  0xf7   :  { %v263_v20 = vadd.f32 %v262_v19, %v261_v18  ;;  %v264_v21 = vpop.f32.mrb[2].mxu0 }
  0xf8   :  { %v265_v23 = vpop.f32.mrb[3].mxu0 }
  0xf9   :  { %v266_v24 = vadd.f32 %v265_v23, %v264_v21  ;;  %v197_v25 = vadd.f32 %v263_v20, %v217_v22 }
  0xfb   :  { %v200_v26 = vadd.f32 %v266_v24, %v217_v22 }
  0xfd   :  { %v243_v27 = vpack.c.bf16 %v200_v26, %v197_v25 }
  0xff   :  { %244 = vst [vmem:[%s369_s3] sm:$0xff] %v243_v27  }

// kernel: colorization_net_forward.17
= control target key start
LH: loop header
LB: loop body
LE: loop exit
PB: predicated region body
PF: predicated region fallthrough
CT: control target
= control target key end

     0   :  { %v1241_v34 = vmov 0.0   ;;  %vm1242_vm0 = vmmov 0   ;;  %vm418_vm1 = vcmask 523264   ;;  %s1539_s3 = inlined_call_operand.vmem [shape: bf16[576,128], index: 3, kind: input, shape index: {}]   ;;  %s1540_s2 = inlined_call_operand.vmem [shape: bf16[16,576], index: 2, kind: input, shape index: {}]   ;;  %s1541_s1 = inlined_call_operand.vmem [shape: bf16[576,128], index: 1, kind: input, shape index: {}]   ;;  %s1542_s0 = inlined_call_operand.vmem [shape: bf16[16,576], index: 0, kind: input, shape index: {}]   ;;  %s1543_s4 = inlined_call_operand.vmem [shape: f32[1,128], index: 4, kind: input, shape index: {}]   ;;  %s1544_s5 = inlined_call_operand.vmem [shape: bf16[16,128], index: 5, kind: output, shape index: {}]  }
   0x1   :  { %v1155_v0 = vld [vmem:[%s1539_s3 + $0x40] sm:$0xff]   ;;  %v1159_v4 = vld [vmem:[%s1539_s3 + $0x48] sm:$0xff]   ;;  %v1163_v8 = vld [vmem:[%s1539_s3 + $0x50] sm:$0xff]  }
   0x2   :  { %v1156_v1 = vld [vmem:[%s1539_s3 + $0xc0] sm:$0xff]   ;;  %1031 = vmatprep.subr.bf16.mxu0 %v1155_v0  ;;  %v1160_v5 = vld [vmem:[%s1539_s3 + $0xc8] sm:$0xff]   ;;  %v1164_v9 = vld [vmem:[%s1539_s3 + $0xd0] sm:$0xff]  }
   0x3   :  { %v1157_v2 = vld [vmem:[%s1539_s3] sm:$0xff]   ;;  %1053 = vmatprep.subr.bf16.mxu1 %v1156_v1  ;;  %v1161_v6 = vld [vmem:[%s1539_s3 + $0x8] sm:$0xff]   ;;  %v1165_v10 = vld [vmem:[%s1539_s3 + $0x10] sm:$0xff]  }
   0x4   :  { %v1158_v3 = vld [vmem:[%s1539_s3 + $0x80] sm:$0xff]   ;;  %1032 = vmatpush3.bf16.msra.mxu0 %v1157_v2  ;;  %v1162_v7 = vld [vmem:[%s1539_s3 + $0x88] sm:$0xff]   ;;  %v1166_v11 = vld [vmem:[%s1539_s3 + $0x90] sm:$0xff]  }
   0x5   :  { %1054 = vmatpush3.bf16.msra.mxu1 %v1158_v3  ;;  %1033 = vmatprep.subr.bf16.mxu0 %v1159_v4  ;;  %v1167_v12 = vld [vmem:[%s1539_s3 + $0x58] sm:$0xff]   ;;  %v1171_v16 = vld [vmem:[%s1539_s3 + $0x60] sm:$0xff]   ;;  %v1175_v20 = vld [vmem:[%s1539_s3 + $0x68] sm:$0xff]  }
   0x6   :  { %1055 = vmatprep.subr.bf16.mxu1 %v1160_v5  ;;  %v1168_v13 = vld [vmem:[%s1539_s3 + $0xd8] sm:$0xff]   ;;  %v1172_v17 = vld [vmem:[%s1539_s3 + $0xe0] sm:$0xff]   ;;  %v1176_v21 = vld [vmem:[%s1539_s3 + $0xe8] sm:$0xff]  }
   0x7   :  { %v1169_v14 = vld [vmem:[%s1539_s3 + $0x18] sm:$0xff]   ;;  %v1173_v18 = vld [vmem:[%s1539_s3 + $0x20] sm:$0xff]   ;;  %v1177_v22 = vld [vmem:[%s1539_s3 + $0x28] sm:$0xff]  }
   0x8   :  { %1034 = vmatpush3.bf16.msra.mxu0 %v1161_v6  ;;  %v1170_v15 = vld [vmem:[%s1539_s3 + $0x98] sm:$0xff]   ;;  %v1174_v19 = vld [vmem:[%s1539_s3 + $0xa0] sm:$0xff]   ;;  %v1178_v23 = vld [vmem:[%s1539_s3 + $0xa8] sm:$0xff]  }
   0x9   :  { %1056 = vmatpush3.bf16.msra.mxu1 %v1162_v7  ;;  %1035 = vmatprep.subr.bf16.mxu0 %v1163_v8  ;;  %v1179_v24 = vld [vmem:[%s1539_s3 + $0x70] sm:$0xff]   ;;  %v1183_v28 = vld [vmem:[%s1539_s3 + $0x78] sm:$0xff]   ;;  %v1192_v36 = vld [vmem:[%s1540_s2 + $0xc] ss:$20 sps:$4 sm:$0xff]  }
   0xa   :  { %1057 = vmatprep.subr.bf16.mxu1 %v1164_v9  ;;  %v1180_v25 = vld [vmem:[%s1539_s3 + $0xf0] sm:$0xff]   ;;  %v1184_v29 = vld [vmem:[%s1539_s3 + $0xf8] sm:$0xff]   ;;  %v1193_v37 = vld [vmem:[%s1541_s1 + $0x40] sm:$0xff]   ;;  %495 = vmatprep.mubr.bf16.mxu1 %v1192_v36 }
   0xb   :  { %v1181_v26 = vld [vmem:[%s1539_s3 + $0x30] sm:$0xff]   ;;  %v1185_v30 = vld [vmem:[%s1539_s3 + $0x38] sm:$0xff]   ;;  %v1194_v38 = vld [vmem:[%s1539_s3 + $0x100] sm:$0xff]  }
   0xc   :  { %1036 = vmatpush3.bf16.msra.mxu0 %v1165_v10  ;;  %v1182_v27 = vld [vmem:[%s1539_s3 + $0xb0] sm:$0xff]   ;;  %v1186_v31 = vld [vmem:[%s1539_s3 + $0xb8] sm:$0xff]   ;;  %v1195_v39 = vld [vmem:[%s1541_s1] sm:$0xff]  }
   0xd   :  { %1058 = vmatpush3.bf16.msra.mxu1 %v1166_v11  ;;  %1037 = vmatprep.subr.bf16.mxu0 %v1167_v12  ;;  %v1187_v32 = vld [vmem:[%s1540_s2] ss:$20 sps:$4 sm:$0xff]   ;;  %v1189_v33 = vld [vmem:[%s1540_s2 + $0x4] ss:$20 sps:$4 sm:$0xff]   ;;  %v1190_v35 = vld [vmem:[%s1540_s2 + $0x8] ss:$20 sps:$4 sm:$0xff]  }
   0xe   :  { %1059 = vmatprep.subr.bf16.mxu1 %v1168_v13  ;;  %454 = vmatprep.mubr.bf16.mxu0 %v1189_v33  ;;  %v1196_v40 = vld [vmem:[%s1541_s1 + $0x48] sm:$0xff]   ;;  %v1199_v43 = vld [vmem:[%s1541_s1 + $0x50] sm:$0xff]   ;;  %v1202_v46 = vld [vmem:[%s1541_s1 + $0x58] sm:$0xff]  }
   0xf   :  { %v1197_v41 = vld [vmem:[%s1539_s3 + $0x108] sm:$0xff]   ;;  %v1200_v44 = vld [vmem:[%s1539_s3 + $0x110] sm:$0xff]   ;;  %v1203_v47 = vld [vmem:[%s1539_s3 + $0x118] sm:$0xff]  }
  0x10   :  { %1038 = vmatpush3.bf16.msra.mxu0 %v1169_v14  ;;  %v1198_v42 = vld [vmem:[%s1541_s1 + $0x8] sm:$0xff]   ;;  %v1201_v45 = vld [vmem:[%s1541_s1 + $0x10] sm:$0xff]   ;;  %v1204_v48 = vld [vmem:[%s1541_s1 + $0x18] sm:$0xff]  }
  0x11   :  { %1060 = vmatpush3.bf16.msra.mxu1 %v1170_v15  ;;  %1039 = vmatprep.subr.bf16.mxu0 %v1171_v16  ;;  %v1205_v49 = vld [vmem:[%s1540_s2 + $0x10] ss:$20 sps:$4 sm:$0xff]   ;;  %v1210_v54 = vld [vmem:[%s1541_s1 + $0x68] sm:$0xff]   ;;  %v1218_v62 = vld [vmem:[%s1541_s1 + $0x78] sm:$0xff]  }
  0x12   :  { %1061 = vmatprep.subr.bf16.mxu1 %v1172_v17  ;;  %v1206_v50 = vld [vmem:[%s1541_s1 + $0x60] sm:$0xff]   ;;  %v1211_v55 = vld [vmem:[%s1541_s1 + $0xc8] sm:$0xff]   ;;  %v1214_v58 = vld [vmem:[%s1541_s1 + $0x70] sm:$0xff]  }
  0x13   :  { %v1207_v51 = vld [vmem:[%s1541_s1 + $0xc0] sm:$0xff]   ;;  %v1212_v56 = vld [vmem:[%s1541_s1 + $0x28] sm:$0xff]   ;;  %v1215_v59 = vld [vmem:[%s1541_s1 + $0xd0] sm:$0xff]  }
  0x14   :  { %1040 = vmatpush3.bf16.msra.mxu0 %v1173_v18  ;;  %v1208_v52 = vld [vmem:[%s1541_s1 + $0x20] sm:$0xff]   ;;  %v1213_v57 = vld [vmem:[%s1541_s1 + $0x88] sm:$0xff]   ;;  %v1216_v60 = vld [vmem:[%s1541_s1 + $0x30] sm:$0xff]  }
  0x15   :  { %1062 = vmatpush3.bf16.msra.mxu1 %v1174_v19  ;;  %1041 = vmatprep.subr.bf16.mxu0 %v1175_v20  ;;  %v1209_v53 = vld [vmem:[%s1541_s1 + $0x80] sm:$0xff]   ;;  %v1217_v61 = vld [vmem:[%s1541_s1 + $0x90] sm:$0xff]   ;;  %v1219_v63 = vld [vmem:[%s1541_s1 + $0xd8] sm:$0xff]  }
  0x16   :  { %1063 = vmatprep.subr.bf16.mxu1 %v1176_v21  ;;  %v1220_v0 = vld [vmem:[%s1541_s1 + $0x38] sm:$0xff]   ;;  %v1222_v2 = vld [vmem:[%s1542_s0] ss:$20 sps:$4 sm:$0xff]   ;;  %v1228_v7 = vld [vmem:[%s1541_s1 + $0xe8] sm:$0xff]  }
  0x17   :  { %v1221_v1 = vld [vmem:[%s1541_s1 + $0x98] sm:$0xff]   ;;  %v1225_v4 = vld [vmem:[%s1541_s1 + $0xe0] sm:$0xff]   ;;  %v1229_v8 = vld [vmem:[%s1541_s1 + $0xa8] sm:$0xff]  }
  0x18   :  { %1042 = vmatpush3.bf16.msra.mxu0 %v1177_v22  ;;  %v1224_v3 = vld [vmem:[%s1542_s0 + $0x4] ss:$20 sps:$4 sm:$0xff]   ;;  %v1230_v9 = vld [vmem:[%s1541_s1 + $0x108] sm:$0xff]   ;;  %v1231_v10 = vld [vmem:[%s1541_s1 + $0xf0] sm:$0xff]  }
  0x19   :  { %1064 = vmatpush3.bf16.msra.mxu1 %v1178_v23  ;;  %1043 = vmatprep.subr.bf16.mxu0 %v1179_v24  ;;  %v1226_v5 = vld [vmem:[%s1541_s1 + $0xa0] sm:$0xff]   ;;  %v1232_v11 = vld [vmem:[%s1541_s1 + $0xb0] sm:$0xff]   ;;  %v1234_v13 = vld [vmem:[%s1541_s1 + $0xf8] sm:$0xff]  }
  0x1a   :  { %1065 = vmatprep.subr.bf16.mxu1 %v1180_v25  ;;  %v1227_v6 = vld [vmem:[%s1541_s1 + $0x100] sm:$0xff]   ;;  %v1233_v12 = vld [vmem:[%s1541_s1 + $0x110] sm:$0xff]   ;;  %v1235_v15 = vld [vmem:[%s1541_s1 + $0xb8] sm:$0xff]  }
  0x1b   :  { %v1238_v14 = vld [vmem:[%s1542_s0 + $0xc] ss:$20 sps:$4 sm:$0xff]   ;;  %v1239_v16 = vld [vmem:[%s1541_s1 + $0x118] sm:$0xff]   ;;  %v1240_v18 = vld [vmem:[%s1542_s0 + $0x10] ss:$20 sps:$4 sm:$0xff]  }
  0x1c   :  { %1044 = vmatpush3.bf16.msra.mxu0 %v1181_v26  ;;  %v1236_v17 = vld [vmem:[%s1542_s0 + $0x8] ss:$20 sps:$4 sm:$0xff]  }
  0x1d   :  { %1066 = vmatpush3.bf16.msra.mxu1 %v1182_v27  ;;  %1045 = vmatprep.subr.bf16.mxu0 %v1183_v28 }
  0x1e   :  { %1067 = vmatprep.subr.bf16.mxu1 %v1184_v29 }
  0x20   :  { %1046 = vmatpush3.bf16.msra.mxu0 %v1185_v30 }
  0x21   :  { %1068 = vmatpush3.bf16.msra.mxu1 %v1186_v31  ;;  %1129 = vmatprep.subr.bf16.mxu0 %v1241_v34 }
  0x22   :  { %1080 = vmatprep.subr.bf16.mxu1 %v1193_v37 }
  0x23   :  { %455 = vmatmul.mubr.bf16.vlgmr.msra.gmra.mrb[0].mxu0 %v1187_v32 }
  0x24   :  { %496 = vmatmul.mubr.bf16.vlgmr.msra.gmra.mrb[0].mxu1 %v1190_v35  ;;  %1130 = vmatpush3.bf16.msra.mxu0 %v1194_v38 }
  0x25   :  { %1137 = vmatprep.mubr.msk.bf16.mxu0 %vm1242_vm0, %v1241_v34  ;;  %1081 = vmatpush3.bf16.msra.mxu1 %v1195_v39 }
  0x26   :  { %1131 = vmatprep.subr.bf16.mxu0 %v1241_v34  ;;  %1082 = vmatprep.subr.bf16.mxu1 %v1196_v40 }
  0x27   :  { %821 = vmatprep.mubr.bf16.mxu1 %v1224_v3 }
  0x28   :  { %1132 = vmatpush3.bf16.msra.mxu0 %v1197_v41 }
  0x29   :  { %1083 = vmatpush3.bf16.msra.mxu1 %v1198_v42  ;;  %1133 = vmatprep.subr.bf16.mxu0 %v1241_v34 }
  0x2a   :  { %1084 = vmatprep.subr.bf16.mxu1 %v1199_v43 }
  0x2c   :  { %1134 = vmatpush3.bf16.msra.mxu0 %v1200_v44 }
  0x2d   :  { %1085 = vmatpush3.bf16.msra.mxu1 %v1201_v45  ;;  %1135 = vmatprep.subr.bf16.mxu0 %v1241_v34 }
  0x2e   :  { %1086 = vmatprep.subr.bf16.mxu1 %v1202_v46 }
  0x30   :  { %1136 = vmatpush3.bf16.msra.mxu0 %v1203_v47 }
  0x31   :  { %1087 = vmatpush3.bf16.msra.mxu1 %v1204_v48  ;;  %1102 = vmatprep.subr.bf16.mxu0 %v1207_v51 }
  0x32   :  { %1088 = vmatprep.subr.bf16.mxu1 %v1206_v50 }
  0x33   :  { %1138 = vmatmul.mubr.msk.bf16.vlgmr.msra.gmra.mrb[4].mxu0 %vm418_vm1, %v1205_v49 }
  0x34   :  { %1103 = vmatpush3.bf16.msra.mxu0 %v1209_v53  ;;  %862 = vmatprep.mubr.bf16.mxu0 %v1238_v14 }
  0x35   :  { %1089 = vmatpush3.bf16.msra.mxu1 %v1208_v52  ;;  %1104 = vmatprep.subr.bf16.mxu0 %v1211_v55 }
  0x36   :  { %1090 = vmatprep.subr.bf16.mxu1 %v1210_v54 }
  0x38   :  { %1105 = vmatpush3.bf16.msra.mxu0 %v1213_v57 }
  0x39   :  { %1091 = vmatpush3.bf16.msra.mxu1 %v1212_v56  ;;  %1106 = vmatprep.subr.bf16.mxu0 %v1215_v59 }
  0x3a   :  { %1092 = vmatprep.subr.bf16.mxu1 %v1214_v58  ;;  %v1021_v58 = vld [vmem:[%s1543_s4] ss:$0 sm:$0xff] }
  0x3c   :  { %1107 = vmatpush3.bf16.msra.mxu0 %v1217_v61 }
  0x3d   :  { %1093 = vmatpush3.bf16.msra.mxu1 %v1216_v60  ;;  %1108 = vmatprep.subr.bf16.mxu0 %v1219_v63 }
  0x3e   :  { %1094 = vmatprep.subr.bf16.mxu1 %v1218_v62 }
  0x40   :  { %1109 = vmatpush3.bf16.msra.mxu0 %v1221_v1 }
  0x41   :  { %1095 = vmatpush3.bf16.msra.mxu1 %v1220_v0  ;;  %1110 = vmatprep.subr.bf16.mxu0 %v1225_v4 }
  0x42   :  { %1141 = vmatprep.subr.bf16.mxu1 %v1241_v34 }
  0x44   :  { %822 = vmatmul.mubr.bf16.vlgmr.msra.gmra.mrb[4].mxu1 %v1222_v2  ;;  %1111 = vmatpush3.bf16.msra.mxu0 %v1226_v5 }
  0x45   :  { %1142 = vmatpush3.bf16.msra.mxu1 %v1227_v6  ;;  %1112 = vmatprep.subr.bf16.mxu0 %v1228_v7 }
  0x46   :  { %1143 = vmatprep.subr.bf16.mxu1 %v1241_v34  ;;  %1149 = vmatprep.mubr.msk.bf16.mxu1 %vm1242_vm0, %v1241_v34 }
  0x48   :  { %1113 = vmatpush3.bf16.msra.mxu0 %v1229_v8 }
  0x49   :  { %1144 = vmatpush3.bf16.msra.mxu1 %v1230_v9  ;;  %1114 = vmatprep.subr.bf16.mxu0 %v1231_v10 }
  0x4a   :  { %1145 = vmatprep.subr.bf16.mxu1 %v1241_v34 }
  0x4c   :  { %1115 = vmatpush3.bf16.msra.mxu0 %v1232_v11 }
  0x4d   :  { %1146 = vmatpush3.bf16.msra.mxu1 %v1233_v12  ;;  %1116 = vmatprep.subr.bf16.mxu0 %v1234_v13 }
  0x4e   :  { %1147 = vmatprep.subr.bf16.mxu1 %v1241_v34 }
  0x50   :  { %1117 = vmatpush3.bf16.msra.mxu0 %v1235_v15 }
  0x51   :  { %1148 = vmatpush3.bf16.msra.mxu1 %v1239_v16 }
  0x53   :  { %863 = vmatmul.mubr.bf16.vlgmr.msra.gmra.mrb[8].mxu0 %v1236_v17 }
  0x54   :  { %1150 = vmatmul.mubr.msk.bf16.vlgmr.msra.gmra.mrb[8].mxu1 %vm418_vm1, %v1240_v18 }
  0xf6   :  { %v1047_v19 = vpop.f32.mrb[0].mxu0 }
  0xf7   :  { %v1069_v20 = vpop.f32.mrb[0].mxu1  ;;  %v1048_v21 = vpop.f32.mrb[1].mxu0 }
  0xf8   :  { %v1049_v22 = vadd.f32 %v1048_v21, %v1047_v19  ;;  %v1070_v23 = vpop.f32.mrb[1].mxu1  ;;  %v1050_v24 = vpop.f32.mrb[2].mxu0 }
  0xf9   :  { %v1071_v25 = vadd.f32 %v1070_v23, %v1069_v20  ;;  %v1072_v26 = vpop.f32.mrb[2].mxu1  ;;  %v1051_v27 = vpop.f32.mrb[3].mxu0 }
  0xfa   :  { %v1052_v28 = vadd.f32 %v1051_v27, %v1050_v24  ;;  %v1073_v29 = vpop.f32.mrb[3].mxu1 }
  0xfb   :  { %v1074_v30 = vadd.f32 %v1073_v29, %v1072_v26  ;;  %v498_v31 = vadd.f32 %v1071_v25, %v1049_v22 }
  0xfd   :  { %v501_v32 = vadd.f32 %v1074_v30, %v1052_v28 }
 0x106   :  { %v538_v33 = vpop.f32.mrb[4].mxu0 }
 0x107   :  { %v539_v34 = vadd.f32 %v538_v33, %v498_v31  ;;  %v1139_v35 = vpop.f32.mrb[5].mxu0 }
 0x108   :  { %v541_v36 = vpop.f32.mrb[6].mxu0 }
 0x109   :  { %v542_v37 = vadd.f32 %v541_v36, %v501_v32  ;;  %v1140_v38 = vpop.f32.mrb[7].mxu0 }
 0x117   :  { %v1096_v39 = vpop.f32.mrb[4].mxu1 }
 0x118   :  { %v1097_v40 = vpop.f32.mrb[5].mxu1 }
 0x119   :  { %v1098_v41 = vadd.f32 %v1097_v40, %v1096_v39  ;;  %v1099_v42 = vpop.f32.mrb[6].mxu1 }
 0x11a   :  { %v1100_v43 = vpop.f32.mrb[7].mxu1 }
 0x11b   :  { %v824_v44 = vadd.f32 %v1098_v41, %v539_v34  ;;  %v1101_v45 = vadd.f32 %v1100_v43, %v1099_v42 }
 0x11d   :  { %v827_v46 = vadd.f32 %v1101_v45, %v542_v37 }
 0x126   :  { %v1118_v47 = vpop.f32.mrb[8].mxu0 }
 0x127   :  { %v1119_v48 = vpop.f32.mrb[9].mxu0  ;;  %v905_v49 = vpop.f32.mrb[8].mxu1 }
 0x128   :  { %v1120_v50 = vadd.f32 %v1119_v48, %v1118_v47  ;;  %v1121_v51 = vpop.f32.mrb[10].mxu0  ;;  %v1151_v52 = vpop.f32.mrb[9].mxu1 }
 0x129   :  { %v1122_v53 = vpop.f32.mrb[11].mxu0  ;;  %v908_v54 = vpop.f32.mrb[10].mxu1 }
 0x12a   :  { %v865_v55 = vadd.f32 %v1120_v50, %v824_v44  ;;  %v1123_v56 = vadd.f32 %v1122_v53, %v1121_v51  ;;  %v1152_v57 = vpop.f32.mrb[11].mxu1 }
 0x12c   :  { %v906_v59 = vadd.f32 %v905_v49, %v865_v55  ;;  %v868_v60 = vadd.f32 %v1123_v56, %v827_v46 }
 0x12e   :  { %v919_v61 = vadd.f32 %v1021_v58, %v906_v59  ;;  %v909_v62 = vadd.f32 %v908_v54, %v868_v60 }
 0x130   :  { %v920_v63 = vadd.f32 %v1021_v58, %v909_v62  ;;  %v921_v0 = vmax.f32 %v919_v61, 0.0 }
 0x132   :  { %v922_v1 = vmax.f32 %v920_v63, 0.0 }
 0x134   :  { %v1029_v2 = vpack.c.bf16 %v922_v1, %v921_v0 }
 0x136   :  { %1030 = vst [vmem:[%s1544_s5] sm:$0xff] %v1029_v2  }

// kernel: colorization_net_forward.19
= control target key start
LH: loop header
LB: loop body
LE: loop exit
PB: predicated region body
PF: predicated region fallthrough
CT: control target
= control target key end

     0   :  { %s1071_s18 = smov 0   ;;  %s1225_s0 = inlined_call_operand.vmem [shape: bf16[32,288], index: 0, kind: input, shape index: {}]   ;;  %s1226_s1 = inlined_call_operand.vmem [shape: bf16[288,128], index: 1, kind: input, shape index: {}]   ;;  %s1227_s2 = inlined_call_operand.vmem [shape: bf16[32,288], index: 2, kind: input, shape index: {}]   ;;  %s1228_s3 = inlined_call_operand.vmem [shape: bf16[288,128], index: 3, kind: input, shape index: {}]   ;;  %s1229_s4 = inlined_call_operand.vmem [shape: f32[1,128], index: 4, kind: input, shape index: {}]   ;;  %s1230_s5 = inlined_call_operand.vmem [shape: bf16[32,128], index: 5, kind: output, shape index: {}]  }
   0x1 LB: > { %s843_s19 = sadd.s32 4294967295, %s1037_s18   ;;  %p847_p0 = scmp.ge.s32.totalorder %s1037_s18, 1  ;;  %s1037_s18 = sphi %s1071_s18, %s15_s18  }
   0x2   : > { %p201_p1 = scmp.lt.s32.totalorder %s1037_s18, 3 }
   0x4   : > { %p202_p2 = pnand %p847_p0, %p201_p1 }
   0x5   : > { %v987_v0 = vld [vmem:[%s1228_s3 + $0x40] sm:$0xff] (!%p202_p2)   ;;  %v1039_v1 = vmov (!%p202_p2), 0.0   ;;  %vm1040_vm0 = vmmov (!%p202_p2), 0   ;;  %s848_s26 = sshll.u32 (!%p202_p2), %s843_s19, 1  ;;  %v990_v4 = vld [vmem:[%s1228_s3 + $0x48] sm:$0xff] (!%p202_p2)   ;;  %v994_v8 = vld [vmem:[%s1228_s3 + $0x50] sm:$0xff] (!%p202_p2)  }
   0x6   : > { %205 = sbr.rel (%p202_p2) target bundleno = 278 (0x116), region = 40  ;;  %960 = vmatprep.subr.bf16.mxu1 (!%p202_p2), %v1039_v1  ;;  %v988_v2 = vld [vmem:[%s1228_s3 + $0x80] sm:$0xff] (!%p202_p2)   ;;  %910 = vmatprep.subr.bf16.mxu0 (!%p202_p2), %v987_v0  ;;  %p237_p3 = scmp.lt.s32.totalorder (!%p202_p2), %s848_s26, 3  ;;  %v991_v5 = vld [vmem:[%s1228_s3 + $0x88] sm:$0xff] (!%p202_p2)   ;;  %vm460_vm1 = vcmask (!%p202_p2), 261120   ;;  %v997_v10 = vld [vmem:[%s1228_s3 + $0x10] sm:$0xff] (!%p202_p2)  }
   0x7   : > { %v989_v3 = vld [vmem:[%s1228_s3] sm:$0xff] (!%p202_p2)   ;;  %964 = vmatprep.mubr.msk.bf16.mxu1 (!%p202_p2), %vm1040_vm0, %v1039_v1  ;;  %961 = vmatpush3.bf16.msra.mxu1 (!%p202_p2), %v988_v2  ;;  %v992_v6 = vld [vmem:[%s1228_s3 + $0x8] sm:$0xff] (!%p202_p2)   ;;  %v999_v13 = vld [vmem:[%s1228_s3 + $0x58] sm:$0xff] (!%p202_p2)  }
   0x8   : > { %911 = vmatpush3.bf16.msra.mxu0 (!%p202_p2), %v989_v3  ;;  %962 = vmatprep.subr.bf16.mxu1 (!%p202_p2), %v1039_v1  ;;  %v993_v7 = vld [vmem:[%s1226_s1 + $0x40] sm:$0xff] (!%p202_p2)   ;;  %v998_v12 = vld [vmem:[%s1226_s1 + $0x48] sm:$0xff] (!%p202_p2)   ;;  %v1001_v15 = vld [vmem:[%s1228_s3 + $0x18] sm:$0xff] (!%p202_p2)  }
   0x9   : > { %912 = vmatprep.subr.bf16.mxu0 (!%p202_p2), %v990_v4  ;;  %v996_v9 = vld [vmem:[%s1226_s1] sm:$0xff] (!%p202_p2)   ;;  %v1000_v14 = vld [vmem:[%s1226_s1 + $0x8] sm:$0xff] (!%p202_p2)   ;;  %v1002_v16 = vld [vmem:[%s1226_s1 + $0x50] sm:$0xff] (!%p202_p2)  }
   0xa   : > { %v1003_v17 = vld [vmem:[%s1228_s3 + $0x60] sm:$0xff] (!%p202_p2)   ;;  %v1004_v18 = vld [vmem:[%s1226_s1 + $0x10] sm:$0xff] (!%p202_p2)   ;;  %v1006_v20 = vld [vmem:[%s1226_s1 + $0x58] sm:$0xff] (!%p202_p2)  }
   0xb   : > { %963 = vmatpush3.bf16.msra.mxu1 (!%p202_p2), %v991_v5  ;;  %v1005_v19 = vld [vmem:[%s1228_s3 + $0x20] sm:$0xff] (!%p202_p2)   ;;  %v1007_v21 = vld [vmem:[%s1228_s3 + $0x68] sm:$0xff] (!%p202_p2)   ;;  %v1008_v22 = vld [vmem:[%s1226_s1 + $0x18] sm:$0xff] (!%p202_p2)  }
   0xc   : > { %913 = vmatpush3.bf16.msra.mxu0 (!%p202_p2), %v992_v6  ;;  %935 = vmatprep.subr.bf16.mxu1 (!%p202_p2), %v993_v7  ;;  %v1009_v23 = vld [vmem:[%s1228_s3 + $0x28] sm:$0xff] (!%p202_p2)   ;;  %v1010_v24 = vld [vmem:[%s1226_s1 + $0x60] sm:$0xff] (!%p202_p2)   ;;  %v1011_v25 = vld [vmem:[%s1228_s3 + $0x70] sm:$0xff] (!%p202_p2)  }
   0xd   : > { %s1232_s26 = smov (!%p237_p3, %s848_s26), 3  ;;  %914 = vmatprep.subr.bf16.mxu0 %v994_v8  ;;  %v1012_v26 = vld [vmem:[%s1226_s1 + $0x20] sm:$0xff]   ;;  %v1013_v27 = vld [vmem:[%s1228_s3 + $0x30] sm:$0xff]   ;;  %v1014_v28 = vld [vmem:[%s1226_s1 + $0x68] sm:$0xff]  }
   0xe   : > { %s976_s12 = smul.u32 12, %s1232_s26  ;;  %v1015_v29 = vld [vmem:[%s1228_s3 + $0x78] sm:$0xff]   ;;  %v1016_v30 = vld [vmem:[%s1226_s1 + $0x28] sm:$0xff]   ;;  %v1021_v34 = vld [vmem:[%s1226_s1 + $0x70] sm:$0xff]   ;;  %s853_s10 = sshll.u32 %s1232_s26, 2 }
   0xf   : > { %v1017_v31 = vld [vmem:[%s1228_s3 + $0x38] sm:$0xff]   ;;  %v1022_v35 = vld [vmem:[%s1226_s1 + $0x30] sm:$0xff]   ;;  %v1023_v36 = vld [vmem:[%s1226_s1 + $0x80] sm:$0xff]   ;;  %s254_s14 = scalar_lea.vmem %s1230_s5, %s853_s10 }
  0x10   : > { %s1118_s17 = scalar_lea.vmem %s1227_s2, %s976_s12  ;;  %915 = vmatpush3.bf16.msra.mxu0 %v997_v10  ;;  %s241_s27 = scalar_lea.vmem %s1225_s0, %s976_s12  ;;  %v1024_v37 = vld [vmem:[%s1226_s1 + $0x78] sm:$0xff]   ;;  %v1029_v40 = vld [vmem:[%s1226_s1 + $0x88] sm:$0xff]   ;;  %v898_v2 = vld [vmem:[%s1229_s4] ss:$0 sm:$0xff] }
  0x11   : > { %v995_v11 = vld [vmem:[%s1118_s17 + $0x8] ss:$12 sps:$4 sm:$0xff]   ;;  %916 = vmatprep.subr.bf16.mxu0 %v999_v13  ;;  %v1018_v32 = vld [vmem:[%s1118_s17] ss:$12 sps:$4 sm:$0xff]   ;;  %v1020_v33 = vld [vmem:[%s1118_s17 + $0x4] ss:$12 sps:$4 sm:$0xff]  }
  0x12   : > { %965 = vmatmul.mubr.msk.bf16.vlgmr.msra.gmra.mrb[0].mxu1 %vm460_vm1, %v995_v11  ;;  %496 = vmatprep.mubr.bf16.mxu0 %v1020_v33  ;;  %v1025_v38 = vld [vmem:[%s1226_s1 + $0x38] sm:$0xff]   ;;  %v1028_v39 = vld [vmem:[%s241_s27 + $0x4] ss:$12 sps:$4 sm:$0xff]   ;;  %v1026_v41 = vld [vmem:[%s241_s27] ss:$12 sps:$4 sm:$0xff]  }
  0x13   : > { %936 = vmatpush3.bf16.msra.mxu1 %v996_v9  ;;  %704 = vmatprep.mubr.bf16.mxu1 %v1028_v39  ;;  %v1030_v42 = vld [vmem:[%s241_s27 + $0x8] ss:$12 sps:$4 sm:$0xff]  }
  0x14   : > { %937 = vmatprep.subr.bf16.mxu1 %v998_v12  ;;  %917 = vmatpush3.bf16.msra.mxu0 %v1001_v15 }
  0x15   : > { %918 = vmatprep.subr.bf16.mxu0 %v1003_v17 }
  0x17   : > { %938 = vmatpush3.bf16.msra.mxu1 %v1000_v14 }
  0x18   : > { %939 = vmatprep.subr.bf16.mxu1 %v1002_v16  ;;  %919 = vmatpush3.bf16.msra.mxu0 %v1005_v19 }
  0x19   : > { %920 = vmatprep.subr.bf16.mxu0 %v1007_v21 }
  0x1b   : > { %940 = vmatpush3.bf16.msra.mxu1 %v1004_v18 }
  0x1c   : > { %941 = vmatprep.subr.bf16.mxu1 %v1006_v20  ;;  %921 = vmatpush3.bf16.msra.mxu0 %v1009_v23 }
  0x1d   : > { %922 = vmatprep.subr.bf16.mxu0 %v1011_v25 }
  0x1f   : > { %942 = vmatpush3.bf16.msra.mxu1 %v1008_v22 }
  0x20   : > { %943 = vmatprep.subr.bf16.mxu1 %v1010_v24  ;;  %923 = vmatpush3.bf16.msra.mxu0 %v1013_v27 }
  0x21   : > { %924 = vmatprep.subr.bf16.mxu0 %v1015_v29 }
  0x23   : > { %944 = vmatpush3.bf16.msra.mxu1 %v1012_v26 }
  0x24   : > { %945 = vmatprep.subr.bf16.mxu1 %v1014_v28  ;;  %925 = vmatpush3.bf16.msra.mxu0 %v1017_v31 }
  0x25   : > { %968 = vmatprep.subr.bf16.mxu0 %v1039_v1 }
  0x27   : > { %946 = vmatpush3.bf16.msra.mxu1 %v1016_v30  ;;  %497 = vmatmul.mubr.bf16.vlgmr.msra.gmra.mrb[0].mxu0 %v1018_v32 }
  0x28   : > { %947 = vmatprep.subr.bf16.mxu1 %v1021_v34  ;;  %972 = vmatprep.mubr.msk.bf16.mxu0 %vm1040_vm0, %v1039_v1 }
  0x29   : > { %969 = vmatpush3.bf16.msra.mxu0 %v1023_v36 }
  0x2a   : > { %970 = vmatprep.subr.bf16.mxu0 %v1039_v1 }
  0x2b   : > { %948 = vmatpush3.bf16.msra.mxu1 %v1022_v35 }
  0x2c   : > { %949 = vmatprep.subr.bf16.mxu1 %v1024_v37 }
  0x2d   : > { %971 = vmatpush3.bf16.msra.mxu0 %v1029_v40 }
  0x2f   : > { %950 = vmatpush3.bf16.msra.mxu1 %v1025_v38 }
  0x30   : > { %973 = vmatmul.mubr.msk.bf16.vlgmr.msra.gmra.mrb[4].mxu0 %vm460_vm1, %v1030_v42 }
  0x32   : > { %705 = vmatmul.mubr.bf16.vlgmr.msra.gmra.mrb[4].mxu1 %v1026_v41 }
  0xe5   : > { %v539_v43 = vpop.f32.mrb[0].mxu1 }
  0xe6   : > { %v966_v44 = vpop.f32.mrb[1].mxu1 }
  0xe7   : > { %v542_v45 = vpop.f32.mrb[2].mxu1 }
  0xe8   : > { %v967_v46 = vpop.f32.mrb[3].mxu1 }
  0xfa   : > { %v926_v47 = vpop.f32.mrb[0].mxu0 }
  0xfb   : > { %v927_v48 = vpop.f32.mrb[1].mxu0 }
  0xfc   : > { %v928_v49 = vadd.f32 %v927_v48, %v926_v47  ;;  %v929_v50 = vpop.f32.mrb[2].mxu0 }
  0xfd   : > { %v930_v51 = vpop.f32.mrb[3].mxu0 }
  0xfe   : > { %v540_v52 = vadd.f32 %v928_v49, %v539_v43  ;;  %v931_v53 = vadd.f32 %v930_v51, %v929_v50 }
 0x100   : > { %v543_v54 = vadd.f32 %v931_v53, %v542_v45 }
 0x103   : > { %v747_v56 = vpop.f32.mrb[4].mxu0 }
 0x104   : > { %v974_v58 = vpop.f32.mrb[5].mxu0 }
 0x105   : > { %v951_v55 = vpop.f32.mrb[4].mxu1  ;;  %v750_v61 = vpop.f32.mrb[6].mxu0 }
 0x106   : > { %v952_v57 = vpop.f32.mrb[5].mxu1  ;;  %v975_v63 = vpop.f32.mrb[7].mxu0 }
 0x107   : > { %v953_v59 = vadd.f32 %v952_v57, %v951_v55  ;;  %v954_v60 = vpop.f32.mrb[6].mxu1 }
 0x108   : > { %v955_v62 = vpop.f32.mrb[7].mxu1 }
 0x109   : > { %v707_v0 = vadd.f32 %v953_v59, %v540_v52  ;;  %v956_v1 = vadd.f32 %v955_v62, %v954_v60 }
 0x10b   : > { %v748_v3 = vadd.f32 %v747_v56, %v707_v0  ;;  %v710_v4 = vadd.f32 %v956_v1, %v543_v54 }
 0x10d   : > { %v761_v5 = vadd.f32 %v898_v2, %v748_v3  ;;  %v751_v6 = vadd.f32 %v750_v61, %v710_v4 }
 0x10f   : > { %v762_v7 = vadd.f32 %v898_v2, %v751_v6  ;;  %v763_v8 = vmax.f32 %v761_v5, 0.0 }
 0x111   : > { %v764_v9 = vmax.f32 %v762_v7, 0.0 }
 0x113   : > { %v908_v10 = vpack.c.bf16 %v764_v9, %v763_v8 }
 0x115   : > { %909 = vst [vmem:[%s254_s14] sm:$0xff] %v908_v10  }
 0x116 PF: > { %s15_s18 = sadd.s32 1, %s1037_s18  }
 0x117   : > { %p12_p4 = scmp.ge.s32.totalorder %s15_s18, 4  }
 0x119   :  { %14 = sbr.rel (!%p12_p4) target bundleno = 1 (0x1), region = 73 }

// kernel: colorization_net_forward.20
= control target key start
LH: loop header
LB: loop body
LE: loop exit
PB: predicated region body
PF: predicated region fallthrough
CT: control target
= control target key end

     0   :  { %s469_s12 = smov 0   ;;  %s516_s0 = inlined_call_operand.vmem [shape: bf16[32,128], index: 0, kind: input, shape index: {}]   ;;  %s517_s1 = inlined_call_operand.vmem [shape: bf16[128,128], index: 1, kind: input, shape index: {}]   ;;  %s518_s2 = inlined_call_operand.vmem [shape: f32[1,128], index: 2, kind: input, shape index: {}]   ;;  %s519_s3 = inlined_call_operand.vmem [shape: bf16[32,128], index: 3, kind: output, shape index: {}]  }
   0x1 LB: > { %s361_s13 = sadd.s32 4294967295, %s445_s12   ;;  %p365_p0 = scmp.ge.s32.totalorder %s445_s12, 1  ;;  %s445_s12 = sphi %s469_s12, %s13_s12  }
   0x2   : > { %p138_p1 = scmp.lt.s32.totalorder %s445_s12, 3 }
   0x4   : > { %p139_p2 = pnand %p365_p0, %p138_p1 }
   0x5   : > { %v430_v0 = vld [vmem:[%s517_s1] sm:$0xff] (!%p139_p2)   ;;  %v447_v1 = vmov (!%p139_p2), 0.0   ;;  %v431_v2 = vld [vmem:[%s517_s1 + $0x8] sm:$0xff] (!%p139_p2)   ;;  %vm448_vm0 = vmmov (!%p139_p2), 0   ;;  %s366_s18 = sshll.u32 (!%p139_p2), %s361_s13, 1  ;;  %v432_v3 = vld [vmem:[%s517_s1 + $0x10] sm:$0xff] (!%p139_p2)  }
   0x6   : > { %142 = sbr.rel (%p139_p2) target bundleno = 257 (0x101), region = 32  ;;  %400 = vmatprep.subr.bf16.mxu0 (!%p139_p2), %v447_v1  ;;  %416 = vmatprep.mubr.msk.bf16.mxu0 (!%p139_p2), %vm448_vm0, %v447_v1  ;;  %p163_p3 = scmp.lt.s32.totalorder (!%p139_p2), %s366_s18, 3  ;;  %v433_v4 = vld [vmem:[%s517_s1 + $0x18] sm:$0xff] (!%p139_p2)   ;;  %v434_v5 = vld [vmem:[%s517_s1 + $0x20] sm:$0xff] (!%p139_p2)   ;;  %v435_v6 = vld [vmem:[%s517_s1 + $0x28] sm:$0xff] (!%p139_p2)  }
   0x7   : > { %401 = vmatpush3.bf16.msra.mxu0 (!%p139_p2), %v430_v0  ;;  %v436_v7 = vld [vmem:[%s517_s1 + $0x30] sm:$0xff] (!%p139_p2)   ;;  %v437_v8 = vld [vmem:[%s517_s1 + $0x38] sm:$0xff] (!%p139_p2)   ;;  %v370_v10 = vld [vmem:[%s518_s2] ss:$0 sm:$0xff] (!%p139_p2) }
   0x8   : > { %402 = vmatprep.subr.bf16.mxu0 (!%p139_p2), %v447_v1 }
   0xb   : > { %403 = vmatpush3.bf16.msra.mxu0 (!%p139_p2), %v431_v2 }
   0xc   : > { %404 = vmatprep.subr.bf16.mxu0 (!%p139_p2), %v447_v1 }
   0xd   : > { %s521_s18 = smov (!%p163_p3, %s366_s18), 3 }
   0xe   : > { %s367_s21 = sshll.u32 %s521_s18, 2 }
   0xf   : > { %s166_s24 = scalar_lea.vmem %s516_s0, %s367_s21  ;;  %405 = vmatpush3.bf16.msra.mxu0 %v432_v3  ;;  %s172_s13 = scalar_lea.vmem %s519_s3, %s367_s21 }
  0x10   : > { %406 = vmatprep.subr.bf16.mxu0 %v447_v1  ;;  %v438_v9 = vld [vmem:[%s166_s24] sm:$0xff]  }
  0x13   : > { %407 = vmatpush3.bf16.msra.mxu0 %v433_v4 }
  0x14   : > { %408 = vmatprep.subr.bf16.mxu0 %v447_v1 }
  0x17   : > { %409 = vmatpush3.bf16.msra.mxu0 %v434_v5 }
  0x18   : > { %410 = vmatprep.subr.bf16.mxu0 %v447_v1 }
  0x1b   : > { %411 = vmatpush3.bf16.msra.mxu0 %v435_v6 }
  0x1c   : > { %412 = vmatprep.subr.bf16.mxu0 %v447_v1 }
  0x1f   : > { %413 = vmatpush3.bf16.msra.mxu0 %v436_v7 }
  0x20   : > { %414 = vmatprep.subr.bf16.mxu0 %v447_v1 }
  0x23   : > { %415 = vmatpush3.bf16.msra.mxu0 %v437_v8 }
  0x26   : > { %417 = vmatmul.mubr.bf16.vlgmr.msra.gmra.mrb[0].mxu0 %v438_v9 }
  0xf9   : > { %v288_v11 = vpop.f32.mrb[0].mxu0 }
  0xfa   : > { %v418_v12 = vpop.f32.mrb[1].mxu0  ;;  %v289_v14 = vadd.f32 %v370_v10, %v288_v11 }
  0xfb   : > { %v291_v13 = vpop.f32.mrb[2].mxu0 }
  0xfc   : > { %v292_v15 = vadd.f32 %v370_v10, %v291_v13  ;;  %v419_v16 = vpop.f32.mrb[3].mxu0 }
  0xfe   : > { %v389_v17 = vpack.c.bf16 %v292_v15, %v289_v14 }
 0x100   : > { %390 = vst [vmem:[%s172_s13] sm:$0xff] %v389_v17  }
 0x101 PF: > { %s13_s12 = sadd.s32 1, %s445_s12  }
 0x102   : > { %p10_p4 = scmp.ge.s32.totalorder %s13_s12, 4  }
 0x104   :  { %12 = sbr.rel (!%p10_p4) target bundleno = 1 (0x1), region = 62 }

// kernel: colorization_net_forward.21
= control target key start
LH: loop header
LB: loop body
LE: loop exit
PB: predicated region body
PF: predicated region fallthrough
CT: control target
= control target key end

     0   :  { %s804_s18 = smov 0   ;;  %s901_s0 = inlined_call_operand.vmem [shape: bf16[128,144], index: 0, kind: input, shape index: {}]   ;;  %s902_s1 = inlined_call_operand.vmem [shape: bf16[144,128], index: 1, kind: input, shape index: {}]   ;;  %s903_s2 = inlined_call_operand.vmem [shape: bf16[128,144], index: 2, kind: input, shape index: {}]   ;;  %s904_s3 = inlined_call_operand.vmem [shape: bf16[144,128], index: 3, kind: input, shape index: {}]   ;;  %s905_s4 = inlined_call_operand.vmem [shape: f32[1,128], index: 4, kind: input, shape index: {}]   ;;  %s906_s5 = inlined_call_operand.vmem [shape: bf16[128,128], index: 5, kind: output, shape index: {}]  }
   0x1 LB: > { %s659_s19 = sadd.s32 4294967295, %s771_s18   ;;  %p663_p0 = scmp.ge.s32.totalorder %s771_s18, 1  ;;  %s771_s18 = sphi %s804_s18, %s15_s18  }
   0x2   : > { %p201_p1 = scmp.lt.s32.totalorder %s771_s18, 5 }
   0x4   : > { %p202_p2 = pnand %p663_p0, %p201_p1 }
   0x5   : > { %v735_v0 = vld [vmem:[%s904_s3] sm:$0xff] (!%p202_p2)   ;;  %v773_v1 = vmov (!%p202_p2), 0   ;;  %v737_v3 = vld [vmem:[%s904_s3 + $0x8] sm:$0xff] (!%p202_p2)   ;;  %s664_s26 = sshll.u32 (!%p202_p2), %s659_s19, 2  ;;  %v739_v5 = vld [vmem:[%s904_s3 + $0x10] sm:$0xff] (!%p202_p2)   ;;  %vm373_vm0 = vcmask (!%p202_p2), 130048  }
   0x6   : > { %205 = sbr.rel (%p202_p2) target bundleno = 273 (0x111), region = 40  ;;  %380 = vmatprep.subr.bf16.mxu0 (!%p202_p2), %v773_v1  ;;  %507 = vmatprep.subr.bf16.mxu1 (!%p202_p2), %v773_v1  ;;  %v736_v2 = vld [vmem:[%s902_s1] sm:$0xff] (!%p202_p2)   ;;  %v738_v4 = vld [vmem:[%s902_s1 + $0x8] sm:$0xff] (!%p202_p2)   ;;  %p237_p3 = scmp.lt.s32.totalorder (!%p202_p2), %s664_s26, 15  ;;  %v740_v6 = vld [vmem:[%s902_s1 + $0x10] sm:$0xff] (!%p202_p2)  }
   0x7   : > { %381 = vmatpush1.bf16.msra.mxu0 (!%p202_p2), %v735_v0  ;;  %508 = vmatpush1.bf16.msra.mxu1 (!%p202_p2), %v736_v2  ;;  %v741_v7 = vld [vmem:[%s904_s3 + $0x18] sm:$0xff] (!%p202_p2)   ;;  %v743_v9 = vld [vmem:[%s904_s3 + $0x20] sm:$0xff] (!%p202_p2)   ;;  %v745_v11 = vld [vmem:[%s904_s3 + $0x28] sm:$0xff] (!%p202_p2)  }
   0x8   : > { %382 = vmatprep.subr.bf16.mxu0 (!%p202_p2), %v773_v1  ;;  %509 = vmatprep.subr.bf16.mxu1 (!%p202_p2), %v773_v1  ;;  %v742_v8 = vld [vmem:[%s902_s1 + $0x18] sm:$0xff] (!%p202_p2)   ;;  %v744_v10 = vld [vmem:[%s902_s1 + $0x20] sm:$0xff] (!%p202_p2)   ;;  %v746_v12 = vld [vmem:[%s902_s1 + $0x28] sm:$0xff] (!%p202_p2)  }
   0x9   : > { %v747_v15 = vld [vmem:[%s904_s3 + $0x30] sm:$0xff] (!%p202_p2)   ;;  %v749_v17 = vld [vmem:[%s904_s3 + $0x38] sm:$0xff] (!%p202_p2)   ;;  %v751_v19 = vld [vmem:[%s904_s3 + $0x40] sm:$0xff] (!%p202_p2)  }
   0xa   : > { %v748_v16 = vld [vmem:[%s902_s1 + $0x30] sm:$0xff] (!%p202_p2)   ;;  %v750_v18 = vld [vmem:[%s902_s1 + $0x38] sm:$0xff] (!%p202_p2)   ;;  %v752_v20 = vld [vmem:[%s902_s1 + $0x40] sm:$0xff] (!%p202_p2)  }
   0xb   : > { %383 = vmatpush1.bf16.msra.mxu0 (!%p202_p2), %v737_v3  ;;  %510 = vmatpush1.bf16.msra.mxu1 (!%p202_p2), %v738_v4  ;;  %v702_v29 = vld [vmem:[%s905_s4] ss:$0 sm:$0xff] (!%p202_p2) }
   0xc   : > { %384 = vmatprep.subr.bf16.mxu0 (!%p202_p2), %v773_v1  ;;  %511 = vmatprep.subr.bf16.mxu1 (!%p202_p2), %v773_v1 }
   0xd   : > { %s908_s26 = smov (!%p237_p3, %s664_s26), 15 }
   0xe   : > { %s709_s12 = sshll.u32 %s908_s26, 3  ;;  %s671_s19 = sshll.u32 %s908_s26, 2 }
   0xf   : > { %385 = vmatpush1.bf16.msra.mxu0 %v739_v5  ;;  %512 = vmatpush1.bf16.msra.mxu1 %v740_v6  ;;  %s848_s20 = scalar_lea.vmem %s903_s2, %s709_s12  ;;  %s856_s25 = scalar_lea.vmem %s901_s0, %s709_s12 }
  0x10   : > { %386 = vmatprep.subr.bf16.mxu0 %v773_v1  ;;  %513 = vmatprep.subr.bf16.mxu1 %v773_v1  ;;  %v755_v13 = vld [vmem:[%s848_s20 + $0x4] ss:$8 sps:$4 sm:$0xff]   ;;  %v753_v21 = vld [vmem:[%s848_s20] ss:$8 sps:$4 sm:$0xff]   ;;  %v759_v23 = vld [vmem:[%s848_s20 + $0x14] ss:$8 sps:$4 sm:$0xff]   ;;  %s254_s22 = scalar_lea.vmem %s906_s5, %s671_s19 }
  0x11   : > { %v758_v14 = vld [vmem:[%s856_s25 + $0x4] ss:$8 sps:$4 sm:$0xff]   ;;  %685 = vmatprep.mubr.msk.bf16.mxu0 %vm373_vm0, %v755_v13  ;;  %v756_v22 = vld [vmem:[%s856_s25] ss:$8 sps:$4 sm:$0xff]   ;;  %v761_v24 = vld [vmem:[%s856_s25 + $0x14] ss:$8 sps:$4 sm:$0xff]  }
  0x12   : > { %700 = vmatprep.mubr.msk.bf16.mxu1 %vm373_vm0, %v758_v14  ;;  %v763_v25 = vld [vmem:[%s848_s20 + $0x10] ss:$8 sps:$4 sm:$0xff]  }
  0x13   : > { %387 = vmatpush1.bf16.msra.mxu0 %v741_v7  ;;  %514 = vmatpush1.bf16.msra.mxu1 %v742_v8  ;;  %v764_v26 = vld [vmem:[%s856_s25 + $0x10] ss:$8 sps:$4 sm:$0xff]  }
  0x14   : > { %388 = vmatprep.subr.bf16.mxu0 %v773_v1  ;;  %515 = vmatprep.subr.bf16.mxu1 %v773_v1 }
  0x17   : > { %389 = vmatpush1.bf16.msra.mxu0 %v743_v9  ;;  %516 = vmatpush1.bf16.msra.mxu1 %v744_v10 }
  0x18   : > { %390 = vmatprep.subr.bf16.mxu0 %v773_v1  ;;  %517 = vmatprep.subr.bf16.mxu1 %v773_v1 }
  0x1b   : > { %391 = vmatpush1.bf16.msra.mxu0 %v745_v11  ;;  %518 = vmatpush1.bf16.msra.mxu1 %v746_v12 }
  0x1c   : > { %392 = vmatprep.subr.bf16.mxu0 %v773_v1  ;;  %519 = vmatprep.subr.bf16.mxu1 %v773_v1 }
  0x1f   : > { %393 = vmatpush1.bf16.msra.mxu0 %v747_v15  ;;  %520 = vmatpush1.bf16.msra.mxu1 %v748_v16 }
  0x20   : > { %394 = vmatprep.subr.bf16.mxu0 %v773_v1  ;;  %521 = vmatprep.subr.bf16.mxu1 %v773_v1 }
  0x23   : > { %395 = vmatpush1.bf16.msra.mxu0 %v749_v17  ;;  %522 = vmatpush1.bf16.msra.mxu1 %v750_v18 }
  0x24   : > { %396 = vmatprep.subr.bf16.mxu0 %v773_v1  ;;  %523 = vmatprep.subr.bf16.mxu1 %v773_v1 }
  0x27   : > { %397 = vmatpush1.bf16.msra.mxu0 %v751_v19  ;;  %524 = vmatpush1.bf16.msra.mxu1 %v752_v20 }
  0x2a   : > { %413 = vmatmul.mubr.bf16.vlgmr.msra.gmra.mrb[0].mxu0 %v753_v21  ;;  %540 = vmatmul.mubr.bf16.vlgmr.msra.gmra.mrb[0].mxu1 %v756_v22 }
  0x2b   : > { %686 = vmatprep.mubr.msk.bf16.mxu0 %vm373_vm0, %v759_v23  ;;  %701 = vmatprep.mubr.msk.bf16.mxu1 %vm373_vm0, %v761_v24 }
  0x32   : > { %421 = vmatmul.mubr.bf16.gmra.mrb[4].mxu0 %v763_v25  ;;  %548 = vmatmul.mubr.bf16.gmra.mrb[4].mxu1 %v764_v26 }
  0xfd   : > { %v414_v27 = vpop.f32.mrb[0].mxu0  ;;  %v541_v28 = vpop.f32.mrb[0].mxu1 }
  0xfe   : > { %v416_v30 = vpop.f32.mrb[1].mxu0  ;;  %v542_v31 = vadd.f32 %v541_v28, %v414_v27  ;;  %v543_v32 = vpop.f32.mrb[1].mxu1 }
  0xff   : > { %v417_v33 = vpop.f32.mrb[2].mxu0  ;;  %v544_v34 = vpop.f32.mrb[2].mxu1 }
 0x100   : > { %v419_v35 = vpop.f32.mrb[3].mxu0  ;;  %v563_v36 = vadd.f32 %v702_v29, %v542_v31  ;;  %v545_v37 = vadd.f32 %v544_v34, %v417_v33  ;;  %v546_v38 = vpop.f32.mrb[3].mxu1 }
 0x102   : > { %v564_v39 = vadd.f32 %v702_v29, %v545_v37  ;;  %v567_v40 = vmax.f32 %v563_v36, 0.0 }
 0x104   : > { %v568_v41 = vmax.f32 %v564_v39, 0.0 }
 0x105   : > { %v422_v42 = vpop.f32.mrb[4].mxu0  ;;  %v549_v43 = vpop.f32.mrb[4].mxu1 }
 0x106   : > { %v424_v44 = vpop.f32.mrb[5].mxu0  ;;  %v718_v45 = vpack.c.bf16 %v568_v41, %v567_v40  ;;  %v550_v46 = vadd.f32 %v549_v43, %v422_v42  ;;  %v551_v47 = vpop.f32.mrb[5].mxu1 }
 0x107   : > { %v425_v48 = vpop.f32.mrb[6].mxu0  ;;  %v552_v49 = vpop.f32.mrb[6].mxu1 }
 0x108   : > { %v427_v50 = vpop.f32.mrb[7].mxu0  ;;  %719 = vst [vmem:[%s254_s22] sm:$0xff] %v718_v45   ;;  %v565_v51 = vadd.f32 %v702_v29, %v550_v46  ;;  %v553_v52 = vadd.f32 %v552_v49, %v425_v48  ;;  %v554_v53 = vpop.f32.mrb[7].mxu1 }
 0x10a   : > { %v566_v54 = vadd.f32 %v702_v29, %v553_v52  ;;  %v569_v55 = vmax.f32 %v565_v51, 0.0 }
 0x10c   : > { %v570_v56 = vmax.f32 %v566_v54, 0.0 }
 0x10e   : > { %v723_v57 = vpack.c.bf16 %v570_v56, %v569_v55 }
 0x110   : > { %725 = vst [vmem:[%s254_s22 + $0x8] sm:$0xff] %v723_v57  }
 0x111 PF: > { %s15_s18 = sadd.s32 1, %s771_s18  }
 0x112   : > { %p12_p4 = scmp.ge.s32.totalorder %s15_s18, 6  }
 0x114   :  { %14 = sbr.rel (!%p12_p4) target bundleno = 1 (0x1), region = 73 }

// kernel: colorization_net_forward.22
= control target key start
LH: loop header
LB: loop body
LE: loop exit
PB: predicated region body
PF: predicated region fallthrough
CT: control target
= control target key end

     0   :  { %s459_s12 = smov 0   ;;  %s491_s0 = inlined_call_operand.vmem [shape: bf16[128,64], index: 0, kind: input, shape index: {}]   ;;  %s492_s1 = inlined_call_operand.vmem [shape: bf16[64,128], index: 1, kind: input, shape index: {}]   ;;  %s493_s2 = inlined_call_operand.vmem [shape: f32[1,128], index: 2, kind: input, shape index: {}]   ;;  %s494_s3 = inlined_call_operand.vmem [shape: bf16[128,128], index: 3, kind: output, shape index: {}]  }
   0x1 LB: > { %s360_s13 = sadd.s32 4294967295, %s437_s12   ;;  %p364_p0 = scmp.ge.s32.totalorder %s437_s12, 1  ;;  %s437_s12 = sphi %s459_s12, %s13_s12  }
   0x2   : > { %p138_p1 = scmp.lt.s32.totalorder %s437_s12, 5 }
   0x4   : > { %p139_p2 = pnand %p364_p0, %p138_p1 }
   0x5   : > { %v425_v0 = vld [vmem:[%s492_s1] sm:$0xff] (!%p139_p2)   ;;  %s365_s16 = sshll.u32 (!%p139_p2), %s360_s13, 2  ;;  %v426_v1 = vld [vmem:[%s492_s1 + $0x8] sm:$0xff] (!%p139_p2)   ;;  %v427_v2 = vld [vmem:[%s492_s1 + $0x10] sm:$0xff] (!%p139_p2)   ;;  %vm228_vm0 = vcmask (!%p139_p2), 523264  }
   0x6   : > { %142 = sbr.rel (%p139_p2) target bundleno = 242 (0xf2), region = 32  ;;  %p163_p3 = scmp.lt.s32.totalorder (!%p139_p2), %s365_s16, 15  ;;  %405 = vmatprep.subr.bf16.mxu0 (!%p139_p2), %v425_v0  ;;  %v428_v4 = vld [vmem:[%s492_s1 + $0x18] sm:$0xff] (!%p139_p2)   ;;  %v369_v7 = vld [vmem:[%s493_s2] ss:$0 sm:$0xff] (!%p139_p2) }
   0x7   : > { %406 = vmatpush3.bf16.msra.mxu0 (!%p139_p2), %v425_v0 }
   0x8   : > { %407 = vmatprep.subr.bf16.mxu0 (!%p139_p2), %v426_v1 }
   0xb   : > { %408 = vmatpush3.bf16.msra.mxu0 (!%p139_p2), %v426_v1 }
   0xc   : > { %409 = vmatprep.subr.bf16.mxu0 (!%p139_p2), %v427_v2 }
   0xd   : > { %s496_s16 = smov (!%p163_p3, %s365_s16), 15 }
   0xe   : > { %s366_s21 = sshll.u32 %s496_s16, 2 }
   0xf   : > { %s166_s24 = scalar_lea.vmem %s491_s0, %s366_s21  ;;  %410 = vmatpush3.bf16.msra.mxu0 %v427_v2  ;;  %s172_s4 = scalar_lea.vmem %s494_s3, %s366_s21 }
  0x10   : > { %v429_v3 = vld [vmem:[%s166_s24] sm:$0xff]   ;;  %411 = vmatprep.subr.bf16.mxu0 %v428_v4  ;;  %v430_v5 = vld [vmem:[%s166_s24 + $0x8] sm:$0xff]  }
  0x11   : > { %413 = vmatprep.mubr.msk.bf16.mxu0 %vm228_vm0, %v429_v3 }
  0x13   : > { %412 = vmatpush3.bf16.msra.mxu0 %v428_v4 }
  0x16   : > { %414 = vmatmul.mubr.msk.bf16.vlgmr.msra.gmra.mrb[0].mxu0 %vm228_vm0, %v430_v5 }
  0xe9   : > { %v415_v6 = vpop.f32.mrb[0].mxu0 }
  0xea   : > { %v269_v8 = vpop.f32.mrb[1].mxu0  ;;  %v278_v10 = vadd.f32 %v415_v6, %v369_v7 }
  0xeb   : > { %v416_v9 = vpop.f32.mrb[2].mxu0  ;;  %v270_v13 = vadd.f32 %v369_v7, %v269_v8 }
  0xec   : > { %v281_v11 = vadd.f32 %v416_v9, %v369_v7  ;;  %v272_v12 = vpop.f32.mrb[3].mxu0 }
  0xed   : > { %v273_v14 = vadd.f32 %v369_v7, %v272_v12 }
  0xee   : > { %v396_v15 = vpack.c.bf16 %v281_v11, %v278_v10 }
  0xef   : > { %v391_v16 = vpack.c.bf16 %v273_v14, %v270_v13 }
  0xf0   : > { %398 = vst [vmem:[%s172_s4 + $0x8] sm:$0xff] %v396_v15  }
  0xf1   : > { %392 = vst [vmem:[%s172_s4] sm:$0xff] %v391_v16  }
  0xf2 PF: > { %s13_s12 = sadd.s32 1, %s437_s12  }
  0xf3   : > { %p10_p4 = scmp.ge.s32.totalorder %s13_s12, 6  }
  0xf5   :  { %12 = sbr.rel (!%p10_p4) target bundleno = 1 (0x1), region = 62 }

// kernel: colorization_net_forward.23
= control target key start
LH: loop header
LB: loop body
LE: loop exit
PB: predicated region body
PF: predicated region fallthrough
CT: control target
= control target key end

     0   :  { %s1480_s24 = smov 0   ;;  %s1615_s0 = inlined_call_operand.vmem [shape: bf16[512,72], index: 0, kind: input, shape index: {}]   ;;  %s1616_s1 = inlined_call_operand.vmem [shape: bf16[72,128], index: 1, kind: input, shape index: {}]   ;;  %s1617_s2 = inlined_call_operand.vmem [shape: bf16[512,72], index: 2, kind: input, shape index: {}]   ;;  %s1618_s3 = inlined_call_operand.vmem [shape: bf16[72,128], index: 3, kind: input, shape index: {}]   ;;  %s1619_s4 = inlined_call_operand.vmem [shape: f32[1,128], index: 4, kind: input, shape index: {}]   ;;  %s1620_s5 = inlined_call_operand.vmem [shape: bf16[128,128], index: 5, kind: input, shape index: {}]   ;;  %s1621_s6 = inlined_call_operand.vmem [shape: f32[1,128], index: 6, kind: input, shape index: {}]   ;;  %s1622_s7 = inlined_call_operand.vmem [shape: bf16[512,128], index: 7, kind: output, shape index: {}]  }
   0x1 LB: > { %s1102_s25 = sadd.s32 4294967295, %s1438_s24   ;;  %p1106_p0 = scmp.ge.s32.totalorder %s1438_s24, 1  ;;  %s1438_s24 = sphi %s1480_s24, %s17_s24  }
   0x2   : > { %p249_p1 = scmp.lt.s32.totalorder %s1438_s24, 5 }
   0x4   : > { %p250_p2 = pnand %p1106_p0, %p249_p1 }
   0x5   : > { %v1398_v0 = vld [vmem:[%s1618_s3] sm:$0xff] (!%p250_p2)   ;;  %v1399_v1 = vld [vmem:[%s1618_s3 + $0x8] sm:$0xff] (!%p250_p2)   ;;  %s1107_s30 = sshll.u32 (!%p250_p2), %s1102_s25, 4  ;;  %v1400_v2 = vld [vmem:[%s1618_s3 + $0x10] sm:$0xff] (!%p250_p2)   ;;  %vm422_vm0 = vcmask (!%p250_p2), 588800   ;;  %vm447_vm1 = vcmask (!%p250_p2), 1043456  }
   0x6   : > { %253 = sbr.rel (%p250_p2) target bundleno = 524 (0x20c), region = 48  ;;  %1288 = vmatprep.subr.bf16.mxu0 (!%p250_p2), %v1398_v0  ;;  %p287_p3 = scmp.lt.s32.totalorder (!%p250_p2), %s1107_s30, 63  ;;  %v1401_v3 = vld [vmem:[%s1618_s3 + $0x18] sm:$0xff] (!%p250_p2)   ;;  %v1402_v5 = vld [vmem:[%s1618_s3 + $0x20] ss:$0 sps:$4 sm:$0xff] (!%p250_p2)   ;;  %v1407_v10 = vld [vmem:[%s1616_s1 + $0x8] sm:$0xff] (!%p250_p2)  }
   0x7   : > { %1289 = vmatpush3.bf16.msra.mxu0 (!%p250_p2), %v1398_v0  ;;  %v449_v6 = vsel (!%p250_p2), %vm447_vm1, %v1402_v5, 0  ;;  %v1405_v7 = vld [vmem:[%s1616_s1] sm:$0xff] (!%p250_p2)   ;;  %v1409_v11 = vld [vmem:[%s1616_s1 + $0x10] sm:$0xff] (!%p250_p2)   ;;  %v1425_v15 = vld [vmem:[%s1620_s5 + $0x8] sm:$0xff] (!%p250_p2)  }
   0x8   : > { %1290 = vmatprep.subr.bf16.mxu0 (!%p250_p2), %v1399_v1  ;;  %v1424_v14 = vld [vmem:[%s1620_s5] sm:$0xff] (!%p250_p2)   ;;  %v1412_v16 = vld [vmem:[%s1616_s1 + $0x18] sm:$0xff] (!%p250_p2)   ;;  %v1426_v17 = vld [vmem:[%s1620_s5 + $0x10] sm:$0xff] (!%p250_p2)  }
   0x9   : > { %1340 = vmatprep.subr.bf16.mxu1 (!%p250_p2), %v1424_v14  ;;  %v1415_v18 = vld [vmem:[%s1616_s1 + $0x20] ss:$0 sps:$4 sm:$0xff] (!%p250_p2)   ;;  %v1427_v20 = vld [vmem:[%s1620_s5 + $0x18] sm:$0xff] (!%p250_p2)   ;;  %v1429_v25 = vld [vmem:[%s1620_s5 + $0x28] sm:$0xff] (!%p250_p2)  }
   0xa   : > { %1341 = vmatpush3.bf16.msra.mxu1 (!%p250_p2), %v1424_v14  ;;  %v640_v22 = vsel (!%p250_p2), %vm447_vm1, %v1415_v18, 0  ;;  %v1428_v23 = vld [vmem:[%s1620_s5 + $0x20] sm:$0xff] (!%p250_p2)   ;;  %v1430_v34 = vld [vmem:[%s1620_s5 + $0x30] sm:$0xff] (!%p250_p2)   ;;  %v1431_v35 = vld [vmem:[%s1620_s5 + $0x38] sm:$0xff] (!%p250_p2)  }
   0xb   : > { %1291 = vmatpush3.bf16.msra.mxu0 (!%p250_p2), %v1399_v1  ;;  %1342 = vmatprep.subr.bf16.mxu1 (!%p250_p2), %v1425_v15  ;;  %v1155_v36 = vld [vmem:[%s1619_s4] ss:$0 sm:$0xff] (!%p250_p2) }
   0xc   : > { %1292 = vmatprep.subr.bf16.mxu0 (!%p250_p2), %v1400_v2 }
   0xd   : > { %s1624_s30 = smov (!%p287_p3, %s1107_s30), 63 }
   0xe   : > { %s1500_s12 = sshll.u32 %s1624_s30, 2  ;;  %1343 = vmatpush3.bf16.msra.mxu1 %v1425_v15 }
   0xf   : > { %s1506_s15 = scalar_lea.vmem %s1617_s2, %s1500_s12  ;;  %1293 = vmatpush3.bf16.msra.mxu0 %v1400_v2  ;;  %s1519_s20 = scalar_lea.vmem %s1615_s0, %s1500_s12  ;;  %1344 = vmatprep.subr.bf16.mxu1 %v1426_v17 }
  0x10   : > { %v1403_v4 = vld [vmem:[%s1506_s15] sm:$0xff]   ;;  %1294 = vmatprep.subr.bf16.mxu0 %v1401_v3  ;;  %v1404_v8 = vld [vmem:[%s1506_s15 + $0x8] sm:$0xff]   ;;  %v1406_v9 = vld [vmem:[%s1506_s15 + $0x10] sm:$0xff]   ;;  %s1602_s10 = scalar_lea.vmem %s1622_s7, %s1500_s12 }
  0x11   : > { %1298 = vmatprep.mubr.msk.bf16.mxu0 %vm422_vm0, %v1403_v4  ;;  %v1408_v12 = vld [vmem:[%s1506_s15 + $0x18] sm:$0xff]   ;;  %v1410_v13 = vld [vmem:[%s1506_s15 + $0x20] sm:$0xff]   ;;  %v1411_v19 = vld [vmem:[%s1506_s15 + $0x28] sm:$0xff]  }
  0x12   : > { %v1413_v21 = vld [vmem:[%s1506_s15 + $0x30] sm:$0xff]   ;;  %1345 = vmatpush3.bf16.msra.mxu1 %v1426_v17  ;;  %v1414_v24 = vld [vmem:[%s1506_s15 + $0x38] sm:$0xff]   ;;  %v1416_v26 = vld [vmem:[%s1519_s20] sm:$0xff]  }
  0x13   : > { %1295 = vmatpush3.bf16.msra.mxu0 %v1401_v3  ;;  %1346 = vmatprep.subr.bf16.mxu1 %v1427_v20  ;;  %v1417_v27 = vld [vmem:[%s1519_s20 + $0x8] sm:$0xff]   ;;  %v1418_v28 = vld [vmem:[%s1519_s20 + $0x10] sm:$0xff]   ;;  %v1419_v29 = vld [vmem:[%s1519_s20 + $0x18] sm:$0xff]  }
  0x14   : > { %1388 = vmatprep.subr.msk.bf16.mxu0 %vm447_vm1, %v1402_v5  ;;  %v1420_v30 = vld [vmem:[%s1519_s20 + $0x20] sm:$0xff]   ;;  %v1421_v31 = vld [vmem:[%s1519_s20 + $0x28] sm:$0xff]   ;;  %v1422_v32 = vld [vmem:[%s1519_s20 + $0x30] sm:$0xff]  }
  0x15   : > { %v1423_v33 = vld [vmem:[%s1519_s20 + $0x38] sm:$0xff]  }
  0x16   : > { %1347 = vmatpush3.bf16.msra.mxu1 %v1427_v20 }
  0x17   : > { %1297 = vmatpush3.bf16.msra.mxu0 %v449_v6  ;;  %1348 = vmatprep.subr.bf16.mxu1 %v1428_v23 }
  0x18   : > { %1314 = vmatprep.subr.bf16.mxu0 %v1405_v7 }
  0x1a   : > { %1299 = vmatmul.mubr.msk.bf16.vlgmr.msra.gmra.mrb[0].mxu0 %vm422_vm0, %v1404_v8  ;;  %1349 = vmatpush3.bf16.msra.mxu1 %v1428_v23 }
  0x1b   : > { %1315 = vmatpush3.bf16.msra.mxu0 %v1405_v7  ;;  %1302 = vmatprep.mubr.msk.bf16.mxu0 %vm422_vm0, %v1406_v9 }
  0x1c   : > { %1316 = vmatprep.subr.bf16.mxu0 %v1407_v10  ;;  %1350 = vmatprep.subr.bf16.mxu1 %v1429_v25 }
  0x1e   : > { %1351 = vmatpush3.bf16.msra.mxu1 %v1429_v25 }
  0x1f   : > { %1317 = vmatpush3.bf16.msra.mxu0 %v1407_v10  ;;  %1352 = vmatprep.subr.bf16.mxu1 %v1430_v34 }
  0x20   : > { %1318 = vmatprep.subr.bf16.mxu0 %v1409_v11 }
  0x22   : > { %1303 = vmatmul.mubr.msk.bf16.gmra.mrb[4].mxu0 %vm422_vm0, %v1408_v12  ;;  %1353 = vmatpush3.bf16.msra.mxu1 %v1430_v34 }
  0x23   : > { %1319 = vmatpush3.bf16.msra.mxu0 %v1409_v11  ;;  %1306 = vmatprep.mubr.msk.bf16.mxu0 %vm422_vm0, %v1410_v13 }
  0x24   : > { %1320 = vmatprep.subr.bf16.mxu0 %v1412_v16  ;;  %1354 = vmatprep.subr.bf16.mxu1 %v1431_v35 }
  0x26   : > { %1355 = vmatpush3.bf16.msra.mxu1 %v1431_v35 }
  0x27   : > { %1321 = vmatpush3.bf16.msra.mxu0 %v1412_v16 }
  0x28   : > { %1389 = vmatprep.subr.msk.bf16.mxu0 %vm447_vm1, %v1415_v18 }
  0x2a   : > { %1307 = vmatmul.mubr.msk.bf16.gmra.mrb[8].mxu0 %vm422_vm0, %v1411_v19 }
  0x2b   : > { %1310 = vmatprep.mubr.msk.bf16.mxu0 %vm422_vm0, %v1413_v21  ;;  %1323 = vmatpush3.bf16.msra.mxu0 %v640_v22 }
  0x32   : > { %1311 = vmatmul.mubr.msk.bf16.gmra.mrb[12].mxu0 %vm422_vm0, %v1414_v24 }
  0x33   : > { %1324 = vmatprep.mubr.msk.bf16.mxu0 %vm422_vm0, %v1416_v26 }
  0x3a   : > { %1325 = vmatmul.mubr.msk.bf16.vlgmr.msra.gmra.mrb[0].mxu0 %vm422_vm0, %v1417_v27 }
  0x3b   : > { %1328 = vmatprep.mubr.msk.bf16.mxu0 %vm422_vm0, %v1418_v28 }
  0x42   : > { %1329 = vmatmul.mubr.msk.bf16.gmra.mrb[4].mxu0 %vm422_vm0, %v1419_v29 }
  0x43   : > { %1332 = vmatprep.mubr.msk.bf16.mxu0 %vm422_vm0, %v1420_v30  ;;  %v1156_v30 = vld [vmem:[%s1621_s6] ss:$0 sm:$0xff] }
  0x4a   : > { %1333 = vmatmul.mubr.msk.bf16.gmra.mrb[8].mxu0 %vm422_vm0, %v1421_v31 }
  0x4b   : > { %1336 = vmatprep.mubr.msk.bf16.mxu0 %vm422_vm0, %v1422_v32 }
  0x52   : > { %1337 = vmatmul.mubr.msk.bf16.gmra.mrb[12].mxu0 %vm422_vm0, %v1423_v33 }
 0x10d   : > { %v1326_v37 = vpop.f32.mrb[0].mxu0 }
 0x10e   : > { %v748_v38 = vadd.f32 %v1326_v37, %v1155_v36  ;;  %v676_v39 = vpop.f32.mrb[1].mxu0 }
 0x10f   : > { %v746_v40 = vadd.f32 %v1155_v36, %v676_v39  ;;  %v1327_v41 = vpop.f32.mrb[2].mxu0 }
 0x110   : > { %v749_v42 = vadd.f32 %v1327_v41, %v1155_v36  ;;  %v679_v43 = vpop.f32.mrb[3].mxu0  ;;  %v764_v45 = vmax.f32 %v748_v38, 0.0 }
 0x111   : > { %v747_v44 = vadd.f32 %v1155_v36, %v679_v43  ;;  %v762_v47 = vmax.f32 %v746_v40, 0.0 }
 0x112   : > { %v765_v46 = vmax.f32 %v749_v42, 0.0 }
 0x113   : > { %v763_v48 = vmax.f32 %v747_v44, 0.0 }
 0x114   : > { %v779_v49 = vpack.c.bf16 %v765_v46, %v764_v45 }
 0x115   : > { %v1330_v50 = vpop.f32.mrb[4].mxu0  ;;  %v778_v51 = vpack.c.bf16 %v763_v48, %v762_v47 }
 0x116   : > { %v752_v52 = vadd.f32 %v1330_v50, %v1155_v36  ;;  %v692_v53 = vpop.f32.mrb[5].mxu0 }
 0x117   : > { %v750_v54 = vadd.f32 %v1155_v36, %v692_v53  ;;  %v1331_v55 = vpop.f32.mrb[6].mxu0  ;;  %1356 = vmatprep.mubr.bf16.mxu1 %v778_v51 }
 0x118   : > { %v753_v56 = vadd.f32 %v1331_v55, %v1155_v36  ;;  %v695_v57 = vpop.f32.mrb[7].mxu0  ;;  %1357 = vmatmul.mubr.bf16.vlgmr.msra.gmra.mrb[0].mxu1 %v779_v49  ;;  %v768_v59 = vmax.f32 %v752_v52, 0.0 }
 0x119   : > { %v751_v58 = vadd.f32 %v1155_v36, %v695_v57  ;;  %v766_v61 = vmax.f32 %v750_v54, 0.0 }
 0x11a   : > { %v769_v60 = vmax.f32 %v753_v56, 0.0 }
 0x11b   : > { %v767_v62 = vmax.f32 %v751_v58, 0.0 }
 0x11c   : > { %v781_v63 = vpack.c.bf16 %v769_v60, %v768_v59 }
 0x11d   : > { %v780_v0 = vpack.c.bf16 %v767_v62, %v766_v61  ;;  %v1334_v1 = vpop.f32.mrb[8].mxu0 }
 0x11e   : > { %v756_v2 = vadd.f32 %v1334_v1, %v1155_v36  ;;  %v708_v3 = vpop.f32.mrb[9].mxu0 }
 0x11f   : > { %v754_v4 = vadd.f32 %v1155_v36, %v708_v3  ;;  %v1335_v5 = vpop.f32.mrb[10].mxu0  ;;  %1360 = vmatprep.mubr.bf16.mxu1 %v780_v0 }
 0x120   : > { %v757_v6 = vadd.f32 %v1335_v5, %v1155_v36  ;;  %v711_v7 = vpop.f32.mrb[11].mxu0  ;;  %1361 = vmatmul.mubr.bf16.gmra.mrb[4].mxu1 %v781_v63  ;;  %v772_v9 = vmax.f32 %v756_v2, 0.0 }
 0x121   : > { %v755_v8 = vadd.f32 %v1155_v36, %v711_v7  ;;  %v770_v11 = vmax.f32 %v754_v4, 0.0 }
 0x122   : > { %v773_v10 = vmax.f32 %v757_v6, 0.0 }
 0x123   : > { %v771_v12 = vmax.f32 %v755_v8, 0.0 }
 0x124   : > { %v783_v13 = vpack.c.bf16 %v773_v10, %v772_v9 }
 0x125   : > { %v782_v14 = vpack.c.bf16 %v771_v12, %v770_v11  ;;  %v1338_v15 = vpop.f32.mrb[12].mxu0 }
 0x126   : > { %v760_v16 = vadd.f32 %v1338_v15, %v1155_v36  ;;  %v724_v17 = vpop.f32.mrb[13].mxu0 }
 0x127   : > { %v758_v18 = vadd.f32 %v1155_v36, %v724_v17  ;;  %v1339_v19 = vpop.f32.mrb[14].mxu0  ;;  %1364 = vmatprep.mubr.bf16.mxu1 %v782_v14 }
 0x128   : > { %v761_v20 = vadd.f32 %v1339_v19, %v1155_v36  ;;  %v727_v21 = vpop.f32.mrb[15].mxu0  ;;  %1365 = vmatmul.mubr.bf16.gmra.mrb[8].mxu1 %v783_v13  ;;  %v776_v23 = vmax.f32 %v760_v16, 0.0 }
 0x129   : > { %v759_v22 = vadd.f32 %v1155_v36, %v727_v21  ;;  %v774_v25 = vmax.f32 %v758_v18, 0.0 }
 0x12a   : > { %v777_v24 = vmax.f32 %v761_v20, 0.0 }
 0x12b   : > { %v775_v26 = vmax.f32 %v759_v22, 0.0 }
 0x12c   : > { %v785_v27 = vpack.c.bf16 %v777_v24, %v776_v23 }
 0x12d   : > { %v784_v28 = vpack.c.bf16 %v775_v26, %v774_v25 }
 0x12f   : > { %1368 = vmatprep.mubr.bf16.mxu1 %v784_v28 }
 0x130   : > { %1369 = vmatmul.mubr.bf16.gmra.mrb[12].mxu1 %v785_v27 }
 0x1eb   : > { %v1358_v29 = vpop.f32.mrb[0].mxu1 }
 0x1ec   : > { %v891_v31 = vpop.f32.mrb[1].mxu1  ;;  %v900_v33 = vadd.f32 %v1358_v29, %v1156_v30 }
 0x1ed   : > { %v1359_v32 = vpop.f32.mrb[2].mxu1  ;;  %v892_v36 = vadd.f32 %v1156_v30, %v891_v31 }
 0x1ee   : > { %v903_v34 = vadd.f32 %v1359_v32, %v1156_v30  ;;  %v894_v35 = vpop.f32.mrb[3].mxu1 }
 0x1ef   : > { %v895_v37 = vadd.f32 %v1156_v30, %v894_v35 }
 0x1f0   : > { %v1207_v38 = vpack.c.bf16 %v903_v34, %v900_v33 }
 0x1f1   : > { %v1202_v39 = vpack.c.bf16 %v895_v37, %v892_v36 }
 0x1f2   : > { %1239 = vst [vmem:[%s1602_s10 + $0x8] sm:$0xff] %v1207_v38  }
 0x1f3   : > { %1203 = vst [vmem:[%s1602_s10] sm:$0xff] %v1202_v39   ;;  %v1362_v40 = vpop.f32.mrb[4].mxu1 }
 0x1f4   : > { %v907_v41 = vpop.f32.mrb[5].mxu1  ;;  %v916_v43 = vadd.f32 %v1362_v40, %v1156_v30 }
 0x1f5   : > { %v1363_v42 = vpop.f32.mrb[6].mxu1  ;;  %v908_v46 = vadd.f32 %v1156_v30, %v907_v41 }
 0x1f6   : > { %v919_v44 = vadd.f32 %v1363_v42, %v1156_v30  ;;  %v910_v45 = vpop.f32.mrb[7].mxu1 }
 0x1f7   : > { %v911_v47 = vadd.f32 %v1156_v30, %v910_v45 }
 0x1f8   : > { %v1217_v48 = vpack.c.bf16 %v919_v44, %v916_v43 }
 0x1f9   : > { %v1212_v49 = vpack.c.bf16 %v911_v47, %v908_v46 }
 0x1fa   : > { %1241 = vst [vmem:[%s1602_s10 + $0x18] sm:$0xff] %v1217_v48  }
 0x1fb   : > { %1240 = vst [vmem:[%s1602_s10 + $0x10] sm:$0xff] %v1212_v49   ;;  %v1366_v50 = vpop.f32.mrb[8].mxu1 }
 0x1fc   : > { %v923_v51 = vpop.f32.mrb[9].mxu1  ;;  %v932_v53 = vadd.f32 %v1366_v50, %v1156_v30 }
 0x1fd   : > { %v1367_v52 = vpop.f32.mrb[10].mxu1  ;;  %v924_v56 = vadd.f32 %v1156_v30, %v923_v51 }
 0x1fe   : > { %v935_v54 = vadd.f32 %v1367_v52, %v1156_v30  ;;  %v926_v55 = vpop.f32.mrb[11].mxu1 }
 0x1ff   : > { %v927_v57 = vadd.f32 %v1156_v30, %v926_v55 }
 0x200   : > { %v1227_v58 = vpack.c.bf16 %v935_v54, %v932_v53 }
 0x201   : > { %v1222_v59 = vpack.c.bf16 %v927_v57, %v924_v56 }
 0x202   : > { %1243 = vst [vmem:[%s1602_s10 + $0x28] sm:$0xff] %v1227_v58  }
 0x203   : > { %1242 = vst [vmem:[%s1602_s10 + $0x20] sm:$0xff] %v1222_v59   ;;  %v1370_v60 = vpop.f32.mrb[12].mxu1 }
 0x204   : > { %v939_v61 = vpop.f32.mrb[13].mxu1  ;;  %v948_v63 = vadd.f32 %v1370_v60, %v1156_v30 }
 0x205   : > { %v1371_v62 = vpop.f32.mrb[14].mxu1  ;;  %v940_v2 = vadd.f32 %v1156_v30, %v939_v61 }
 0x206   : > { %v951_v0 = vadd.f32 %v1371_v62, %v1156_v30  ;;  %v942_v1 = vpop.f32.mrb[15].mxu1 }
 0x207   : > { %v943_v3 = vadd.f32 %v1156_v30, %v942_v1 }
 0x208   : > { %v1237_v4 = vpack.c.bf16 %v951_v0, %v948_v63 }
 0x209   : > { %v1232_v5 = vpack.c.bf16 %v943_v3, %v940_v2 }
 0x20a   : > { %1245 = vst [vmem:[%s1602_s10 + $0x38] sm:$0xff] %v1237_v4  }
 0x20b   : > { %1244 = vst [vmem:[%s1602_s10 + $0x30] sm:$0xff] %v1232_v5  }
 0x20c PF: > { %s17_s24 = sadd.s32 1, %s1438_s24  }
 0x20d   : > { %p14_p4 = scmp.ge.s32.totalorder %s17_s24, 6  }
 0x20f   :  { %16 = sbr.rel (!%p14_p4) target bundleno = 1 (0x1), region = 81 }

</bundles_post_ra>
